<compile_context>
chip_gen: v7x
topology: tpu7x:2x2x1
jax: 0.10.0
libtpu: 0.0.40
codegen_flags: <defaults>
</compile_context>

<pallas_src>
import functools

import jax
import jax.numpy as jnp
from jax.experimental import pallas as pl
from jax.experimental.pallas import tpu as pltpu

_EPS = 1e-5
_LANES = 128          # output-channel padding -> lane-dense stores
_TM_MAX = 1024        # cap on output rows computed per grid step


# --------------------------------------------------------------------------------------
# Kernel
# --------------------------------------------------------------------------------------
def _make_conv_kernel(w_row, tm, has_att, has_residual):
    """3x3 conv as 3 row-shifted matmuls; bias-initialised f32 acc, optional per-K-lane
    attention scale on the input taps, optional residual, ReLU epilogue."""

    def kernel(*refs):
        it = iter(refs)
        x_ref = next(it)                    # (tm + 2*w_row, K) bf16  halo tile
        w_ref = next(it)                    # (3, K, 128)      bf16  BN-folded weights
        b_ref = next(it)                    # (1, 128)         f32   BN-folded bias
        att_ref = next(it) if has_att else None       # (1, K) bf16
        r_ref = next(it) if has_residual else None    # (tm, 128) bf16
        o_ref = next(it)                    # (tm, 128)

        # Accumulator initialised from the bias (saves one VPU add per step).
        acc = jnp.broadcast_to(b_ref[...], o_ref.shape).astype(jnp.float32)
        for i in range(3):                               # the three kernel-row taps
            xs = x_ref[i * w_row:i * w_row + tm, :]      # static slice, (tm, K) bf16
            if has_att:
                xs = xs * att_ref[...]                   # fold channel attention into conv
            acc = acc + jnp.dot(xs, w_ref[i], preferred_element_type=jnp.float32)
        if has_residual:
            acc = acc + r_ref[...].astype(jnp.float32)
        o_ref[...] = jnp.maximum(acc, 0.0).astype(o_ref.dtype)

    return kernel


# --------------------------------------------------------------------------------------
# Host-side helpers
# --------------------------------------------------------------------------------------
def _tile_plan(n, m_valid, tm_max=_TM_MAX):
    """Static (m_tiles, tm, m_pad). Guarantees >= 2 parallel grid steps for the v7x megacore."""
    m_tiles = max(1, -(-m_valid // tm_max))
    if n * m_tiles < 2 and m_valid >= 16:
        m_tiles = 2
    tm = -(-m_valid // m_tiles)
    tm = ((tm + 7) // 8) * 8
    return m_tiles, tm, tm * m_tiles


def _lower_conv_input(x_nhwc, tm, m_tiles):
    """(N, H, W, C) -> (N, m_tiles, tm + 2*W, 3*C) bf16 halo-tiled column-tap layout.

    Spatial pad by 1, concatenate the 3 column taps along channels, then cut overlapping
    row windows of tm + 2*W rows per M tile so a 3x3/s1/p1 conv becomes three row-shifted
    matmuls (row stride = W) with only Blocked BlockSpec indexing."""
    n, h, w, c = x_nhwc.shape
    x = x_nhwc.astype(jnp.bfloat16)
    xp = jnp.pad(x, ((0, 0), (1, 1), (1, 1), (0, 0)))
    cols = [xp[:, :, j:j + w, :] for j in range(3)]                  # each (N, H+2, W, C)
    x3 = jnp.concatenate(cols, axis=-1).reshape(n, (h + 2) * w, 3 * c)
    rows = tm + 2 * w
    s = (h + 2) * w
    s_need = m_tiles * tm + 2 * w
    if s < s_need:
        x3 = jnp.pad(x3, ((0, 0), (0, s_need - s), (0, 0)))
    if m_tiles == 1:
        return x3[:, :rows, :].reshape(n, 1, rows, 3 * c)
    idx = jnp.arange(m_tiles)[:, None] * tm + jnp.arange(rows)[None, :]
    return jnp.take(x3, idx, axis=1)                                 # (N, m_tiles, rows, 3C)


def _fold_conv_bn(weight, conv_bias, gamma, beta, mean, var, *,
                  cin_pad, ci_offset, cout_pad, co_offset):
    """Fold inference BatchNorm into the conv weight/bias and lay out for the kernel.

    weight: (Cout, Cin, 3, 3).  Input channels are placed at [ci_offset, ci_offset+Cin)
    of cin_pad, output channels at [co_offset, co_offset+Cout) of cout_pad.
    Returns w3: (3, 3*cin_pad, cout_pad) bf16 and bias: (1, cout_pad) f32."""
    cout, cin, kh, kw = weight.shape
    scale = gamma * jax.lax.rsqrt(var + _EPS)                        # (Cout,)
    w = weight * scale[:, None, None, None]
    w = jnp.pad(w, ((0, 0), (ci_offset, cin_pad - ci_offset - cin), (0, 0), (0, 0)))
    w = jnp.transpose(w, (2, 3, 1, 0)).reshape(kh, kw * cin_pad, cout)   # [i, j*cin_pad+c, o]
    w = jnp.pad(w, ((0, 0), (0, 0), (co_offset, cout_pad - co_offset - cout)))
    b = beta - mean * scale
    if conv_bias is not None:
        b = b + conv_bias * scale
    b = jnp.pad(b, (co_offset, cout_pad - co_offset - cout)).reshape(1, cout_pad)
    return w.astype(jnp.bfloat16), b.astype(jnp.float32)


def _vmem_limit_bytes():
    """Generation-aware scoped-VMEM limit: ~48 MB on v7x (64 MiB physical), up to 100 MB
    on v5e/v6e (128 MiB physical)."""
    cap = 128 * 1024 * 1024
    try:
        cap = int(getattr(pltpu.get_tpu_info(), "vmem_capacity_bytes", cap))
    except Exception:
        pass
    return int(min(max(cap - 16 * 1024 * 1024, 32 * 1024 * 1024), 100 * 1024 * 1024))


def _conv3x3(x_nhwc, w3, bias, *, att=None, residual=None, out_dtype=jnp.float32):
    """Fused 3x3/s1/p1 conv + bias (+ channel-attention input scale) (+ residual) + ReLU.

    x_nhwc:  (N, H, W, Cin) activation (any float dtype; lowered to bf16)
    w3:      (3, 3*Cin, 128) bf16 BN-folded weights
    bias:    (1, 128) f32
    att:     optional (N, Cin) per-batch input-channel scale (folds fea_fuse = att * x)
    residual:optional (N, M, Cr) added before the ReLU (Cr <= 128)
    Returns (N, H*W, 128) in out_dtype."""
    n, h, w, cin = x_nhwc.shape
    m = h * w
    m_tiles, tm, m_pad = _tile_plan(n, m)
    x3 = _lower_conv_input(x_nhwc, tm, m_tiles)          # (N, m_tiles, tm+2w, 3*Cin) bf16
    k = 3 * cin
    cp = w3.shape[-1]
    rows = tm + 2 * w

    in_specs = [
        pl.BlockSpec((None, None, rows, k), lambda b, mi: (b, mi, 0, 0)),   # halo tile
        pl.BlockSpec((3, k, cp), lambda b, mi: (0, 0, 0)),                  # weights resident
        pl.BlockSpec((1, cp), lambda b, mi: (0, 0)),
    ]
    args = [x3, w3, bias]

    if att is not None:
        # Per-K-lane scale: the K layout is [col-tap j][channel c], so tile att x3.
        att3 = jnp.tile(att, (1, 3)).reshape(n, 1, k).astype(jnp.bfloat16)
        in_specs.append(pl.BlockSpec((None, 1, k), lambda b, mi: (b, 0, 0)))
        args.append(att3)

    if residual is not None:
        r = residual.astype(jnp.bfloat16)                # bf16 residual traffic
        if r.shape[-1] < cp:
            r = jnp.pad(r, ((0, 0), (0, 0), (0, cp - r.shape[-1])))
        if r.shape[1] < m_pad:
            r = jnp.pad(r, ((0, 0), (0, m_pad - r.shape[1]), (0, 0)))
        in_specs.append(pl.BlockSpec((None, tm, cp), lambda b, mi: (b, mi, 0)))
        args.append(r)

    kernel = _make_conv_kernel(w, tm, att is not None, residual is not None)

    out_itemsize = jnp.dtype(out_dtype).itemsize
    flops = 2 * n * m_pad * 3 * k * cp
    bytes_accessed = (x3.size * 2 + w3.size * 2 + bias.size * 4
                      + n * m_pad * cp * out_itemsize
                      + sum(a.size * a.dtype.itemsize for a in args[3:]))

    out = pl.pallas_call(
        kernel,
        out_shape=jax.ShapeDtypeStruct((n, m_pad, cp), out_dtype),
        grid=(n, m_tiles),
        in_specs=in_specs,
        out_specs=pl.BlockSpec((None, tm, cp), lambda b, mi: (b, mi, 0)),
        compiler_params=pltpu.CompilerParams(
            dimension_semantics=("parallel", "parallel"),
            vmem_limit_bytes=_vmem_limit_bytes()),
        cost_estimate=pl.CostEstimate(flops=int(flops), transcendentals=0,
                                      bytes_accessed=int(bytes_accessed)),
    )(*args)
    return out[:, :m, :]


# --------------------------------------------------------------------------------------
# BDRM forward
# --------------------------------------------------------------------------------------
@functools.partial(jax.jit, static_argnames=("downfactor",))
def bdrm_forward(params, in_high, in_low, downfactor=2):
    """BDRM forward.  in_high: (N, 64, df*H, df*W), in_low: (N, 64, H, W), NCHW f32.
    Returns (fea_out, att_ca, fea_ca) in NCHW, matching the PyTorch module."""
    n, c, h, w = in_low.shape
    m = h * w

    # NCHW -> NHWC once; everything inside stays NHWC.
    low = jnp.transpose(in_low, (0, 2, 3, 1)).astype(jnp.float32)          # (N, H, W, 64)
    high = jnp.transpose(in_high, (0, 2, 3, 1)).astype(jnp.float32)

    # --- F.max_pool2d(in_high, downfactor): tiny, memory-bound -> plain JAX ---
    df = downfactor
    nh, hh, wh, ch = high.shape
    high_p = high.reshape(nh, hh // df, df, wh // df, df, ch).max(axis=(2, 4))

    # --- cbr1 + cbr2 fused into ONE conv+BN+ReLU kernel producing fea_ca directly.
    # Inputs are concatenated channel-wise (128 ch); cbr1 weights see input [0,64) and
    # write output [0,64); cbr2 weights see input [64,128) and write output [64,128).
    w1, b1 = _fold_conv_bn(params["cbr1_w"], None, params["cbr1_gamma"],
                           params["cbr1_beta"], params["cbr1_mean"], params["cbr1_var"],
                           cin_pad=2 * c, ci_offset=0, cout_pad=_LANES, co_offset=0)
    w2, b2 = _fold_conv_bn(params["cbr2_w"], None, params["cbr2_gamma"],
                           params["cbr2_beta"], params["cbr2_mean"], params["cbr2_var"],
                           cin_pad=2 * c, ci_offset=c, cout_pad=_LANES, co_offset=c)
    w_cbr = w1 + w2                      # disjoint (input, output) blocks -> simple sum
    b_cbr = b1 + b2

    x_cat = jnp.concatenate([low, high_p], axis=-1)                         # (N, H, W, 128)
    fea_ca_p = _conv3x3(x_cat, w_cbr, b_cbr, out_dtype=jnp.bfloat16)        # (N, M, 128) bf16
    fea_ca_bf = fea_ca_p.reshape(n, h, w, 2 * c)                            # bf16 intermediate
    fea_ca = fea_ca_bf.astype(jnp.float32)                                  # module output

    # --- CAM channel attention (global pool + two 1x1 convs + softmax): plain JAX ---
    pooled = jnp.mean(fea_ca, axis=(1, 2))                                  # (N, 128)
    c_hid = params["ca_w1"].shape[0]
    w_ca1 = params["ca_w1"].reshape(c_hid, 2 * c)                           # (32, 128)
    w_ca2 = params["ca_w2"].reshape(2 * c, c_hid)                           # (128, 32)
    hid = jnp.maximum(pooled @ w_ca1.T + params["ca_b1"], 0.0)
    att = hid @ w_ca2.T + params["ca_b2"]                                   # (N, 128)
    att = jax.nn.softmax(att, axis=1)
    att = att - jnp.min(att)             # torch .min()/.max() are global reductions
    att = att / jnp.max(att)

    # --- final conv+BN+residual+ReLU with the attention folded into the kernel:
    # fea_fuse = att * fea_ca is never materialised; the kernel scales its input taps.
    w3, b3 = _fold_conv_bn(params["conv_w"], params["conv_b"], params["bn_gamma"],
                           params["bn_beta"], params["bn_mean"], params["bn_var"],
                           cin_pad=2 * c, ci_offset=0, cout_pad=_LANES, co_offset=0)
    res = low.reshape(n, m, c)                                              # in_low residual
    fea_out_p = _conv3x3(fea_ca_bf, w3, b3, att=att, residual=res,
                         out_dtype=jnp.float32)                             # (N, M, 128)
    fea_out = fea_out_p[:, :, :c].reshape(n, h, w, c)

    # Back to NCHW only at the module boundary.
    return (jnp.transpose(fea_out, (0, 3, 1, 2)),
            att[:, :, None, None],
            jnp.transpose(fea_ca, (0, 3, 1, 2)))


# --------------------------------------------------------------------------------------
# Pure-JAX reference (eval-mode BN) for correctness checking
# --------------------------------------------------------------------------------------
def _reference_bdrm(params, in_high, in_low, downfactor=2):
    def conv(x, w, pad):
        return jax.lax.conv_general_dilated(
            x, w, window_strides=(1, 1),
            padding=[(pad, pad), (pad, pad)],
            dimension_numbers=("NCHW", "OIHW", "NCHW"))

    def bn(x, g, b, mu, var):
        inv = jax.lax.rsqrt(var + _EPS)
        return (x - mu[None, :, None, None]) * (g * inv)[None, :, None, None] \
            + b[None, :, None, None]

    n, c, hh, wh = in_high.shape
    df = downfactor
    pooled_high = in_high.reshape(n, c, hh // df, df, wh // df, df).max(axis=(3, 5))

    fea_low = jnp.maximum(bn(conv(in_low, params["cbr1_w"], 1), params["cbr1_gamma"],
                             params["cbr1_beta"], params["cbr1_mean"],
                             params["cbr1_var"]), 0.0)
    fea_h2l = jnp.maximum(bn(conv(pooled_high, params["cbr2_w"], 1), params["cbr2_gamma"],
                             params["cbr2_beta"], params["cbr2_mean"],
                             params["cbr2_var"]), 0.0)
    fea_ca = jnp.concatenate([fea_low, fea_h2l], axis=1)

    pooled = jnp.mean(fea_ca, axis=(2, 3), keepdims=True)                  # (N, 128, 1, 1)
    hid = jnp.maximum(conv(pooled, params["ca_w1"], 0)
                      + params["ca_b1"][None, :, None, None], 0.0)
    att = conv(hid, params["ca_w2"], 0) + params["ca_b2"][None, :, None, None]
    att = jax.nn.softmax(att, axis=1)
    att = att - att.min()
    att = att / att.max()

    fea_fuse = att * fea_ca
    y = conv(fea_fuse, params["conv_w"], 1) + params["conv_b"][None, :, None, None]
    y = bn(y, params["bn_gamma"], params["bn_beta"], params["bn_mean"], params["bn_var"])
    fea_out = jnp.maximum(y + in_low, 0.0)
    return fea_out, att, fea_ca


if __name__ == "__main__":
    key = jax.random.PRNGKey(0)
    ks = jax.random.split(key, 10)

    N, C, H, W = 2, 64, 16, 16               # channel count is fixed to 64 by BDRM
    in_low = jax.random.normal(ks[0], (N, C, H, W), dtype=jnp.float32)
    in_high = jax.random.normal(ks[1], (N, C, 2 * H, 2 * W), dtype=jnp.float32)

    params = {
        "cbr1_w": 0.1 * jax.random.normal(ks[2], (C, C, 3, 3), dtype=jnp.float32),
        "cbr1_gamma": jnp.linspace(0.5, 1.5, C, dtype=jnp.float32),
        "cbr1_beta": jnp.linspace(-0.1, 0.1, C, dtype=jnp.float32),
        "cbr1_mean": jnp.linspace(-0.05, 0.05, C, dtype=jnp.float32),
        "cbr1_var": jnp.linspace(0.9, 1.1, C, dtype=jnp.float32),
        "cbr2_w": 0.1 * jax.random.normal(ks[3], (C, C, 3, 3), dtype=jnp.float32),
        "cbr2_gamma": jnp.linspace(1.2, 0.8, C, dtype=jnp.float32),
        "cbr2_beta": jnp.linspace(0.1, -0.1, C, dtype=jnp.float32),
        "cbr2_mean": jnp.linspace(0.05, -0.05, C, dtype=jnp.float32),
        "cbr2_var": jnp.linspace(1.1, 0.9, C, dtype=jnp.float32),
        "ca_w1": 0.1 * jax.random.normal(ks[4], (2 * C // 4, 2 * C, 1, 1), dtype=jnp.float32),
        "ca_b1": 0.05 * jax.random.normal(ks[5], (2 * C // 4,), dtype=jnp.float32),
        "ca_w2": 0.1 * jax.random.normal(ks[6], (2 * C, 2 * C // 4, 1, 1), dtype=jnp.float32),
        "ca_b2": 0.05 * jax.random.normal(ks[7], (2 * C,), dtype=jnp.float32),
        "conv_w": 0.1 * jax.random.normal(ks[8], (C, 2 * C, 3, 3), dtype=jnp.float32),
        "conv_b": 0.05 * jax.random.normal(ks[9], (C,), dtype=jnp.float32),
        "bn_gamma": jnp.linspace(0.9, 1.1, C, dtype=jnp.float32),
        "bn_beta": jnp.linspace(-0.2, 0.2, C, dtype=jnp.float32),
        "bn_mean": jnp.linspace(-0.1, 0.1, C, dtype=jnp.float32),
        "bn_var": jnp.linspace(0.8, 1.2, C, dtype=jnp.float32),
    }

    fea_out, att_ca, fea_ca = bdrm_forward(params, in_high, in_low)
    jax.block_until_ready((fea_out, att_ca, fea_ca))

    assert fea_out.shape == (N, C, H, W)
    assert att_ca.shape == (N, 2 * C, 1, 1)
    assert fea_ca.shape == (N, 2 * C, H, W)

    # Sanity check against a pure-JAX f32 reference (kernel uses bf16 operands and bf16
    # intermediates with f32 accumulation, hence the generous tolerances).
    ref_out, ref_att, ref_ca = _reference_bdrm(params, in_high, in_low)
    ca_err = float(jnp.max(jnp.abs(fea_ca - ref_ca)))
    att_err = float(jnp.max(jnp.abs(att_ca - ref_att)))
    out_err = float(jnp.max(jnp.abs(fea_out - ref_out)))
    assert jnp.allclose(fea_ca, ref_ca, atol=1e-1, rtol=5e-2), ca_err
    assert jnp.allclose(att_ca, ref_att, atol=5e-2, rtol=5e-2), att_err
    assert jnp.allclose(fea_out, ref_out, atol=2e-1, rtol=5e-2), out_err

    print("KERNEL_OK")
</pallas_src>

<mosaic_0001>
module attributes {stable_mosaic.version = 11 : i64} {
  func.func @kernel(%arg0: i32, %arg1: i32, %arg2: memref<1x1x288x384xbf16, #tpu.memory_space<vmem>>, %arg3: memref<3x384x128xbf16, #tpu.memory_space<vmem>>, %arg4: memref<1x128xf32, #tpu.memory_space<vmem>>, %arg5: memref<1x256x128xbf16, #tpu.memory_space<vmem>>) attributes {dimension_semantics = [#tpu.dimension_semantics<parallel>, #tpu.dimension_semantics<parallel>], iteration_bounds = array<i64: 2, 1>, scalar_prefetch = 0 : i64, scratch_operands = 0 : i64, tpu.core_type = #tpu.core_type<tc>, window_params = [{transform_indices = @transform_0, window_bounds = array<i64: 1, 1, 288, 384>}, {pipeline_mode = #tpu.pipeline_mode<synchronous>, transform_indices = @transform_1, window_bounds = array<i64: 3, 384, 128>}, {pipeline_mode = #tpu.pipeline_mode<synchronous>, transform_indices = @transform_2, window_bounds = array<i64: 1, 128>}, {transform_indices = @transform_3, window_bounds = array<i64: 1, 256, 128>}]} {
    %c0 = arith.constant 0 : index
    %c0_0 = arith.constant 0 : index
    %0 = vector.load %arg4[%c0, %c0_0] : memref<1x128xf32, #tpu.memory_space<vmem>>, vector<1x128xf32>
    %1 = vector.shape_cast %0 : vector<1x128xf32> to vector<1x128xf32>
    %2 = vector.broadcast %1 : vector<1x128xf32> to vector<256x128xf32>
    %c0_1 = arith.constant 0 : index
    %c0_2 = arith.constant 0 : index
    %c0_3 = arith.constant 0 : index
    %c0_4 = arith.constant 0 : index
    %3 = vector.load %arg2[%c0_1, %c0_2, %c0_3, %c0_4] : memref<1x1x288x384xbf16, #tpu.memory_space<vmem>>, vector<1x1x256x384xbf16>
    %4 = vector.shape_cast %3 : vector<1x1x256x384xbf16> to vector<256x384xbf16>
    %c0_5 = arith.constant 0 : index
    %c0_6 = arith.constant 0 : index
    %c0_7 = arith.constant 0 : index
    %5 = vector.load %arg3[%c0_5, %c0_6, %c0_7] : memref<3x384x128xbf16, #tpu.memory_space<vmem>>, vector<1x384x128xbf16>
    %6 = vector.shape_cast %5 : vector<1x384x128xbf16> to vector<384x128xbf16>
    %cst = arith.constant dense<0.000000e+00> : vector<256x128xf32>
    %7 = tpu.matmul %4, %6, %cst {dimension_numbers = #tpu.dot_dimension_numbers<[1], [0], [0], [1], [0, 0, 1, 1], [], []>} : vector<256x384xbf16>, vector<384x128xbf16>, vector<256x128xf32> -> vector<256x128xf32>
    %8 = arith.addf %2, %7 : vector<256x128xf32>
    %c0_8 = arith.constant 0 : index
    %c0_9 = arith.constant 0 : index
    %c16 = arith.constant 16 : index
    %c0_10 = arith.constant 0 : index
    %9 = vector.load %arg2[%c0_8, %c0_9, %c16, %c0_10] : memref<1x1x288x384xbf16, #tpu.memory_space<vmem>>, vector<1x1x256x384xbf16>
    %10 = vector.shape_cast %9 : vector<1x1x256x384xbf16> to vector<256x384xbf16>
    %c1 = arith.constant 1 : index
    %c0_11 = arith.constant 0 : index
    %c0_12 = arith.constant 0 : index
    %11 = vector.load %arg3[%c1, %c0_11, %c0_12] : memref<3x384x128xbf16, #tpu.memory_space<vmem>>, vector<1x384x128xbf16>
    %12 = vector.shape_cast %11 : vector<1x384x128xbf16> to vector<384x128xbf16>
    %cst_13 = arith.constant dense<0.000000e+00> : vector<256x128xf32>
    %13 = tpu.matmul %10, %12, %cst_13 {dimension_numbers = #tpu.dot_dimension_numbers<[1], [0], [0], [1], [0, 0, 1, 1], [], []>} : vector<256x384xbf16>, vector<384x128xbf16>, vector<256x128xf32> -> vector<256x128xf32>
    %14 = arith.addf %8, %13 : vector<256x128xf32>
    %c0_14 = arith.constant 0 : index
    %c0_15 = arith.constant 0 : index
    %c32 = arith.constant 32 : index
    %c0_16 = arith.constant 0 : index
    %15 = vector.load %arg2[%c0_14, %c0_15, %c32, %c0_16] : memref<1x1x288x384xbf16, #tpu.memory_space<vmem>>, vector<1x1x256x384xbf16>
    %16 = vector.shape_cast %15 : vector<1x1x256x384xbf16> to vector<256x384xbf16>
    %c2 = arith.constant 2 : index
    %c0_17 = arith.constant 0 : index
    %c0_18 = arith.constant 0 : index
    %17 = vector.load %arg3[%c2, %c0_17, %c0_18] : memref<3x384x128xbf16, #tpu.memory_space<vmem>>, vector<1x384x128xbf16>
    %18 = vector.shape_cast %17 : vector<1x384x128xbf16> to vector<384x128xbf16>
    %cst_19 = arith.constant dense<0.000000e+00> : vector<256x128xf32>
    %19 = tpu.matmul %16, %18, %cst_19 {dimension_numbers = #tpu.dot_dimension_numbers<[1], [0], [0], [1], [0, 0, 1, 1], [], []>} : vector<256x384xbf16>, vector<384x128xbf16>, vector<256x128xf32> -> vector<256x128xf32>
    %20 = arith.addf %14, %19 : vector<256x128xf32>
    %cst_20 = arith.constant 0.000000e+00 : f32
    %21 = vector.broadcast %cst_20 : f32 to vector<256x128xf32>
    %22 = arith.maximumf %20, %21 : vector<256x128xf32>
    %23 = arith.truncf %22 : vector<256x128xf32> to vector<256x128xbf16>
    %c0_21 = arith.constant 0 : index
    %c0_22 = arith.constant 0 : index
    %c0_23 = arith.constant 0 : index
    %24 = vector.load %arg5[%c0_21, %c0_22, %c0_23] : memref<1x256x128xbf16, #tpu.memory_space<vmem>>, vector<1x256x128xbf16>
    %25 = vector.shape_cast %24 : vector<1x256x128xbf16> to vector<256x128xbf16>
    %26 = vector.shape_cast %23 : vector<256x128xbf16> to vector<1x256x128xbf16>
    tpu.vector_store %arg5[%c0_21, %c0_22, %c0_23], %26 {strides = array<i32>} : memref<1x256x128xbf16, #tpu.memory_space<vmem>>, vector<1x256x128xbf16>,
    return
  }
  func.func @transform_0(%arg0: i32, %arg1: i32) -> (i32, i32, i32, i32) {
    %c0_i32 = arith.constant 0 : i32
    %c0_i32_0 = arith.constant 0 : i32
    %c0_i32_1 = arith.constant 0 : i32
    return %arg0, %arg1, %c0_i32, %c0_i32_0 : i32, i32, i32, i32
  }
  func.func @transform_1(%arg0: i32, %arg1: i32) -> (i32, i32, i32) {
    %c0_i32 = arith.constant 0 : i32
    %c0_i32_0 = arith.constant 0 : i32
    %c0_i32_1 = arith.constant 0 : i32
    %c0_i32_2 = arith.constant 0 : i32
    return %c0_i32, %c0_i32_0, %c0_i32_1 : i32, i32, i32
  }
  func.func @transform_2(%arg0: i32, %arg1: i32) -> (i32, i32) {
    %c0_i32 = arith.constant 0 : i32
    %c0_i32_0 = arith.constant 0 : i32
    %c0_i32_1 = arith.constant 0 : i32
    return %c0_i32, %c0_i32_0 : i32, i32
  }
  func.func @transform_3(%arg0: i32, %arg1: i32) -> (i32, i32, i32) {
    %c0_i32 = arith.constant 0 : i32
    %c0_i32_0 = arith.constant 0 : i32
    return %arg0, %arg1, %c0_i32 : i32, i32, i32
  }
}

module attributes {stable_mosaic.version = 11 : i64} {
  func.func @kernel(%arg0: i32, %arg1: i32, %arg2: memref<1x1x288x384xbf16, #tpu.memory_space<vmem>>, %arg3: memref<3x384x128xbf16, #tpu.memory_space<vmem>>, %arg4: memref<1x128xf32, #tpu.memory_space<vmem>>, %arg5: memref<1x1x384xbf16, #tpu.memory_space<vmem>>, %arg6: memref<1x256x128xbf16, #tpu.memory_space<vmem>>, %arg7: memref<1x256x128xf32, #tpu.memory_space<vmem>>) attributes {dimension_semantics = [#tpu.dimension_semantics<parallel>, #tpu.dimension_semantics<parallel>], iteration_bounds = array<i64: 2, 1>, scalar_prefetch = 0 : i64, scratch_operands = 0 : i64, tpu.core_type = #tpu.core_type<tc>, window_params = [{transform_indices = @transform_0, window_bounds = array<i64: 1, 1, 288, 384>}, {pipeline_mode = #tpu.pipeline_mode<synchronous>, transform_indices = @transform_1, window_bounds = array<i64: 3, 384, 128>}, {pipeline_mode = #tpu.pipeline_mode<synchronous>, transform_indices = @transform_2, window_bounds = array<i64: 1, 128>}, {transform_indices = @transform_3, window_bounds = array<i64: 1, 1, 384>}, {transform_indices = @transform_4, window_bounds = array<i64: 1, 256, 128>}, {transform_indices = @transform_5, window_bounds = array<i64: 1, 256, 128>}]} {
    %c0 = arith.constant 0 : index
    %c0_0 = arith.constant 0 : index
    %0 = vector.load %arg4[%c0, %c0_0] : memref<1x128xf32, #tpu.memory_space<vmem>>, vector<1x128xf32>
    %1 = vector.shape_cast %0 : vector<1x128xf32> to vector<1x128xf32>
    %2 = vector.broadcast %1 : vector<1x128xf32> to vector<256x128xf32>
    %c0_1 = arith.constant 0 : index
    %c0_2 = arith.constant 0 : index
    %c0_3 = arith.constant 0 : index
    %c0_4 = arith.constant 0 : index
    %3 = vector.load %arg2[%c0_1, %c0_2, %c0_3, %c0_4] : memref<1x1x288x384xbf16, #tpu.memory_space<vmem>>, vector<1x1x256x384xbf16>
    %4 = vector.shape_cast %3 : vector<1x1x256x384xbf16> to vector<256x384xbf16>
    %c0_5 = arith.constant 0 : index
    %c0_6 = arith.constant 0 : index
    %c0_7 = arith.constant 0 : index
    %5 = vector.load %arg5[%c0_5, %c0_6, %c0_7] : memref<1x1x384xbf16, #tpu.memory_space<vmem>>, vector<1x1x384xbf16>
    %6 = vector.shape_cast %5 : vector<1x1x384xbf16> to vector<1x384xbf16>
    %7 = vector.broadcast %6 : vector<1x384xbf16> to vector<256x384xbf16>
    %8 = arith.mulf %4, %7 : vector<256x384xbf16>
    %c0_8 = arith.constant 0 : index
    %c0_9 = arith.constant 0 : index
    %c0_10 = arith.constant 0 : index
    %9 = vector.load %arg3[%c0_8, %c0_9, %c0_10] : memref<3x384x128xbf16, #tpu.memory_space<vmem>>, vector<1x384x128xbf16>
    %10 = vector.shape_cast %9 : vector<1x384x128xbf16> to vector<384x128xbf16>
    %cst = arith.constant dense<0.000000e+00> : vector<256x128xf32>
    %11 = tpu.matmul %8, %10, %cst {dimension_numbers = #tpu.dot_dimension_numbers<[1], [0], [0], [1], [0, 0, 1, 1], [], []>} : vector<256x384xbf16>, vector<384x128xbf16>, vector<256x128xf32> -> vector<256x128xf32>
    %12 = arith.addf %2, %11 : vector<256x128xf32>
    %c0_11 = arith.constant 0 : index
    %c0_12 = arith.constant 0 : index
    %c16 = arith.constant 16 : index
    %c0_13 = arith.constant 0 : index
    %13 = vector.load %arg2[%c0_11, %c0_12, %c16, %c0_13] : memref<1x1x288x384xbf16, #tpu.memory_space<vmem>>, vector<1x1x256x384xbf16>
    %14 = vector.shape_cast %13 : vector<1x1x256x384xbf16> to vector<256x384xbf16>
    %c0_14 = arith.constant 0 : index
    %c0_15 = arith.constant 0 : index
    %c0_16 = arith.constant 0 : index
    %15 = vector.load %arg5[%c0_14, %c0_15, %c0_16] : memref<1x1x384xbf16, #tpu.memory_space<vmem>>, vector<1x1x384xbf16>
    %16 = vector.shape_cast %15 : vector<1x1x384xbf16> to vector<1x384xbf16>
    %17 = vector.broadcast %16 : vector<1x384xbf16> to vector<256x384xbf16>
    %18 = arith.mulf %14, %17 : vector<256x384xbf16>
    %c1 = arith.constant 1 : index
    %c0_17 = arith.constant 0 : index
    %c0_18 = arith.constant 0 : index
    %19 = vector.load %arg3[%c1, %c0_17, %c0_18] : memref<3x384x128xbf16, #tpu.memory_space<vmem>>, vector<1x384x128xbf16>
    %20 = vector.shape_cast %19 : vector<1x384x128xbf16> to vector<384x128xbf16>
    %cst_19 = arith.constant dense<0.000000e+00> : vector<256x128xf32>
    %21 = tpu.matmul %18, %20, %cst_19 {dimension_numbers = #tpu.dot_dimension_numbers<[1], [0], [0], [1], [0, 0, 1, 1], [], []>} : vector<256x384xbf16>, vector<384x128xbf16>, vector<256x128xf32> -> vector<256x128xf32>
    %22 = arith.addf %12, %21 : vector<256x128xf32>
    %c0_20 = arith.constant 0 : index
    %c0_21 = arith.constant 0 : index
    %c32 = arith.constant 32 : index
    %c0_22 = arith.constant 0 : index
    %23 = vector.load %arg2[%c0_20, %c0_21, %c32, %c0_22] : memref<1x1x288x384xbf16, #tpu.memory_space<vmem>>, vector<1x1x256x384xbf16>
    %24 = vector.shape_cast %23 : vector<1x1x256x384xbf16> to vector<256x384xbf16>
    %c0_23 = arith.constant 0 : index
    %c0_24 = arith.constant 0 : index
    %c0_25 = arith.constant 0 : index
    %25 = vector.load %arg5[%c0_23, %c0_24, %c0_25] : memref<1x1x384xbf16, #tpu.memory_space<vmem>>, vector<1x1x384xbf16>
    %26 = vector.shape_cast %25 : vector<1x1x384xbf16> to vector<1x384xbf16>
    %27 = vector.broadcast %26 : vector<1x384xbf16> to vector<256x384xbf16>
    %28 = arith.mulf %24, %27 : vector<256x384xbf16>
    %c2 = arith.constant 2 : index
    %c0_26 = arith.constant 0 : index
    %c0_27 = arith.constant 0 : index
    %29 = vector.load %arg3[%c2, %c0_26, %c0_27] : memref<3x384x128xbf16, #tpu.memory_space<vmem>>, vector<1x384x128xbf16>
    %30 = vector.shape_cast %29 : vector<1x384x128xbf16> to vector<384x128xbf16>
    %cst_28 = arith.constant dense<0.000000e+00> : vector<256x128xf32>
    %31 = tpu.matmul %28, %30, %cst_28 {dimension_numbers = #tpu.dot_dimension_numbers<[1], [0], [0], [1], [0, 0, 1, 1], [], []>} : vector<256x384xbf16>, vector<384x128xbf16>, vector<256x128xf32> -> vector<256x128xf32>
    %32 = arith.addf %22, %31 : vector<256x128xf32>
    %c0_29 = arith.constant 0 : index
    %c0_30 = arith.constant 0 : index
    %c0_31 = arith.constant 0 : index
    %33 = vector.load %arg6[%c0_29, %c0_30, %c0_31] : memref<1x256x128xbf16, #tpu.memory_space<vmem>>, vector<1x256x128xbf16>
    %34 = vector.shape_cast %33 : vector<1x256x128xbf16> to vector<256x128xbf16>
    %35 = arith.extf %34 : vector<256x128xbf16> to vector<256x128xf32>
    %36 = arith.addf %32, %35 : vector<256x128xf32>
    %cst_32 = arith.constant 0.000000e+00 : f32
    %37 = vector.broadcast %cst_32 : f32 to vector<256x128xf32>
    %38 = arith.maximumf %36, %37 : vector<256x128xf32>
    %c0_33 = arith.constant 0 : index
    %c0_34 = arith.constant 0 : index
    %c0_35 = arith.constant 0 : index
    %39 = vector.load %arg7[%c0_33, %c0_34, %c0_35] : memref<1x256x128xf32, #tpu.memory_space<vmem>>, vector<1x256x128xf32>
    %40 = vector.shape_cast %39 : vector<1x256x128xf32> to vector<256x128xf32>
    %41 = vector.shape_cast %38 : vector<256x128xf32> to vector<1x256x128xf32>
    tpu.vector_store %arg7[%c0_33, %c0_34, %c0_35], %41 {strides = array<i32>} : memref<1x256x128xf32, #tpu.memory_space<vmem>>, vector<1x256x128xf32>,
    return
  }
  func.func @transform_0(%arg0: i32, %arg1: i32) -> (i32, i32, i32, i32) {
    %c0_i32 = arith.constant 0 : i32
    %c0_i32_0 = arith.constant 0 : i32
    %c0_i32_1 = arith.constant 0 : i32
    return %arg0, %arg1, %c0_i32, %c0_i32_0 : i32, i32, i32, i32
  }
  func.func @transform_1(%arg0: i32, %arg1: i32) -> (i32, i32, i32) {
    %c0_i32 = arith.constant 0 : i32
    %c0_i32_0 = arith.constant 0 : i32
    %c0_i32_1 = arith.constant 0 : i32
    %c0_i32_2 = arith.constant 0 : i32
    return %c0_i32, %c0_i32_0, %c0_i32_1 : i32, i32, i32
  }
  func.func @transform_2(%arg0: i32, %arg1: i32) -> (i32, i32) {
    %c0_i32 = arith.constant 0 : i32
    %c0_i32_0 = arith.constant 0 : i32
    %c0_i32_1 = arith.constant 0 : i32
    return %c0_i32, %c0_i32_0 : i32, i32
  }
  func.func @transform_3(%arg0: i32, %arg1: i32) -> (i32, i32, i32) {
    %c0_i32 = arith.constant 0 : i32
    %c0_i32_0 = arith.constant 0 : i32
    %c0_i32_1 = arith.constant 0 : i32
    return %arg0, %c0_i32, %c0_i32_0 : i32, i32, i32
  }
  func.func @transform_4(%arg0: i32, %arg1: i32) -> (i32, i32, i32) {
    %c0_i32 = arith.constant 0 : i32
    %c0_i32_0 = arith.constant 0 : i32
    return %arg0, %arg1, %c0_i32 : i32, i32, i32
  }
  func.func @transform_5(%arg0: i32, %arg1: i32) -> (i32, i32, i32) {
    %c0_i32 = arith.constant 0 : i32
    %c0_i32_0 = arith.constant 0 : i32
    return %arg0, %arg1, %c0_i32 : i32, i32, i32
  }
}

</mosaic_0001>

<bundles_post_ra>
// kernel: bdrm_forward.2
= control target key start
LH: loop header
LB: loop body
LE: loop exit
PB: predicated region body
PF: predicated region fallthrough
CT: control target
= control target key end

     0   :  { %8 = vsyncpa [#allocation3], 0  ;;  %s5643_s0 = inlined_call_operand.hbm [shape: bf16[2,1,288,384], index: 0, kind: input, shape index: {}]   ;;  %s5644_s1 = inlined_call_operand.hbm [shape: bf16[3,384,128], index: 1, kind: input, shape index: {}]   ;;  %s5645_s2 = inlined_call_operand.hbm [shape: f32[1,128], index: 2, kind: input, shape index: {}]   ;;  %s5646_s3 = inlined_call_operand.hbm [shape: bf16[2,256,128], index: 3, kind: output, shape index: {}]  }
   0x1   :  { %10 = vsyncpa [#allocation3 + $0x1], 0 }
   0x2   :  { %11 = vsyncpa [#allocation6], 0 }
   0x3   :  { %12 = vsyncpa [#allocation4], 0 }
   0x4   :  { %14 = vsyncpa [#allocation4 + $0x1], 0  ;;  %s4780_s12 = smov 0   ;;  %s4782_s13 = smov 0  }
   0x5   :  { %s4784_s14 = smov 0   ;;  %s4786_s15 = smov 0  }
   0x6   :  { %s4788_s16 = smov 0   ;;  %s4790_s17 = smov 0  }
   0x7 LB: > { %s3157_s18 = sadd.s32 4294967295, %s4748_s17   ;;  %s3158_s19 = sadd.s32 4294967294, %s4748_s17   ;;  %s4748_s17 = sphi %s4790_s17, %s20_s17   ;;  %s4744_s16 = sphi %s4788_s16, %s5672_s16   ;;  %s4740_s15 = sphi %s4786_s15, %s5671_s15   ;;  %s4736_s14 = sphi %s4784_s14, %s5670_s14   ;;  %s4732_s13 = sphi %s4782_s13, %s5669_s13   ;;  %s4728_s12 = sphi %s4780_s12, %s5668_s12  }
   0x8   : > { %p54_p0 = scmp.ne.s32.totalorder %s4732_s13, %s4728_s12  ;;  %p4814_p1 = scmp.eq.s32.totalorder %s3157_s18, 0 }
   0x9   : > { %p4818_p2 = scmp.eq.s32.totalorder %s3157_s18, 1  ;;  %p128_p3 = scmp.eq.s32.totalorder %s3158_s19, 1 }
   0xa   : > { %s5651_s20 = scalar_select %p4814_p1, 1, 0 }
   0xb   : > { %p4824_p4 = por %p4814_p1, %p54_p0  ;;  %p3159_p5 = scmp.ge.s32.totalorder %s4748_s17, 1 }
   0xc   : > { %p4829_p6 = por %p128_p3, %p54_p0  ;;  %p135_p7 = scmp.lt.s32.totalorder %s4748_s17, 3 }
   0xd   : > { %s5653_s22 = scalar_select %p4824_p4, 1, 0 }
   0xe   : > { %s5654_s23 = scalar_select %p4829_p6, 1, 0 }
   0xf   : > { %p4834_p8 = pnand %p3159_p5, %p135_p7  ;;  %s4750_s25 = smov [#allocation5]  }
  0x10   : > { %s147_s26 = sshll.u32 %s4750_s25, 4  ;;  %s4751_s28 = smov [#allocation7]   ;;  %s4838_s26 = int_to_ptr.vmem [resolvable:$true] %s147_s26 }
  0x11   : > { %p4325_p9 = pneg %p4834_p8  ;;  %s161_s29 = sshll.u32 %s4751_s28, 4  ;;  %s4849_s29 = int_to_ptr.vmem [resolvable:$true] %s161_s29 }
  0x12   : > { %s4576_s5 = scalar_lea.hbm %s5644_s1, 9216 }
  0x13   : > { %p4845_p11 = pnand %p4325_p9, %p4814_p1  ;;  %p4577_p12 = scmp.ne.s32.totalorder %s5644_s1, %s4576_s5 }
  0x14   : > { %p4583_p5 = scmp.lt.u32.totalorder %s4576_s5, %s5644_s1 }
  0x15   : > { %p4578_p13 = pneg %p4845_p11 }
  0x17   : > { %p4579_p0 = pnand %p4578_p13, %p4577_p12 }
  0x19   : > { %p4580_p3 = pneg %p4579_p0 }
  0x1b   : > { %p4585_p7 = pnand %p4583_p5, %p4580_p3 }
  0x1d   : > { %4588 = shalt.err (!%p4585_p7)
}
  0x1e   : > { %s4589_s10 = scalar_lea.vmem %s4838_s26, 9216  ;;  %p4597_p1 = scmp.lt.s32.totalorder %s4838_s26, %s4838_s26 }
  0x1f   : > { %p4590_p9 = scmp.ne.s32.totalorder %s4838_s26, %s4589_s10  ;;  %p4598_p12 = scmp.lt.s32.totalorder %s4589_s10, %s4589_s10 }
  0x21   : > { %p4592_p10 = pnand %p4590_p9, %p4578_p13  ;;  %p4599_p0 = por %p4598_p12, %p4597_p1 }
  0x23   : > { %p4593_p6 = pneg %p4592_p10 }
  0x25   : > { %p4600_p4 = pnand %p4599_p0, %p4593_p6 }
  0x27   : > { %4603 = shalt.err (!%p4600_p4)
}
  0x28   : > { %s4752_s11 = smov 64   ;;  %s4753_s18 = smov 4  }
  0x29   : > { %4328 = dma.hbm_to_vmem [thread:$0]  (!%p4845_p11), %s5644_s1, 9216, %s4838_s26, [#allocation6], %s4752_s11, %s4752_s11, %s4753_s18  }
  0x2a   : > { %s4604_s4 = scalar_lea.hbm %s5645_s2, 16 }
  0x2b   : > { %p4605_p1 = scmp.ne.s32.totalorder %s5645_s2, %s4604_s4  ;;  %p4611_p10 = scmp.lt.u32.totalorder %s4604_s4, %s5645_s2 }
  0x2d   : > { %p4607_p4 = pnand %p4605_p1, %p4578_p13 }
  0x2f   : > { %p4608_p6 = pneg %p4607_p4 }
  0x31   : > { %p4613_p3 = pnand %p4611_p10, %p4608_p6 }
  0x33   : > { %4616 = shalt.err (!%p4613_p3)
}
  0x34   : > { %s4617_s26 = scalar_lea.vmem %s4849_s29, 16  ;;  %s4624_s9 = scalar_lea.vmem %s4849_s29, 32 }
  0x35   : > { %p4618_p5 = scmp.ne.s32.totalorder %s4849_s29, %s4617_s26  ;;  %p4625_p12 = scmp.lt.s32.totalorder %s4849_s29, %s4849_s29 }
  0x36   : > { %p4626_p0 = scmp.lt.s32.totalorder %s4624_s9, %s4617_s26 }
  0x37   : > { %p4620_p7 = pnand %p4618_p5, %p4578_p13 }
  0x38   : > { %p4627_p1 = por %p4626_p0, %p4625_p12 }
  0x39   : > { %p4621_p9 = pneg %p4620_p7 }
  0x3b   : > { %p4628_p4 = pnand %p4627_p1, %p4621_p9 }
  0x3d   : > { %4631 = shalt.err (!%p4628_p4)
}
  0x3e   : > { %4331 = dma.hbm_to_vmem [thread:$0]  (!%p4845_p11), %s5645_s2, 16, %s4849_s29, [#allocation6]  }
  0x3f   : > { %s32_s18 = sadd.s32 1, %s4744_s16  ;;  %s41_s19 = sadd.s32 1, %s4736_s14 }
  0x40   : > { %p34_p13 = scmp.ge.s32.totalorder %s32_s18, 2  ;;  %p48_p6 = scmp.ne.s32.totalorder %s4736_s14, %s4732_s13 }
  0x41   : > { %p49_p10 = scmp.eq.s32.totalorder %s4748_s17, 0  ;;  %p4342_p3 = scmp.lt.s32.totalorder %s4748_s17, 2 }
  0x42   : > { %s5674_s18 = smov (%p34_p13, %s32_s18), 0  ;;  %p4914_p7 = por %p4818_p2, %p48_p6 }
  0x43   : > { %p50_p5 = por %p49_p10, %p48_p6  ;;  %s36_s25 = ssub.s32 %s4744_s16, %s5674_s18 }
  0x44   : > { %s5657_s27 = scalar_select %p4914_p7, 1, 0 }
  0x45   : > { %s172_s28 = sand.u32 1, %s4736_s14   ;;  %p39_p9 = scmp.eq.s32.totalorder %s36_s25, 0 }
  0x46   : > { %s4310_s29 = smul.u32 432, %s172_s28  ;;  %p4921_p11 = pnand %p4342_p3, %p50_p5 }
  0x47   : > { %s4926_s4 = scalar_select %p39_p9, %s4736_s14, %s41_s19  }
  0x48   : > { %s4311_s5 = smul.u32 6912, %s4744_s16  ;;  %s176_s6 = scalar_lea.vmem [#allocation2], %s4310_s29 }
  0x49   : > { %s185_s7 = sshll.u32 %s176_s6, 4  ;;  %s4936_s9 = scalar_lea.sflag [#allocation3], %s172_s28  ;;  %s4934_s7 = int_to_ptr.vmem [resolvable:$true] %s185_s7 }
  0x4a   : > { %s4932_s26 = scalar_lea.hbm %s5643_s0, %s4311_s5  ;;  %p4634_p12 = pneg %p4921_p11 }
  0x4b   : > { %s4632_s10 = scalar_lea.hbm %s4932_s26, 6912  ;;  %s4637_s25 = scalar_lea.hbm %s5643_s0, 13824 }
  0x4c   : > { %p4633_p2 = scmp.ne.s32.totalorder %s4932_s26, %s4632_s10  ;;  %p4638_p4 = scmp.lt.u32.totalorder %s4932_s26, %s5643_s0 }
  0x4d   : > { %p4639_p13 = scmp.lt.u32.totalorder %s4637_s25, %s4632_s10  ;;  %p4641_p10 = scmp.lt.u32.totalorder %s4632_s10, %s4932_s26 }
  0x4e   : > { %p4635_p0 = pnand %p4634_p12, %p4633_p2 }
  0x4f   : > { %p4640_p6 = por %p4639_p13, %p4638_p4 }
  0x50   : > { %p4636_p1 = pneg %p4635_p0 }
  0x51   : > { %p4642_p3 = por %p4641_p10, %p4640_p6 }
  0x53   : > { %p4643_p5 = pnand %p4642_p3, %p4636_p1 }
  0x55   : > { %4646 = shalt.err (!%p4643_p5)
}
  0x56   : > { %s4647_s28 = scalar_lea.vmem %s4934_s7, 6912  ;;  %s4754_s6 = smov [#allocation2]  }
  0x57   : > { %p4648_p9 = scmp.ne.s32.totalorder %s4934_s7, %s4647_s28  ;;  %s4652_s21 = sshll.u32 %s4754_s6, 4  ;;  %s4653_s21 = int_to_ptr.vmem [resolvable:$false] %s4652_s21 }
  0x58   : > { %s4654_s8 = scalar_lea.vmem %s4653_s21, 13824  ;;  %p4655_p7 = scmp.lt.s32.totalorder %s4934_s7, %s4653_s21 }
  0x59   : > { %p4650_p2 = pnand %p4648_p9, %p4634_p12  ;;  %p4656_p4 = scmp.lt.s32.totalorder %s4654_s8, %s4647_s28 }
  0x5b   : > { %p4651_p0 = pneg %p4650_p2  ;;  %p4657_p13 = por %p4656_p4, %p4655_p7 }
  0x5d   : > { %p4658_p6 = pnand %p4657_p13, %p4651_p0 }
  0x5f   : > { %4661 = shalt.err (!%p4658_p6)
}
  0x60   : > { %s4755_s10 = smov 192   ;;  %s4756_s11 = smov 12  }
  0x61   : > { %4335 = dma.hbm_to_vmem [thread:$0]  (!%p4921_p11), %s4932_s26, 6912, %s4934_s7, %s4936_s9, %s4755_s10, %s4755_s10, %s4756_s11  }
  0x62   : > { %197 = sbr.rel (%p4834_p8) target bundleno = 667 (0x29b), region = 32 }
  0x69   : > { %s4967_s19 = sand.u32 1, %s4732_s13   ;;  %p5659_p7 = scmp.ne.s32.totalorder %s5653_s22, 0 }
  0x6a   : > { %s4312_s25 = smul.u32 432, %s4967_s19  ;;  %s200_s29 = scalar_lea.sflag [#allocation3], %s4967_s19 }
  0x6c   : > { %s4971_s5 = scalar_lea.vmem [#allocation2], %s4312_s25 }
  0x6d   : > { %4715 = dma.done.wait (%p5659_p7), %s200_s29, 6912  }
  0x6e   : > { %4717 = vsyncadd (%p5659_p7), %s200_s29, 4294960384  ;;  %p5660_p11 = scmp.ne.s32.totalorder %s5651_s20, 0 }
  0x70   : > { %4719 = dma.done.wait (%p5660_p11), [#allocation6], 9232  }
  0x71   : > { %4721 = vsyncadd (%p5660_p11), [#allocation6], 4294958064  ;;  %v4402_v0 = vld [vmem:[#allocation5 + $0x40] sm:$0xff]   ;;  %v4405_v3 = vld [vmem:[#allocation5 + $0x48] sm:$0xff]   ;;  %s3167_s20 = sshll.u32 %s4967_s19, 7  ;;  %s3454_s24 = sshll.u32 %s4740_s15, 11 }
  0x72   : > { %v4981_v1 = vld [vmem:[#allocation5 + $0x80] sm:$0xff]   ;;  %3550 = vmatprep.subr.bf16.mxu0 %v4402_v0  ;;  %v4985_v4 = vld [vmem:[#allocation5 + $0x88] sm:$0xff]   ;;  %v4408_v6 = vld [vmem:[#allocation5 + $0x50] sm:$0xff]   ;;  %s5536_s22 = scalar_lea.vmem [#allocation8], %s3167_s20  ;;  %s5591_s9 = scalar_lea.hbm %s5646_s3, %s3454_s24 }
  0x73   : > { %v4404_v2 = vld [vmem:[#allocation5] sm:$0xff]   ;;  %4102 = vmatprep.subr.bf16.mxu1 %v4981_v1  ;;  %v4407_v5 = vld [vmem:[#allocation5 + $0x8] sm:$0xff]   ;;  %v4988_v7 = vld [vmem:[#allocation5 + $0x90] sm:$0xff]   ;;  %s3051_s30 = sshll.u32 %s5536_s22, 4  ;;  %s3036_s28 = scalar_lea.sflag [#allocation4], %s4967_s19  ;;  %s5593_s30 = int_to_ptr.vmem [resolvable:$true] %s3051_s30 }
  0x74   : > { %3551 = vmatpush3.bf16.msra.mxu0 %v4404_v2  ;;  %4110 = vmatpush3.bf16.msra.mxu1 %v4981_v1  ;;  %v4410_v8 = vld [vmem:[#allocation5 + $0x10] sm:$0xff]   ;;  %v4411_v9 = vld [vmem:[#allocation5 + $0x58] sm:$0xff]   ;;  %v4414_v12 = vld [vmem:[#allocation5 + $0x60] sm:$0xff]   ;;  %s4662_s6 = scalar_lea.vmem %s5593_s30, 2048  ;;  %p5665_p12 = scmp.ne.s32.totalorder %s5657_s27, 0 }
  0x75   : > { %3552 = vmatprep.subr.bf16.mxu0 %v4405_v3  ;;  %4103 = vmatprep.subr.bf16.mxu1 %v4985_v4  ;;  %v4992_v10 = vld [vmem:[#allocation5 + $0x98] sm:$0xff]   ;;  %v4996_v13 = vld [vmem:[#allocation5 + $0xa0] sm:$0xff]   ;;  %v4417_v15 = vld [vmem:[#allocation5 + $0x68] sm:$0xff]   ;;  %p4663_p8 = scmp.ne.s32.totalorder %s5593_s30, %s4662_s6  ;;  %s4757_s15 = smov [#allocation8]  }
  0x76   : > { %v4413_v11 = vld [vmem:[#allocation5 + $0x18] sm:$0xff]   ;;  %v4416_v14 = vld [vmem:[#allocation5 + $0x20] sm:$0xff]   ;;  %v5000_v16 = vld [vmem:[#allocation5 + $0xa8] sm:$0xff]   ;;  %s4666_s21 = sshll.u32 %s4757_s15, 4  ;;  %s4667_s21 = int_to_ptr.vmem [resolvable:$false] %s4666_s21 }
  0x77   : > { %v4419_v17 = vld [vmem:[#allocation5 + $0x28] sm:$0xff]   ;;  %v4420_v18 = vld [vmem:[#allocation5 + $0x70] sm:$0xff]   ;;  %v4423_v21 = vld [vmem:[#allocation5 + $0x78] sm:$0xff]   ;;  %p4664_p1 = pnand %p4663_p8, %p5665_p12  ;;  %s4668_s8 = scalar_lea.vmem %s4667_s21, 4096 }
  0x78   : > { %3553 = vmatpush3.bf16.msra.mxu0 %v4407_v5  ;;  %4111 = vmatpush3.bf16.msra.mxu1 %v4985_v4  ;;  %v5004_v19 = vld [vmem:[#allocation5 + $0xb0] sm:$0xff]   ;;  %v5007_v22 = vld [vmem:[#allocation5 + $0xb8] sm:$0xff]   ;;  %v4431_v26 = vld [vmem:[#allocation5 + $0x100] sm:$0xff]   ;;  %p4669_p3 = scmp.lt.s32.totalorder %s5593_s30, %s4667_s21  ;;  %p4670_p5 = scmp.lt.s32.totalorder %s4668_s8, %s4662_s6 }
  0x79   : > { %3554 = vmatprep.subr.bf16.mxu0 %v4408_v6  ;;  %4104 = vmatprep.subr.bf16.mxu1 %v4988_v7  ;;  %v4422_v20 = vld [vmem:[#allocation5 + $0x30] sm:$0xff]   ;;  %v4425_v25 = vld [vmem:[#allocation5 + $0x38] sm:$0xff]   ;;  %v4432_v29 = vld [vmem:[#allocation5 + $0xc0] sm:$0xff]   ;;  %p4665_p10 = pneg %p4664_p1 }
  0x7a   : > { %v4428_v23 = vld [vmem:[%s4971_s5 + $0x4] ss:$12 sps:$4 sm:$0xff]   ;;  %v4429_v24 = vld [vmem:[%s4971_s5 + $0xc8] ss:$12 sps:$4 sm:$0xff]   ;;  %v4426_v27 = vld [vmem:[%s4971_s5] ss:$12 sps:$4 sm:$0xff]   ;;  %p4671_p9 = por %p4670_p5, %p4669_p3 }
  0x7b   : > { %787 = vmatprep.mubr.bf16.mxu0 %v4428_v23  ;;  %3990 = vmatprep.mubr.bf16.mxu1 %v4429_v24  ;;  %v4430_v28 = vld [vmem:[%s4971_s5 + $0xe0] ss:$12 sps:$4 sm:$0xff]   ;;  %v5019_v31 = vld [vmem:[%s4971_s5 + $0x1c] ss:$12 sps:$4 sm:$0xff]   ;;  %v4437_v32 = vld [vmem:[%s4971_s5 + $0xf8] ss:$12 sps:$4 sm:$0xff]  }
  0x7c   : > { %3555 = vmatpush3.bf16.msra.mxu0 %v4410_v8  ;;  %4112 = vmatpush3.bf16.msra.mxu1 %v4988_v7  ;;  %v4433_v30 = vld [vmem:[#allocation5 + $0x108] sm:$0xff]   ;;  %v4440_v35 = vld [vmem:[#allocation5 + $0x110] sm:$0xff]   ;;  %v4442_v38 = vld [vmem:[#allocation5 + $0x118] sm:$0xff]   ;;  %p4672_p2 = pnand %p4671_p9, %p4665_p10 }
  0x7d   : > { %3556 = vmatprep.subr.bf16.mxu0 %v4411_v9  ;;  %4105 = vmatprep.subr.bf16.mxu1 %v4992_v10  ;;  %v4434_v33 = vld [vmem:[#allocation5 + $0xc8] sm:$0xff]   ;;  %v4441_v37 = vld [vmem:[#allocation5 + $0xd0] sm:$0xff]   ;;  %v4443_v41 = vld [vmem:[#allocation5 + $0xd8] sm:$0xff]  }
  0x7e   : > { %v5025_v34 = vld [vmem:[%s4971_s5 + $0x18] ss:$12 sps:$4 sm:$0xff]   ;;  %v4439_v36 = vld [vmem:[%s4971_s5 + $0x110] ss:$12 sps:$4 sm:$0xff]   ;;  %v5030_v39 = vld [vmem:[%s4971_s5 + $0x34] ss:$12 sps:$4 sm:$0xff]  }
  0x7f   : > { %v4446_v40 = vld [vmem:[%s4971_s5 + $0x128] ss:$12 sps:$4 sm:$0xff]   ;;  %v5038_v42 = vld [vmem:[%s4971_s5 + $0x30] ss:$12 sps:$4 sm:$0xff]   ;;  %v4448_v43 = vld [vmem:[%s4971_s5 + $0x140] ss:$12 sps:$4 sm:$0xff]  }
  0x80   : > { %3557 = vmatpush3.bf16.msra.mxu0 %v4413_v11  ;;  %4113 = vmatpush3.bf16.msra.mxu1 %v4992_v10  ;;  %v4449_v44 = vld [vmem:[#allocation5 + $0x120] sm:$0xff]   ;;  %v4451_v46 = vld [vmem:[#allocation5 + $0x128] sm:$0xff]   ;;  %v4458_v50 = vld [vmem:[#allocation5 + $0x130] sm:$0xff]  }
  0x81   : > { %3558 = vmatprep.subr.bf16.mxu0 %v4414_v12  ;;  %4106 = vmatprep.subr.bf16.mxu1 %v4996_v13  ;;  %v4450_v45 = vld [vmem:[#allocation5 + $0xe0] sm:$0xff]   ;;  %v5044_v47 = vld [vmem:[%s4971_s5 + $0x4c] ss:$12 sps:$4 sm:$0xff]   ;;  %v4459_v53 = vld [vmem:[#allocation5 + $0xf0] sm:$0xff]  }
  0x82   : > { %v4455_v48 = vld [vmem:[%s4971_s5 + $0x158] ss:$12 sps:$4 sm:$0xff]   ;;  %v5051_v51 = vld [vmem:[%s4971_s5 + $0x48] ss:$12 sps:$4 sm:$0xff]   ;;  %v4457_v52 = vld [vmem:[%s4971_s5 + $0x170] ss:$12 sps:$4 sm:$0xff]  }
  0x83   : > { %v4452_v49 = vld [vmem:[#allocation5 + $0xe8] sm:$0xff]   ;;  %v5057_v54 = vld [vmem:[%s4971_s5 + $0x64] ss:$12 sps:$4 sm:$0xff]   ;;  %v4460_v55 = vld [vmem:[#allocation5 + $0x138] sm:$0xff]  }
  0x84   : > { %3559 = vmatpush3.bf16.msra.mxu0 %v4416_v14  ;;  %4114 = vmatpush3.bf16.msra.mxu1 %v4996_v13  ;;  %v4461_v56 = vld [vmem:[#allocation5 + $0xf8] sm:$0xff]   ;;  %v4465_v57 = vld [vmem:[#allocation5 + $0x140] sm:$0xff]   ;;  %v4472_v60 = vld [vmem:[#allocation5 + $0x148] sm:$0xff]  }
  0x85   : > { %3560 = vmatprep.subr.bf16.mxu0 %v4417_v15  ;;  %4107 = vmatprep.subr.bf16.mxu1 %v5000_v16  ;;  %v5065_v58 = vld [vmem:[%s4971_s5 + $0x60] ss:$12 sps:$4 sm:$0xff]   ;;  %v5069_v59 = vld [vmem:[%s4971_s5 + $0x7c] ss:$12 sps:$4 sm:$0xff]   ;;  %v5078_v62 = vld [vmem:[%s4971_s5 + $0x78] ss:$12 sps:$4 sm:$0xff]  }
  0x86   : > { %v4479_v61 = vld [vmem:[#allocation5 + $0x150] sm:$0xff]   ;;  %v4486_v0 = vld [vmem:[#allocation5 + $0x158] sm:$0xff]   ;;  %v4506_v2 = vld [vmem:[#allocation5 + $0x1c0] sm:$0xff]  }
  0x87   : > { %v5082_v63 = vld [vmem:[%s4971_s5 + $0x94] ss:$12 sps:$4 sm:$0xff]   ;;  %v5089_v3 = vld [vmem:[%s4971_s5 + $0x90] ss:$12 sps:$4 sm:$0xff]   ;;  %v5119_v12 = vld [vmem:[%s4971_s5 + $0xd8] ss:$12 sps:$4 sm:$0xff]  }
  0x88   : > { %3561 = vmatpush3.bf16.msra.mxu0 %v4419_v17  ;;  %4115 = vmatpush3.bf16.msra.mxu1 %v5000_v16  ;;  %v4500_v5 = vld [vmem:[#allocation5 + $0x168] sm:$0xff]   ;;  %v4508_v6 = vld [vmem:[#allocation5 + $0x170] sm:$0xff]   ;;  %v4521_v9 = vld [vmem:[#allocation5 + $0x178] sm:$0xff]  }
  0x89   : > { %3562 = vmatprep.subr.bf16.mxu0 %v4420_v18  ;;  %4108 = vmatprep.subr.bf16.mxu1 %v5004_v19  ;;  %v5102_v8 = vld [vmem:[%s4971_s5 + $0xc4] ss:$12 sps:$4 sm:$0xff]   ;;  %v5112_v11 = vld [vmem:[%s4971_s5 + $0xdc] ss:$12 sps:$4 sm:$0xff]   ;;  %v5175_v24 = vld [vmem:[%s4971_s5 + $0x16c] ss:$12 sps:$4 sm:$0xff]  }
  0x8a   : > { %v5124_v14 = vld [vmem:[#allocation5 + $0x200] sm:$0xff]  }
  0x8b   : > { %v5132_v15 = vld [vmem:[%s4971_s5 + $0xf0] ss:$12 sps:$4 sm:$0xff]   ;;  %v5142_v17 = vld [vmem:[%s4971_s5 + $0x108] ss:$12 sps:$4 sm:$0xff]  }
  0x8c   : > { %3563 = vmatpush3.bf16.msra.mxu0 %v4422_v20  ;;  %4116 = vmatpush3.bf16.msra.mxu1 %v5004_v19  ;;  %v5145_v18 = vld [vmem:[%s4971_s5 + $0x124] ss:$12 sps:$4 sm:$0xff]   ;;  %v5155_v20 = vld [vmem:[%s4971_s5 + $0x13c] ss:$12 sps:$4 sm:$0xff]  }
  0x8d   : > { %3564 = vmatprep.subr.bf16.mxu0 %v4423_v21  ;;  %4109 = vmatprep.subr.bf16.mxu1 %v5007_v22  ;;  %v5162_v21 = vld [vmem:[%s4971_s5 + $0x138] ss:$12 sps:$4 sm:$0xff]   ;;  %v5172_v23 = vld [vmem:[%s4971_s5 + $0x150] ss:$12 sps:$4 sm:$0xff]  }
  0x90   : > { %3565 = vmatpush3.bf16.msra.mxu0 %v4425_v25  ;;  %4117 = vmatpush3.bf16.msra.mxu1 %v5007_v22  ;;  %v5182_v25 = vld [vmem:[%s4971_s5 + $0x168] ss:$12 sps:$4 sm:$0xff]  }
  0x91   : > { %3958 = vmatprep.subr.bf16.mxu0 %v4981_v1  ;;  %3686 = vmatprep.subr.bf16.mxu1 %v4431_v26  ;;  %v4504_v26 = vld [vmem:[%s4971_s5 + $0x8] ss:$12 sps:$4 sm:$0xff]  }
  0x93   : > { %788 = vmatmul.mubr.bf16.vlgmr.msra.gmra.mrb[0].mxu0 %v4426_v27  ;;  %3991 = vmatmul.mubr.bf16.vlgmr.msra.gmra.mrb[0].mxu1 %v4430_v28  ;;  %v4505_v27 = vld [vmem:[%s4971_s5 + $0x20] ss:$12 sps:$4 sm:$0xff]  }
  0x94   : > { %3959 = vmatpush3.bf16.msra.mxu0 %v4981_v1  ;;  %3687 = vmatpush3.bf16.msra.mxu1 %v4432_v29  ;;  %v4493_v1 = vld [vmem:[#allocation5 + $0x160] sm:$0xff]  }
  0x95   : > { %3688 = vmatprep.subr.bf16.mxu1 %v4433_v30  ;;  %795 = vmatprep.mubr.bf16.mxu0 %v5019_v31  ;;  %v4507_v28 = vld [vmem:[#allocation5 + $0x180] sm:$0xff]   ;;  %v4509_v30 = vld [vmem:[#allocation5 + $0x1c8] sm:$0xff]  }
  0x96   : > { %3994 = vmatprep.mubr.bf16.mxu1 %v4437_v32  ;;  %3960 = vmatprep.subr.bf16.mxu0 %v4985_v4  ;;  %v4511_v29 = vld [vmem:[%s4971_s5 + $0x38] ss:$12 sps:$4 sm:$0xff]  }
  0x97   : > { %v4513_v32 = vld [vmem:[#allocation5 + $0x1d0] sm:$0xff]  }
  0x98   : > { %3689 = vmatpush3.bf16.msra.mxu1 %v4434_v33  ;;  %3961 = vmatpush3.bf16.msra.mxu0 %v4985_v4  ;;  %v5092_v4 = vld [vmem:[%s4971_s5 + $0xac] ss:$12 sps:$4 sm:$0xff]   ;;  %v4512_v33 = vld [vmem:[%s4971_s5 + $0x50] ss:$12 sps:$4 sm:$0xff]  }
  0x99   : > { %3690 = vmatprep.subr.bf16.mxu1 %v4440_v35  ;;  %3962 = vmatprep.subr.bf16.mxu0 %v4988_v7  ;;  %v4517_v35 = vld [vmem:[%s4971_s5 + $0x68] ss:$12 sps:$4 sm:$0xff]  }
  0x9b   : > { %796 = vmatmul.mubr.bf16.gmra.mrb[4].mxu0 %v5025_v34  ;;  %3995 = vmatmul.mubr.bf16.gmra.mrb[4].mxu1 %v4439_v36  ;;  %v4515_v36 = vld [vmem:[#allocation5 + $0x1d8] sm:$0xff]  }
  0x9c   : > { %3691 = vmatpush3.bf16.msra.mxu1 %v4441_v37  ;;  %803 = vmatprep.mubr.bf16.mxu0 %v5030_v39  ;;  %v4516_v37 = vld [vmem:[#allocation5 + $0x198] sm:$0xff]  }
  0x9d   : > { %3692 = vmatprep.subr.bf16.mxu1 %v4442_v38  ;;  %3998 = vmatprep.mubr.bf16.mxu1 %v4446_v40  ;;  %v4519_v38 = vld [vmem:[#allocation5 + $0x1e0] sm:$0xff]  }
  0x9e   : > { %3963 = vmatpush3.bf16.msra.mxu0 %v4988_v7  ;;  %v5099_v7 = vld [vmem:[%s4971_s5 + $0xa8] ss:$12 sps:$4 sm:$0xff]   ;;  %v4518_v40 = vld [vmem:[%s4971_s5 + $0x80] ss:$12 sps:$4 sm:$0xff]  }
  0x9f   : > { %3964 = vmatprep.subr.bf16.mxu0 %v4992_v10 }
  0xa0   : > { %3693 = vmatpush3.bf16.msra.mxu1 %v4443_v41  ;;  %v4520_v41 = vld [vmem:[#allocation5 + $0x1a0] sm:$0xff]  }
  0xa1   : > { %3694 = vmatprep.subr.bf16.mxu1 %v4449_v44  ;;  %v4522_v44 = vld [vmem:[#allocation5 + $0x1e8] sm:$0xff]  }
  0xa2   : > { %3965 = vmatpush3.bf16.msra.mxu0 %v4992_v10  ;;  %v5109_v10 = vld [vmem:[%s4971_s5 + $0xc0] ss:$12 sps:$4 sm:$0xff]  }
  0xa3   : > { %804 = vmatmul.mubr.bf16.gmra.mrb[8].mxu0 %v5038_v42  ;;  %3999 = vmatmul.mubr.bf16.gmra.mrb[8].mxu1 %v4448_v43  ;;  %v4524_v43 = vld [vmem:[%s4971_s5 + $0x98] ss:$12 sps:$4 sm:$0xff]  }
  0xa4   : > { %3695 = vmatpush3.bf16.msra.mxu1 %v4450_v45  ;;  %811 = vmatprep.mubr.bf16.mxu0 %v5044_v47  ;;  %v5199_v45 = vld [vmem:[%s4971_s5 + $0x184] ss:$12 sps:$4 sm:$0xff]  }
  0xa5   : > { %3696 = vmatprep.subr.bf16.mxu1 %v4451_v46  ;;  %4002 = vmatprep.mubr.bf16.mxu1 %v4455_v48  ;;  %v4523_v46 = vld [vmem:[#allocation5 + $0x1a8] sm:$0xff]   ;;  %v4529_v48 = vld [vmem:[#allocation5 + $0x1f0] sm:$0xff]  }
  0xa6   : > { %3966 = vmatprep.subr.bf16.mxu0 %v4996_v13 }
  0xa7   : > { %3967 = vmatpush3.bf16.msra.mxu0 %v4996_v13  ;;  %v5122_v13 = vld [vmem:[%s4971_s5 + $0xf4] ss:$12 sps:$4 sm:$0xff]  }
  0xa8   : > { %3697 = vmatpush3.bf16.msra.mxu1 %v4452_v49  ;;  %3968 = vmatprep.subr.bf16.mxu0 %v5000_v16  ;;  %v4527_v49 = vld [vmem:[%s4971_s5 + $0xb0] ss:$12 sps:$4 sm:$0xff]  }
  0xa9   : > { %3698 = vmatprep.subr.bf16.mxu1 %v4458_v50  ;;  %v5205_v50 = vld [vmem:[%s4971_s5 + $0x180] ss:$12 sps:$4 sm:$0xff]  }
  0xab   : > { %812 = vmatmul.mubr.bf16.gmra.mrb[12].mxu0 %v5051_v51  ;;  %4003 = vmatmul.mubr.bf16.gmra.mrb[12].mxu1 %v4457_v52  ;;  %v4530_v52 = vld [vmem:[#allocation5 + $0x1b0] sm:$0xff]  }
  0xac   : > { %3699 = vmatpush3.bf16.msra.mxu1 %v4459_v53  ;;  %819 = vmatprep.mubr.bf16.mxu0 %v5057_v54  ;;  %v4533_v53 = vld [vmem:[%s4971_s5 + $0x20] ss:$12 sps:$4 sm:$0xff]  }
  0xad   : > { %3700 = vmatprep.subr.bf16.mxu1 %v4460_v55  ;;  %1654 = vmatprep.mubr.bf16.mxu1 %v5019_v31  ;;  %v4510_v31 = vld [vmem:[#allocation5 + $0x188] sm:$0xff]   ;;  %v4531_v55 = vld [vmem:[#allocation5 + $0x1f8] sm:$0xff]  }
  0xae   : > { %3969 = vmatpush3.bf16.msra.mxu0 %v5000_v16  ;;  %v5135_v16 = vld [vmem:[%s4971_s5 + $0x10c] ss:$12 sps:$4 sm:$0xff]  }
  0xaf   : > { %3970 = vmatprep.subr.bf16.mxu0 %v5004_v19 }
  0xb0   : > { %3701 = vmatpush3.bf16.msra.mxu1 %v4461_v56  ;;  %v4532_v56 = vld [vmem:[#allocation5 + $0x1b8] sm:$0xff]  }
  0xb1   : > { %4006 = vmatprep.subr.bf16.mxu1 %v4465_v57 }
  0xb2   : > { %3971 = vmatpush3.bf16.msra.mxu0 %v5004_v19  ;;  %v5152_v19 = vld [vmem:[%s4971_s5 + $0x120] ss:$12 sps:$4 sm:$0xff]  }
  0xb3   : > { %820 = vmatmul.mubr.bf16.gmra.mrb[16].mxu0 %v5065_v58  ;;  %1655 = vmatmul.mubr.bf16.vlgmr.msra.gmra.mrb[16].mxu1 %v5025_v34  ;;  %v4514_v34 = vld [vmem:[#allocation5 + $0x190] sm:$0xff]  }
  0xb4   : > { %4007 = vmatpush3.bf16.msra.mxu1 %v4465_v57  ;;  %827 = vmatprep.mubr.bf16.mxu0 %v5069_v59  ;;  %v4534_v57 = vld [vmem:[%s4971_s5 + $0x38] ss:$12 sps:$4 sm:$0xff]  }
  0xb5   : > { %1662 = vmatprep.mubr.bf16.mxu1 %v5030_v39  ;;  %4008 = vmatprep.subr.bf16.mxu1 %v4472_v60 }
  0xb6   : > { %3972 = vmatprep.subr.bf16.mxu0 %v5007_v22 }
  0xb7   : > { %3973 = vmatpush3.bf16.msra.mxu0 %v5007_v22  ;;  %v5165_v22 = vld [vmem:[%s4971_s5 + $0x154] ss:$12 sps:$4 sm:$0xff]  }
  0xb8   : > { %4009 = vmatpush3.bf16.msra.mxu1 %v4472_v60  ;;  %3822 = vmatprep.subr.bf16.mxu0 %v4506_v2  ;;  %v4536_v60 = vld [vmem:[%s4971_s5 + $0x50] ss:$12 sps:$4 sm:$0xff]   ;;  %v4539_v2 = vld [vmem:[%s4971_s5 + $0x80] ss:$12 sps:$4 sm:$0xff]  }
  0xb9   : > { %4010 = vmatprep.subr.bf16.mxu1 %v4479_v61 }
  0xbb   : > { %828 = vmatmul.mubr.bf16.gmra.mrb[20].mxu0 %v5078_v62  ;;  %1663 = vmatmul.mubr.bf16.gmra.mrb[20].mxu1 %v5038_v42 }
  0xbc   : > { %835 = vmatprep.mubr.bf16.mxu0 %v5082_v63  ;;  %1670 = vmatprep.mubr.bf16.mxu1 %v5044_v47 }
  0xbd   : > { %4011 = vmatpush3.bf16.msra.mxu1 %v4479_v61  ;;  %v4538_v61 = vld [vmem:[#allocation5 + $0x208] sm:$0xff]  }
  0xbe   : > { %4012 = vmatprep.subr.bf16.mxu1 %v4486_v0 }
  0xc1   : > { %4013 = vmatpush3.bf16.msra.mxu1 %v4486_v0  ;;  %v4541_v0 = vld [vmem:[#allocation5 + $0x210] sm:$0xff]  }
  0xc2   : > { %4014 = vmatprep.subr.bf16.mxu1 %v4493_v1 }
  0xc3   : > { %836 = vmatmul.mubr.bf16.gmra.mrb[24].mxu0 %v5089_v3  ;;  %1671 = vmatmul.mubr.bf16.gmra.mrb[24].mxu1 %v5051_v51 }
  0xc4   : > { %843 = vmatprep.mubr.bf16.mxu0 %v5092_v4  ;;  %1678 = vmatprep.mubr.bf16.mxu1 %v5057_v54 }
  0xc5   : > { %4015 = vmatpush3.bf16.msra.mxu1 %v4493_v1  ;;  %v4537_v1 = vld [vmem:[%s4971_s5 + $0x68] ss:$12 sps:$4 sm:$0xff]  }
  0xc6   : > { %4016 = vmatprep.subr.bf16.mxu1 %v4500_v5 }
  0xc9   : > { %4017 = vmatpush3.bf16.msra.mxu1 %v4500_v5  ;;  %v4542_v5 = vld [vmem:[%s4971_s5 + $0xb0] ss:$12 sps:$4 sm:$0xff]  }
  0xca   : > { %4018 = vmatprep.subr.bf16.mxu1 %v4508_v6 }
  0xcb   : > { %844 = vmatmul.mubr.bf16.gmra.mrb[28].mxu0 %v5099_v7  ;;  %1679 = vmatmul.mubr.bf16.gmra.mrb[28].mxu1 %v5065_v58 }
  0xcc   : > { %851 = vmatprep.mubr.bf16.mxu0 %v5102_v8  ;;  %1686 = vmatprep.mubr.bf16.mxu1 %v5069_v59 }
  0xcd   : > { %4019 = vmatpush3.bf16.msra.mxu1 %v4508_v6  ;;  %v4550_v6 = vld [vmem:[#allocation5 + $0x228] sm:$0xff]  }
  0xce   : > { %4020 = vmatprep.subr.bf16.mxu1 %v4521_v9 }
  0xd1   : > { %4021 = vmatpush3.bf16.msra.mxu1 %v4521_v9  ;;  %v4545_v9 = vld [vmem:[%s4971_s5 + $0xe0] ss:$12 sps:$4 sm:$0xff]  }
  0xd2   : > { %4054 = vmatprep.subr.bf16.mxu1 %v5124_v14 }
  0xd3   : > { %852 = vmatmul.mubr.bf16.gmra.mrb[32].mxu0 %v5109_v10  ;;  %1687 = vmatmul.mubr.bf16.gmra.mrb[32].mxu1 %v5078_v62 }
  0xd4   : > { %859 = vmatprep.mubr.bf16.mxu0 %v5112_v11  ;;  %1694 = vmatprep.mubr.bf16.mxu1 %v5082_v63 }
  0xdb   : > { %860 = vmatmul.mubr.bf16.gmra.mrb[36].mxu0 %v5119_v12  ;;  %1695 = vmatmul.mubr.bf16.gmra.mrb[36].mxu1 %v5089_v3 }
  0xdc   : > { %867 = vmatprep.mubr.bf16.mxu0 %v5122_v13  ;;  %1702 = vmatprep.mubr.bf16.mxu1 %v5092_v4 }
  0xe3   : > { %868 = vmatmul.mubr.bf16.gmra.mrb[40].mxu0 %v5132_v15  ;;  %1703 = vmatmul.mubr.bf16.gmra.mrb[40].mxu1 %v5099_v7 }
  0xe4   : > { %875 = vmatprep.mubr.bf16.mxu0 %v5135_v16  ;;  %1710 = vmatprep.mubr.bf16.mxu1 %v5102_v8 }
  0xeb   : > { %876 = vmatmul.mubr.bf16.gmra.mrb[44].mxu0 %v5142_v17  ;;  %1711 = vmatmul.mubr.bf16.gmra.mrb[44].mxu1 %v5109_v10 }
  0xec   : > { %883 = vmatprep.mubr.bf16.mxu0 %v5145_v18  ;;  %1718 = vmatprep.mubr.bf16.mxu1 %v5112_v11 }
  0xf3   : > { %884 = vmatmul.mubr.bf16.gmra.mrb[48].mxu0 %v5152_v19  ;;  %1719 = vmatmul.mubr.bf16.gmra.mrb[48].mxu1 %v5119_v12 }
  0xf4   : > { %891 = vmatprep.mubr.bf16.mxu0 %v5155_v20  ;;  %1726 = vmatprep.mubr.bf16.mxu1 %v5122_v13 }
  0xfb   : > { %892 = vmatmul.mubr.bf16.gmra.mrb[52].mxu0 %v5162_v21  ;;  %1727 = vmatmul.mubr.bf16.gmra.mrb[52].mxu1 %v5132_v15 }
  0xfc   : > { %899 = vmatprep.mubr.bf16.mxu0 %v5165_v22  ;;  %1734 = vmatprep.mubr.bf16.mxu1 %v5135_v16 }
 0x103   : > { %900 = vmatmul.mubr.bf16.gmra.mrb[56].mxu0 %v5172_v23  ;;  %1735 = vmatmul.mubr.bf16.gmra.mrb[56].mxu1 %v5142_v17 }
 0x104   : > { %907 = vmatprep.mubr.bf16.mxu0 %v5175_v24  ;;  %1742 = vmatprep.mubr.bf16.mxu1 %v5145_v18 }
 0x10b   : > { %908 = vmatmul.mubr.bf16.gmra.mrb[60].mxu0 %v5182_v25  ;;  %1743 = vmatmul.mubr.bf16.gmra.mrb[60].mxu1 %v5152_v19 }
 0x10c   : > { %3974 = vmatprep.mubr.bf16.mxu0 %v4504_v26  ;;  %1750 = vmatprep.mubr.bf16.mxu1 %v5155_v20  ;;  %v4549_v26 = vld [vmem:[%s4971_s5 + $0x128] ss:$12 sps:$4 sm:$0xff]  }
 0x113   : > { %3975 = vmatmul.mubr.bf16.vlgmr.msra.gmra.mrb[64].mxu0 %v4505_v27  ;;  %1751 = vmatmul.mubr.bf16.gmra.mrb[64].mxu1 %v5162_v21  ;;  %v4551_v27 = vld [vmem:[%s4971_s5 + $0x140] ss:$12 sps:$4 sm:$0xff]  }
 0x114   : > { %3823 = vmatpush3.bf16.msra.mxu0 %v4507_v28  ;;  %3978 = vmatprep.mubr.bf16.mxu0 %v4511_v29  ;;  %v4555_v28 = vld [vmem:[%s4971_s5 + $0x188] ss:$12 sps:$4 sm:$0xff]  }
 0x115   : > { %3824 = vmatprep.subr.bf16.mxu0 %v4509_v30  ;;  %1758 = vmatprep.mubr.bf16.mxu1 %v5165_v22 }
 0x118   : > { %3825 = vmatpush3.bf16.msra.mxu0 %v4510_v31 }
 0x119   : > { %3826 = vmatprep.subr.bf16.mxu0 %v4513_v32 }
 0x11b   : > { %3979 = vmatmul.mubr.bf16.gmra.mrb[68].mxu0 %v4512_v33  ;;  %1759 = vmatmul.mubr.bf16.gmra.mrb[68].mxu1 %v5172_v23 }
 0x11c   : > { %3827 = vmatpush3.bf16.msra.mxu0 %v4514_v34  ;;  %3982 = vmatprep.mubr.bf16.mxu0 %v4517_v35  ;;  %v4559_v35 = vld [vmem:[%s4971_s5 + $0x68] ss:$12 sps:$4 sm:$0xff]  }
 0x11d   : > { %3828 = vmatprep.subr.bf16.mxu0 %v4515_v36  ;;  %1766 = vmatprep.mubr.bf16.mxu1 %v5175_v24 }
 0x120   : > { %3829 = vmatpush3.bf16.msra.mxu0 %v4516_v37 }
 0x121   : > { %3830 = vmatprep.subr.bf16.mxu0 %v4519_v38  ;;  %v4560_v38 = vld [vmem:[%s4971_s5 + $0x80] ss:$12 sps:$4 sm:$0xff]  }
 0x123   : > { %3983 = vmatmul.mubr.bf16.gmra.mrb[72].mxu0 %v4518_v40  ;;  %1767 = vmatmul.mubr.bf16.gmra.mrb[72].mxu1 %v5182_v25 }
 0x124   : > { %3831 = vmatpush3.bf16.msra.mxu0 %v4520_v41  ;;  %3986 = vmatprep.mubr.bf16.mxu0 %v4524_v43  ;;  %v4561_v43 = vld [vmem:[%s4971_s5 + $0x98] ss:$12 sps:$4 sm:$0xff]  }
 0x125   : > { %3832 = vmatprep.subr.bf16.mxu0 %v4522_v44  ;;  %1774 = vmatprep.mubr.bf16.mxu1 %v5199_v45 }
 0x128   : > { %3833 = vmatpush3.bf16.msra.mxu0 %v4523_v46 }
 0x129   : > { %3834 = vmatprep.subr.bf16.mxu0 %v4529_v48  ;;  %v4562_v48 = vld [vmem:[%s4971_s5 + $0xb0] ss:$12 sps:$4 sm:$0xff]  }
 0x12b   : > { %3987 = vmatmul.mubr.bf16.gmra.mrb[76].mxu0 %v4527_v49  ;;  %1775 = vmatmul.mubr.bf16.gmra.mrb[76].mxu1 %v5205_v50 }
 0x12c   : > { %3835 = vmatpush3.bf16.msra.mxu0 %v4530_v52  ;;  %4022 = vmatprep.mubr.bf16.mxu1 %v4533_v53  ;;  %v4563_v53 = vld [vmem:[%s4971_s5 + $0xc8] ss:$12 sps:$4 sm:$0xff]  }
 0x12d   : > { %3836 = vmatprep.subr.bf16.mxu0 %v4531_v55  ;;  %2521 = vmatprep.mubr.bf16.mxu0 %v5030_v39  ;;  %v4544_v39 = vld [vmem:[#allocation5 + $0x218] sm:$0xff]  }
 0x130   : > { %3837 = vmatpush3.bf16.msra.mxu0 %v4532_v56 }
 0x133   : > { %4023 = vmatmul.mubr.bf16.vlgmr.msra.gmra.mrb[80].mxu1 %v4534_v57  ;;  %2522 = vmatmul.mubr.bf16.vlgmr.msra.gmra.mrb[80].mxu0 %v5038_v42  ;;  %v4547_v42 = vld [vmem:[#allocation5 + $0x220] sm:$0xff]  }
 0x134   : > { %4055 = vmatpush3.bf16.msra.mxu1 %v5124_v14  ;;  %4026 = vmatprep.mubr.bf16.mxu1 %v4536_v60  ;;  %v4556_v14 = vld [vmem:[#allocation5 + $0x238] sm:$0xff]  }
 0x135   : > { %2529 = vmatprep.mubr.bf16.mxu0 %v5044_v47  ;;  %4056 = vmatprep.subr.bf16.mxu1 %v4538_v61  ;;  %v4540_v47 = vld [vmem:[%s4971_s5 + $0x98] ss:$12 sps:$4 sm:$0xff]  }
 0x138   : > { %4057 = vmatpush3.bf16.msra.mxu1 %v4538_v61  ;;  %v4564_v61 = vld [vmem:[%s4971_s5 + $0xe0] ss:$12 sps:$4 sm:$0xff]  }
 0x139   : > { %4058 = vmatprep.subr.bf16.mxu1 %v4541_v0 }
 0x13b   : > { %4027 = vmatmul.mubr.bf16.gmra.mrb[84].mxu1 %v4537_v1  ;;  %2530 = vmatmul.mubr.bf16.gmra.mrb[84].mxu0 %v5051_v51  ;;  %v4553_v51 = vld [vmem:[#allocation5 + $0x230] sm:$0xff]  }
 0x13c   : > { %4030 = vmatprep.mubr.bf16.mxu1 %v4539_v2  ;;  %2537 = vmatprep.mubr.bf16.mxu0 %v5057_v54  ;;  %v4543_v54 = vld [vmem:[%s4971_s5 + $0xc8] ss:$12 sps:$4 sm:$0xff]  }
 0x13d   : > { %4059 = vmatpush3.bf16.msra.mxu1 %v4541_v0 }
 0x13e   : > { %4060 = vmatprep.subr.bf16.mxu1 %v4544_v39 }
 0x141   : > { %4061 = vmatpush3.bf16.msra.mxu1 %v4544_v39 }
 0x142   : > { %4062 = vmatprep.subr.bf16.mxu1 %v4547_v42 }
 0x143   : > { %4031 = vmatmul.mubr.bf16.gmra.mrb[88].mxu1 %v4540_v47  ;;  %2538 = vmatmul.mubr.bf16.gmra.mrb[88].mxu0 %v5065_v58  ;;  %v4546_v58 = vld [vmem:[%s4971_s5 + $0xf8] ss:$12 sps:$4 sm:$0xff]  }
 0x144   : > { %4034 = vmatprep.mubr.bf16.mxu1 %v4542_v5  ;;  %2545 = vmatprep.mubr.bf16.mxu0 %v5069_v59  ;;  %v4548_v59 = vld [vmem:[%s4971_s5 + $0x110] ss:$12 sps:$4 sm:$0xff]  }
 0x145   : > { %4063 = vmatpush3.bf16.msra.mxu1 %v4547_v42  ;;  %v4565_v42 = vld [vmem:[%s4971_s5 + $0xf8] ss:$12 sps:$4 sm:$0xff]  }
 0x146   : > { %4064 = vmatprep.subr.bf16.mxu1 %v4550_v6 }
 0x149   : > { %4065 = vmatpush3.bf16.msra.mxu1 %v4550_v6 }
 0x14a   : > { %4066 = vmatprep.subr.bf16.mxu1 %v4553_v51 }
 0x14b   : > { %4035 = vmatmul.mubr.bf16.gmra.mrb[92].mxu1 %v4543_v54  ;;  %2546 = vmatmul.mubr.bf16.gmra.mrb[92].mxu0 %v5078_v62  ;;  %v4552_v62 = vld [vmem:[%s4971_s5 + $0x158] ss:$12 sps:$4 sm:$0xff]  }
 0x14c   : > { %4038 = vmatprep.mubr.bf16.mxu1 %v4545_v9  ;;  %2553 = vmatprep.mubr.bf16.mxu0 %v5082_v63  ;;  %v4554_v63 = vld [vmem:[%s4971_s5 + $0x170] ss:$12 sps:$4 sm:$0xff]  }
 0x14d   : > { %4067 = vmatpush3.bf16.msra.mxu1 %v4553_v51 }
 0x14e   : > { %4068 = vmatprep.subr.bf16.mxu1 %v4556_v14 }
 0x151   : > { %4069 = vmatpush3.bf16.msra.mxu1 %v4556_v14  ;;  %v4566_v14 = vld [vmem:[%s4971_s5 + $0x110] ss:$12 sps:$4 sm:$0xff]  }
 0x153   : > { %4039 = vmatmul.mubr.bf16.gmra.mrb[0].mxu1 %v4546_v58  ;;  %2554 = vmatmul.mubr.bf16.gmra.mrb[96].mxu0 %v5089_v3 }
 0x154   : > { %4042 = vmatprep.mubr.bf16.mxu1 %v4548_v59  ;;  %2561 = vmatprep.mubr.bf16.mxu0 %v5092_v4 }
 0x15b   : > { %4043 = vmatmul.mubr.bf16.gmra.mrb[4].mxu1 %v4549_v26  ;;  %2562 = vmatmul.mubr.bf16.gmra.mrb[100].mxu0 %v5099_v7  ;;  %v4557_v7 = vld [vmem:[%s4971_s5 + $0x38] ss:$12 sps:$4 sm:$0xff]  }
 0x15c   : > { %4046 = vmatprep.mubr.bf16.mxu1 %v4551_v27  ;;  %2569 = vmatprep.mubr.bf16.mxu0 %v5102_v8 }
 0x163   : > { %4047 = vmatmul.mubr.bf16.gmra.mrb[8].mxu1 %v4552_v62  ;;  %2570 = vmatmul.mubr.bf16.gmra.mrb[104].mxu0 %v5109_v10  ;;  %v4567_v62 = vld [vmem:[%s4971_s5 + $0x128] ss:$12 sps:$4 sm:$0xff]  }
 0x164   : > { %4050 = vmatprep.mubr.bf16.mxu1 %v4554_v63  ;;  %2577 = vmatprep.mubr.bf16.mxu0 %v5112_v11  ;;  %v4558_v11 = vld [vmem:[%s4971_s5 + $0x50] ss:$12 sps:$4 sm:$0xff]  }
 0x166   : > { %v3566_v3 = vpop.f32.mrb[0].mxu0 }
 0x167   : > { %v3567_v4 = vpop.f32.mrb[1].mxu0 }
 0x168   : > { %v5240_v29 = vadd.f32 %v3567_v4, %v3566_v3  ;;  %v3569_v30 = vpop.f32.mrb[2].mxu0 }
 0x169   : > { %v3570_v31 = vpop.f32.mrb[3].mxu0 }
 0x16a   : > { %v5243_v32 = vadd.f32 %v3570_v31, %v3569_v30  ;;  %v4568_v31 = vld [vmem:[%s4971_s5 + $0x140] ss:$12 sps:$4 sm:$0xff]  }
 0x16b   : > { %4051 = vmatmul.mubr.bf16.gmra.mrb[12].mxu1 %v4555_v28  ;;  %2578 = vmatmul.mubr.bf16.gmra.mrb[108].mxu0 %v5119_v12 }
 0x16c   : > { %2585 = vmatprep.mubr.bf16.mxu0 %v5122_v13  ;;  %4070 = vmatprep.mubr.bf16.mxu1 %v4557_v7 }
 0x16e   : > { %v3572_v8 = vpop.f32.mrb[4].mxu0 }
 0x16f   : > { %v3573_v10 = vpop.f32.mrb[5].mxu0 }
 0x170   : > { %v5248_v33 = vadd.f32 %v3573_v10, %v3572_v8  ;;  %v3575_v34 = vpop.f32.mrb[6].mxu0 }
 0x171   : > { %v3576_v36 = vpop.f32.mrb[7].mxu0 }
 0x172   : > { %v5251_v37 = vadd.f32 %v3576_v36, %v3575_v34 }
 0x173   : > { %2586 = vmatmul.mubr.bf16.gmra.mrb[112].mxu0 %v5132_v15  ;;  %4071 = vmatmul.mubr.bf16.vlgmr.msra.gmra.mrb[80].mxu1 %v4558_v11 }
 0x174   : > { %2593 = vmatprep.mubr.bf16.mxu0 %v5135_v16  ;;  %4074 = vmatprep.mubr.bf16.mxu1 %v4559_v35  ;;  %v4569_v35 = vld [vmem:[%s4971_s5 + $0x158] ss:$12 sps:$4 sm:$0xff]  }
 0x176   : > { %v3578_v12 = vpop.f32.mrb[8].mxu0 }
 0x177   : > { %v3579_v13 = vpop.f32.mrb[9].mxu0 }
 0x178   : > { %v5256_v40 = vadd.f32 %v3579_v13, %v3578_v12  ;;  %v3581_v41 = vpop.f32.mrb[10].mxu0 }
 0x179   : > { %v3582_v44 = vpop.f32.mrb[11].mxu0 }
 0x17a   : > { %v5259_v46 = vadd.f32 %v3582_v44, %v3581_v41  ;;  %v4570_v44 = vld [vmem:[%s4971_s5 + $0x170] ss:$12 sps:$4 sm:$0xff]  }
 0x17b   : > { %2594 = vmatmul.mubr.bf16.gmra.mrb[116].mxu0 %v5142_v17  ;;  %4075 = vmatmul.mubr.bf16.gmra.mrb[84].mxu1 %v4560_v38 }
 0x17c   : > { %2601 = vmatprep.mubr.bf16.mxu0 %v5145_v18  ;;  %4078 = vmatprep.mubr.bf16.mxu1 %v4561_v43 }
 0x17e   : > { %v3584_v15 = vpop.f32.mrb[12].mxu0 }
 0x17f   : > { %v3585_v16 = vpop.f32.mrb[13].mxu0 }
 0x180   : > { %v5264_v49 = vadd.f32 %v3585_v16, %v3584_v15  ;;  %v3587_v52 = vpop.f32.mrb[14].mxu0 }
 0x181   : > { %v3588_v55 = vpop.f32.mrb[15].mxu0 }
 0x182   : > { %v5267_v56 = vadd.f32 %v3588_v55, %v3587_v52  ;;  %v4573_v55 = vld [vmem:[%s4971_s5 + $0x188] ss:$12 sps:$4 sm:$0xff]  }
 0x183   : > { %2602 = vmatmul.mubr.bf16.gmra.mrb[120].mxu0 %v5152_v19  ;;  %4079 = vmatmul.mubr.bf16.gmra.mrb[88].mxu1 %v4562_v48 }
 0x184   : > { %2609 = vmatprep.mubr.bf16.mxu0 %v5155_v20  ;;  %4082 = vmatprep.mubr.bf16.mxu1 %v4563_v53  ;;  %v4571_v53 = vld [vmem:[%s4971_s5 + $0x19c] ss:$12 sps:$4 sm:$0xff]  }
 0x186   : > { %v3590_v17 = vpop.f32.mrb[16].mxu0  ;;  %v3702_v18 = vpop.f32.mrb[16].mxu1 }
 0x187   : > { %v3591_v57 = vpop.f32.mrb[17].mxu0  ;;  %v3703_v60 = vpop.f32.mrb[17].mxu1 }
 0x188   : > { %v5272_v0 = vadd.f32 %v3591_v57, %v3590_v17  ;;  %v3593_v1 = vpop.f32.mrb[18].mxu0  ;;  %v5274_v2 = vadd.f32 %v3703_v60, %v3702_v18  ;;  %v3705_v39 = vpop.f32.mrb[18].mxu1 }
 0x189   : > { %v3594_v47 = vpop.f32.mrb[19].mxu0  ;;  %v3706_v5 = vpop.f32.mrb[19].mxu1 }
 0x18a   : > { %v5277_v19 = vadd.f32 %v3594_v47, %v3593_v1  ;;  %v5279_v20 = vadd.f32 %v3706_v5, %v3705_v39  ;;  %v4574_v39 = vld [vmem:[%s4971_s5 + $0x198] ss:$12 sps:$4 sm:$0xff]  }
 0x18b   : > { %2610 = vmatmul.mubr.bf16.gmra.mrb[124].mxu0 %v5162_v21  ;;  %4083 = vmatmul.mubr.bf16.gmra.mrb[92].mxu1 %v4564_v61 }
 0x18c   : > { %2617 = vmatprep.mubr.bf16.mxu0 %v5165_v22  ;;  %4086 = vmatprep.mubr.bf16.mxu1 %v4565_v42  ;;  %v4575_v42 = vld [vmem:[%s4971_s5 + $0x1a0] ss:$12 sps:$4 sm:$0xff]  }
 0x18e   : > { %v3596_v6 = vpop.f32.mrb[20].mxu0  ;;  %v3708_v51 = vpop.f32.mrb[20].mxu1 }
 0x18f   : > { %v3597_v54 = vpop.f32.mrb[21].mxu0  ;;  %v3709_v9 = vpop.f32.mrb[21].mxu1 }
 0x190   : > { %v5284_v58 = vadd.f32 %v3597_v54, %v3596_v6  ;;  %v3599_v59 = vpop.f32.mrb[22].mxu0  ;;  %v5286_v26 = vadd.f32 %v3709_v9, %v3708_v51  ;;  %v3711_v27 = vpop.f32.mrb[22].mxu1 }
 0x191   : > { %v3600_v63 = vpop.f32.mrb[23].mxu0  ;;  %v3712_v3 = vpop.f32.mrb[23].mxu1 }
 0x192   : > { %v5289_v21 = vadd.f32 %v3600_v63, %v3599_v59  ;;  %v5291_v22 = vadd.f32 %v3712_v3, %v3711_v27 }
 0x193   : > { %2618 = vmatmul.mubr.bf16.gmra.mrb[128].mxu0 %v5172_v23  ;;  %4087 = vmatmul.mubr.bf16.gmra.mrb[0].mxu1 %v4566_v14 }
 0x194   : > { %2625 = vmatprep.mubr.bf16.mxu0 %v5175_v24  ;;  %4090 = vmatprep.mubr.bf16.mxu1 %v4567_v62 }
 0x196   : > { %v3602_v4 = vpop.f32.mrb[24].mxu0  ;;  %v3714_v28 = vpop.f32.mrb[24].mxu1 }
 0x197   : > { %v3603_v30 = vpop.f32.mrb[25].mxu0  ;;  %v3715_v7 = vpop.f32.mrb[25].mxu1 }
 0x198   : > { %v5296_v8 = vadd.f32 %v3603_v30, %v3602_v4  ;;  %v3605_v10 = vpop.f32.mrb[26].mxu0  ;;  %v5298_v11 = vadd.f32 %v3715_v7, %v3714_v28  ;;  %v3717_v34 = vpop.f32.mrb[26].mxu1 }
 0x199   : > { %v3606_v36 = vpop.f32.mrb[27].mxu0  ;;  %v3718_v12 = vpop.f32.mrb[27].mxu1 }
 0x19a   : > { %v5301_v23 = vadd.f32 %v3606_v36, %v3605_v10  ;;  %v5303_v24 = vadd.f32 %v3718_v12, %v3717_v34 }
 0x19b   : > { %2626 = vmatmul.mubr.bf16.gmra.mrb[132].mxu0 %v5182_v25  ;;  %4091 = vmatmul.mubr.bf16.gmra.mrb[4].mxu1 %v4568_v31 }
 0x19c   : > { %2633 = vmatprep.mubr.bf16.mxu0 %v5199_v45  ;;  %4094 = vmatprep.mubr.bf16.mxu1 %v4569_v35 }
 0x19e   : > { %v3608_v13 = vpop.f32.mrb[28].mxu0  ;;  %v3720_v38 = vpop.f32.mrb[28].mxu1 }
 0x19f   : > { %v3609_v41 = vpop.f32.mrb[29].mxu0  ;;  %v3721_v43 = vpop.f32.mrb[29].mxu1 }
 0x1a0   : > { %v5308_v15 = vadd.f32 %v3609_v41, %v3608_v13  ;;  %v3611_v16 = vpop.f32.mrb[30].mxu0  ;;  %v5310_v48 = vadd.f32 %v3721_v43, %v3720_v38  ;;  %v3723_v52 = vpop.f32.mrb[30].mxu1 }
 0x1a1   : > { %v3612_v25 = vpop.f32.mrb[31].mxu0  ;;  %v3724_v17 = vpop.f32.mrb[31].mxu1 }
 0x1a2   : > { %v5314_v18 = vadd.f32 %v3612_v25, %v3611_v16  ;;  %v5316_v45 = vadd.f32 %v3724_v17, %v3723_v52 }
 0x1a3   : > { %2634 = vmatmul.mubr.bf16.gmra.mrb[136].mxu0 %v5205_v50  ;;  %4095 = vmatmul.mubr.bf16.gmra.mrb[8].mxu1 %v4570_v44 }
 0x1a4   : > { %2641 = vmatprep.mubr.bf16.mxu0 %v4571_v53  ;;  %4098 = vmatprep.mubr.bf16.mxu1 %v4573_v55 }
 0x1a6   : > { %v3614_v57 = vpop.f32.mrb[32].mxu0  ;;  %v3726_v60 = vpop.f32.mrb[32].mxu1 }
 0x1a7   : > { %v3615_v61 = vpop.f32.mrb[33].mxu0  ;;  %v3727_v1 = vpop.f32.mrb[33].mxu1 }
 0x1a8   : > { %v3616_v47 = vadd.f32 %v3615_v61, %v3614_v57  ;;  %v3617_v5 = vpop.f32.mrb[34].mxu0  ;;  %v5321_v6 = vadd.f32 %v3727_v1, %v3726_v60  ;;  %v3729_v51 = vpop.f32.mrb[34].mxu1 }
 0x1a9   : > { %v3618_v54 = vpop.f32.mrb[35].mxu0  ;;  %v3730_v9 = vpop.f32.mrb[35].mxu1 }
 0x1aa   : > { %v3619_v14 = vadd.f32 %v3618_v54, %v3617_v5  ;;  %v5323_v59 = vadd.f32 %v3730_v9, %v3729_v51 }
 0x1ab   : > { %2642 = vmatmul.mubr.bf16.gmra.mrb[140].mxu0 %v4574_v39  ;;  %4099 = vmatmul.mubr.bf16.gmra.mrb[12].mxu1 %v4575_v42 }
 0x1ae   : > { %v3620_v50 = vpop.f32.mrb[36].mxu0  ;;  %v3732_v27 = vpop.f32.mrb[36].mxu1 }
 0x1af   : > { %v3621_v62 = vpop.f32.mrb[37].mxu0  ;;  %v3733_v63 = vpop.f32.mrb[37].mxu1 }
 0x1b0   : > { %v3622_v3 = vadd.f32 %v3621_v62, %v3620_v50  ;;  %v3623_v4 = vpop.f32.mrb[38].mxu0  ;;  %v5325_v28 = vadd.f32 %v3733_v63, %v3732_v27  ;;  %v3735_v30 = vpop.f32.mrb[38].mxu1  ;;  %v5337_v62 = vld [vmem:[#allocation7] ss:$0 sm:$0xff] }
 0x1b1   : > { %v3624_v7 = vpop.f32.mrb[39].mxu0  ;;  %v3736_v31 = vpop.f32.mrb[39].mxu1 }
 0x1b2   : > { %v3625_v10 = vadd.f32 %v3624_v7, %v3623_v4  ;;  %v5327_v34 = vadd.f32 %v3736_v31, %v3735_v30  ;;  %v4202_v30 = vadd.f32 %v3616_v47, %v5337_v62 }
 0x1b6   : > { %v3626_v35 = vpop.f32.mrb[40].mxu0  ;;  %v3738_v36 = vpop.f32.mrb[40].mxu1 }
 0x1b7   : > { %v3627_v12 = vpop.f32.mrb[41].mxu0  ;;  %v3739_v13 = vpop.f32.mrb[41].mxu1 }
 0x1b8   : > { %v3628_v38 = vadd.f32 %v3627_v12, %v3626_v35  ;;  %v3629_v41 = vpop.f32.mrb[42].mxu0  ;;  %v5329_v43 = vadd.f32 %v3739_v13, %v3738_v36  ;;  %v3741_v44 = vpop.f32.mrb[42].mxu1 }
 0x1b9   : > { %v3630_v16 = vpop.f32.mrb[43].mxu0  ;;  %v3742_v52 = vpop.f32.mrb[43].mxu1 }
 0x1ba   : > { %v3631_v53 = vadd.f32 %v3630_v16, %v3629_v41  ;;  %v5331_v55 = vadd.f32 %v3742_v52, %v3741_v44  ;;  %v4210_v41 = vadd.f32 %v3619_v14, %v5337_v62 }
 0x1be   : > { %v3632_v25 = vpop.f32.mrb[44].mxu0  ;;  %v3744_v17 = vpop.f32.mrb[44].mxu1 }
 0x1bf   : > { %v3633_v57 = vpop.f32.mrb[45].mxu0  ;;  %v3745_v60 = vpop.f32.mrb[45].mxu1 }
 0x1c0   : > { %v3634_v61 = vadd.f32 %v3633_v57, %v3632_v25  ;;  %v3635_v1 = vpop.f32.mrb[46].mxu0  ;;  %v5333_v39 = vadd.f32 %v3745_v60, %v3744_v17  ;;  %v3747_v42 = vpop.f32.mrb[46].mxu1 }
 0x1c1   : > { %v3636_v5 = vpop.f32.mrb[47].mxu0  ;;  %v3748_v51 = vpop.f32.mrb[47].mxu1 }
 0x1c2   : > { %v3637_v54 = vadd.f32 %v3636_v5, %v3635_v1  ;;  %v5335_v9 = vadd.f32 %v3748_v51, %v3747_v42  ;;  %v4198_v1 = vadd.f32 %v3622_v3, %v5337_v62 }
 0x1c6   : > { %v3638_v50 = vpop.f32.mrb[48].mxu0  ;;  %v3750_v27 = vpop.f32.mrb[48].mxu1 }
 0x1c7   : > { %v3639_v63 = vpop.f32.mrb[49].mxu0  ;;  %v3751_v4 = vpop.f32.mrb[49].mxu1 }
 0x1c8   : > { %v5340_v7 = vadd.f32 %v3639_v63, %v3638_v50  ;;  %v3752_v31 = vadd.f32 %v3751_v4, %v3750_v27  ;;  %v3641_v35 = vpop.f32.mrb[50].mxu0  ;;  %v3753_v36 = vpop.f32.mrb[50].mxu1  ;;  %v4206_v63 = vadd.f32 %v3625_v10, %v5337_v62 }
 0x1c9   : > { %v3642_v12 = vpop.f32.mrb[51].mxu0  ;;  %v3754_v13 = vpop.f32.mrb[51].mxu1 }
 0x1ca   : > { %v5343_v44 = vadd.f32 %v4202_v30, %v3752_v31  ;;  %v5345_v16 = vadd.f32 %v3642_v12, %v3641_v35  ;;  %v3755_v52 = vadd.f32 %v3754_v13, %v3753_v36 }
 0x1cc   : > { %v5347_v25 = vadd.f32 %v4210_v41, %v3755_v52  ;;  %v4218_v41 = vadd.f32 %v3628_v38, %v5337_v62 }
 0x1ce   : > { %v3644_v17 = vpop.f32.mrb[52].mxu0  ;;  %v3756_v57 = vpop.f32.mrb[52].mxu1 }
 0x1cf   : > { %v3645_v60 = vpop.f32.mrb[53].mxu0  ;;  %v3757_v47 = vpop.f32.mrb[53].mxu1 }
 0x1d0   : > { %v5350_v42 = vadd.f32 %v3645_v60, %v3644_v17  ;;  %v3758_v5 = vadd.f32 %v3757_v47, %v3756_v57  ;;  %v3647_v51 = vpop.f32.mrb[54].mxu0  ;;  %v3759_v50 = vpop.f32.mrb[54].mxu1 }
 0x1d1   : > { %v3648_v27 = vpop.f32.mrb[55].mxu0  ;;  %v3760_v14 = vpop.f32.mrb[55].mxu1 }
 0x1d2   : > { %v5353_v4 = vadd.f32 %v4198_v1, %v3758_v5  ;;  %v5355_v30 = vadd.f32 %v3648_v27, %v3647_v51  ;;  %v3761_v31 = vadd.f32 %v3760_v14, %v3759_v50  ;;  %v4226_v1 = vadd.f32 %v3631_v53, %v5337_v62 }
 0x1d4   : > { %5661 = vst [vmem:[#allocation12_spill] sm:$0xff] %v5353_v4  ;;  %v5357_v35 = vadd.f32 %v4206_v63, %v3761_v31 }
 0x1d6   : > { %5662 = vst [vmem:[#allocation13_spill] sm:$0xff] %v5357_v35  ;;  %v3650_v36 = vpop.f32.mrb[56].mxu0  ;;  %v3762_v12 = vpop.f32.mrb[56].mxu1 }
 0x1d7   : > { %v3651_v13 = vpop.f32.mrb[57].mxu0  ;;  %v3763_v3 = vpop.f32.mrb[57].mxu1 }
 0x1d8   : > { %v5360_v52 = vadd.f32 %v3651_v13, %v3650_v36  ;;  %v3764_v17 = vadd.f32 %v3763_v3, %v3762_v12  ;;  %v3653_v57 = vpop.f32.mrb[58].mxu0  ;;  %v3765_v60 = vpop.f32.mrb[58].mxu1  ;;  %v4214_v36 = vadd.f32 %v3634_v61, %v5337_v62 }
 0x1d9   : > { %v3654_v47 = vpop.f32.mrb[59].mxu0  ;;  %v3766_v10 = vpop.f32.mrb[59].mxu1 }
 0x1da   : > { %v5363_v5 = vadd.f32 %v4218_v41, %v3764_v17  ;;  %v5365_v51 = vadd.f32 %v3654_v47, %v3653_v57  ;;  %v3767_v50 = vadd.f32 %v3766_v10, %v3765_v60  ;;  %v4222_v41 = vadd.f32 %v3637_v54, %v5337_v62 }
 0x1db   : > { %v4118_v10 = vadd.f32 %v5248_v33, %v5337_v62  ;;  %v4128_v54 = vadd.f32 %v5251_v37, %v5337_v62  ;;  %v4133_v33 = vadd.f32 %v5243_v32, %v5337_v62 }
 0x1dc   : > { %v5367_v27 = vadd.f32 %v4226_v1, %v3767_v50  ;;  %v4123_v50 = vadd.f32 %v5240_v29, %v5337_v62 }
 0x1de   : > { %v3656_v14 = vpop.f32.mrb[60].mxu0  ;;  %v3768_v63 = vpop.f32.mrb[60].mxu1 }
 0x1df   : > { %v3657_v31 = vpop.f32.mrb[61].mxu0  ;;  %v3769_v38 = vpop.f32.mrb[61].mxu1 }
 0x1e0   : > { %v5370_v12 = vadd.f32 %v3657_v31, %v3656_v14  ;;  %v3770_v13 = vadd.f32 %v3769_v38, %v3768_v63  ;;  %v3659_v3 = vpop.f32.mrb[62].mxu0  ;;  %v3771_v35 = vpop.f32.mrb[62].mxu1 }
 0x1e1   : > { %v3660_v4 = vpop.f32.mrb[63].mxu0  ;;  %v3772_v53 = vpop.f32.mrb[63].mxu1 }
 0x1e2   : > { %v5373_v17 = vadd.f32 %v4214_v36, %v3770_v13  ;;  %v5375_v57 = vadd.f32 %v3660_v4, %v3659_v3  ;;  %v3773_v60 = vadd.f32 %v3772_v53, %v3771_v35  ;;  %v4234_v4 = vadd.f32 %v5340_v7, %v5337_v62 }
 0x1e3   : > { %v4242_v3 = vadd.f32 %v5345_v16, %v5337_v62 }
 0x1e4   : > { %v5377_v47 = vadd.f32 %v4222_v41, %v3773_v60 }
 0x1e6   : > { %v3976_v61 = vpop.f32.mrb[64].mxu0  ;;  %v3774_v1 = vpop.f32.mrb[64].mxu1 }
 0x1e7   : > { %v4119_v14 = vadd.f32 %v4118_v10, %v3976_v61  ;;  %v950_v63 = vpop.f32.mrb[65].mxu0  ;;  %v3775_v31 = vpop.f32.mrb[65].mxu1 }
 0x1e8   : > { %v4124_v35 = vadd.f32 %v4123_v50, %v950_v63  ;;  %v3776_v38 = vadd.f32 %v3775_v31, %v3774_v1  ;;  %v3977_v36 = vpop.f32.mrb[66].mxu0  ;;  %v3777_v13 = vpop.f32.mrb[66].mxu1 }
 0x1e9   : > { %v5392_v29 = vadd.f32 %v4119_v14, %v5286_v26  ;;  %v4129_v53 = vadd.f32 %v4128_v54, %v3977_v36  ;;  %v953_v41 = vpop.f32.mrb[67].mxu0  ;;  %v3778_v60 = vpop.f32.mrb[67].mxu1  ;;  %v4138_v26 = vadd.f32 %v5264_v49, %v5337_v62  ;;  %v4153_v49 = vadd.f32 %v5259_v46, %v5337_v62 }
 0x1ea   : > { %v5395_v37 = vadd.f32 %v4124_v35, %v5274_v2  ;;  %v5397_v7 = vadd.f32 %v4234_v4, %v3776_v38  ;;  %v4134_v10 = vadd.f32 %v4133_v33, %v953_v41  ;;  %v3779_v61 = vadd.f32 %v3778_v60, %v3777_v13 }
 0x1eb   : > { %v5400_v1 = vadd.f32 %v4129_v53, %v5291_v22  ;;  %v4143_v2 = vadd.f32 %v5256_v40, %v5337_v62  ;;  %v4148_v22 = vadd.f32 %v5267_v56, %v5337_v62  ;;  %v4238_v13 = vadd.f32 %v5355_v30, %v5337_v62 }
 0x1ec   : > { %v5403_v32 = vadd.f32 %v4134_v10, %v5279_v20  ;;  %v5405_v16 = vadd.f32 %v4242_v3, %v3779_v61  ;;  %v4230_v20 = vadd.f32 %v5350_v42, %v5337_v62 }
 0x1ee   : > { %v3980_v50 = vpop.f32.mrb[68].mxu0  ;;  %v3780_v14 = vpop.f32.mrb[68].mxu1 }
 0x1ef   : > { %v4139_v63 = vadd.f32 %v4138_v26, %v3980_v50  ;;  %v966_v31 = vpop.f32.mrb[69].mxu0  ;;  %v3781_v54 = vpop.f32.mrb[69].mxu1 }
 0x1f0   : > { %v4144_v4 = vadd.f32 %v4143_v2, %v966_v31  ;;  %v3782_v35 = vadd.f32 %v3781_v54, %v3780_v14  ;;  %v3981_v38 = vpop.f32.mrb[70].mxu0  ;;  %v3783_v36 = vpop.f32.mrb[70].mxu1 }
 0x1f1   : > { %v5420_v40 = vadd.f32 %v4139_v63, %v5310_v48  ;;  %v4149_v33 = vadd.f32 %v4148_v22, %v3981_v38  ;;  %v969_v3 = vpop.f32.mrb[71].mxu0  ;;  %v3784_v53 = vpop.f32.mrb[71].mxu1  ;;  %v4158_v48 = vadd.f32 %v5284_v58, %v5337_v62  ;;  %v4173_v58 = vadd.f32 %v5277_v19, %v5337_v62 }
 0x1f2   : > { %v5423_v56 = vadd.f32 %v4144_v4, %v5298_v11  ;;  %v5425_v42 = vadd.f32 %v4230_v20, %v3782_v35  ;;  %v4154_v41 = vadd.f32 %v4153_v49, %v969_v3  ;;  %v3785_v60 = vadd.f32 %v3784_v53, %v3783_v36 }
 0x1f3   : > { %v5428_v10 = vadd.f32 %v4149_v33, %v5316_v45  ;;  %v4163_v11 = vadd.f32 %v5272_v0, %v5337_v62  ;;  %v4168_v45 = vadd.f32 %v5289_v21, %v5337_v62  ;;  %v4258_v20 = vadd.f32 %v5365_v51, %v5337_v62 }
 0x1f4   : > { %v5431_v46 = vadd.f32 %v4154_v41, %v5303_v24  ;;  %v5433_v30 = vadd.f32 %v4238_v13, %v3785_v60  ;;  %v4250_v24 = vadd.f32 %v5360_v52, %v5337_v62 }
 0x1f6   : > { %v3984_v61 = vpop.f32.mrb[72].mxu0  ;;  %v3786_v26 = vpop.f32.mrb[72].mxu1 }
 0x1f7   : > { %v4159_v50 = vadd.f32 %v4158_v48, %v3984_v61  ;;  %v982_v14 = vpop.f32.mrb[73].mxu0  ;;  %v3787_v2 = vpop.f32.mrb[73].mxu1 }
 0x1f8   : > { %v4164_v63 = vadd.f32 %v4163_v11, %v982_v14  ;;  %v3788_v31 = vadd.f32 %v3787_v2, %v3786_v26  ;;  %v3985_v54 = vpop.f32.mrb[74].mxu0  ;;  %v3789_v22 = vpop.f32.mrb[74].mxu1 }
 0x1f9   : > { %v5448_v0 = vadd.f32 %v4159_v50, %v5325_v28  ;;  %v4169_v4 = vadd.f32 %v4168_v45, %v3985_v54  ;;  %v985_v35 = vpop.f32.mrb[75].mxu0  ;;  %v3790_v38 = vpop.f32.mrb[75].mxu1  ;;  %v4178_v28 = vadd.f32 %v5308_v15, %v5337_v62  ;;  %v4193_v15 = vadd.f32 %v5301_v23, %v5337_v62 }
 0x1fa   : > { %v5451_v21 = vadd.f32 %v4164_v63, %v5321_v6  ;;  %v5453_v52 = vadd.f32 %v4250_v24, %v3788_v31  ;;  %v4174_v36 = vadd.f32 %v4173_v58, %v985_v35  ;;  %v3791_v49 = vadd.f32 %v3790_v38, %v3789_v22 }
 0x1fb   : > { %v5456_v13 = vadd.f32 %v4169_v4, %v5327_v34  ;;  %v4183_v6 = vadd.f32 %v5296_v8, %v5337_v62  ;;  %v4188_v34 = vadd.f32 %v5314_v18, %v5337_v62  ;;  %v4254_v50 = vadd.f32 %v5375_v57, %v5337_v62 }
 0x1fc   : > { %v5459_v19 = vadd.f32 %v4174_v36, %v5323_v59  ;;  %v5461_v51 = vadd.f32 %v4258_v20, %v3791_v49  ;;  %v4246_v59 = vadd.f32 %v5370_v12, %v5337_v62 }
 0x1fe   : > { %v3988_v33 = vpop.f32.mrb[76].mxu0  ;;  %v3792_v3 = vpop.f32.mrb[76].mxu1 }
 0x1ff   : > { %v4179_v53 = vadd.f32 %v4178_v28, %v3988_v33  ;;  %v998_v41 = vpop.f32.mrb[77].mxu0  ;;  %v3793_v60 = vpop.f32.mrb[77].mxu1 }
 0x200   : > { %v4184_v48 = vadd.f32 %v4183_v6, %v998_v41  ;;  %v3794_v61 = vadd.f32 %v3793_v60, %v3792_v3  ;;  %v3989_v26 = vpop.f32.mrb[78].mxu0  ;;  %v3795_v11 = vpop.f32.mrb[78].mxu1 }
 0x201   : > { %v5476_v8 = vadd.f32 %v4179_v53, %v5333_v39  ;;  %v4189_v14 = vadd.f32 %v4188_v34, %v3989_v26  ;;  %v1001_v2 = vpop.f32.mrb[79].mxu0  ;;  %v3796_v45 = vpop.f32.mrb[79].mxu1 }
 0x202   : > { %v4185_v18 = vadd.f32 %v4184_v48, %v5329_v43  ;;  %v5479_v24 = vadd.f32 %v4246_v59, %v3794_v61  ;;  %v4194_v12 = vadd.f32 %v4193_v15, %v1001_v2  ;;  %v3797_v63 = vadd.f32 %v3796_v45, %v3795_v11 }
 0x203   : > { %v5482_v31 = vadd.f32 %v4189_v14, %v5335_v9 }
 0x204   : > { %v4195_v23 = vadd.f32 %v4194_v12, %v5331_v55  ;;  %v5485_v54 = vadd.f32 %v4254_v50, %v3797_v63 }
 0x206   : > { %v3838_v62 = vpop.f32.mrb[80].mxu0 }
 0x207   : > { %v3839_v57 = vpop.f32.mrb[81].mxu0 }
 0x208   : > { %v3840_v39 = vadd.f32 %v3839_v57, %v3838_v62  ;;  %v3841_v22 = vpop.f32.mrb[82].mxu0 }
 0x209   : > { %v3842_v58 = vpop.f32.mrb[83].mxu0 }
 0x20a   : > { %v3843_v20 = vadd.f32 %v3842_v58, %v3841_v22  ;;  %v5488_v4 = vadd.f32 %v5395_v37, %v3840_v39 }
 0x20c   : > { %v5491_v43 = vadd.f32 %v5403_v32, %v3843_v20 }
 0x20e   : > { %v3844_v35 = vpop.f32.mrb[84].mxu0 }
 0x20f   : > { %v3845_v38 = vpop.f32.mrb[85].mxu0 }
 0x210   : > { %v3846_v9 = vadd.f32 %v3845_v38, %v3844_v35  ;;  %v3847_v36 = vpop.f32.mrb[86].mxu0 }
 0x211   : > { %v3848_v49 = vpop.f32.mrb[87].mxu0 }
 0x212   : > { %v3849_v55 = vadd.f32 %v3848_v49, %v3847_v36  ;;  %v4121_v28 = vadd.f32 %v5392_v29, %v3846_v9 }
 0x214   : > { %v4131_v33 = vadd.f32 %v5400_v1, %v3849_v55 }
 0x216   : > { %v3850_v3 = vpop.f32.mrb[88].mxu0 }
 0x217   : > { %v3851_v6 = vpop.f32.mrb[89].mxu0 }
 0x218   : > { %v3852_v53 = vadd.f32 %v3851_v6, %v3850_v3  ;;  %v3853_v41 = vpop.f32.mrb[90].mxu0 }
 0x219   : > { %v3854_v60 = vpop.f32.mrb[91].mxu0 }
 0x21a   : > { %v3855_v37 = vadd.f32 %v3854_v60, %v3853_v41  ;;  %v5496_v34 = vadd.f32 %v5423_v56, %v3852_v53 }
 0x21c   : > { %v5499_v32 = vadd.f32 %v5431_v46, %v3855_v37 }
 0x21e   : > { %v3856_v59 = vpop.f32.mrb[92].mxu0 }
 0x21f   : > { %v3857_v48 = vpop.f32.mrb[93].mxu0 }
 0x220   : > { %v3858_v61 = vadd.f32 %v3857_v48, %v3856_v59  ;;  %v3859_v26 = vpop.f32.mrb[94].mxu0 }
 0x221   : > { %v3860_v11 = vpop.f32.mrb[95].mxu0 }
 0x222   : > { %v3861_v29 = vadd.f32 %v3860_v11, %v3859_v26  ;;  %v4141_v1 = vadd.f32 %v5420_v40, %v3858_v61 }
 0x224   : > { %v5503_v15 = vadd.f32 %v5428_v10, %v3861_v29 }
 0x226   : > { %v3862_v50 = vpop.f32.mrb[96].mxu0 }
 0x227   : > { %v3863_v14 = vpop.f32.mrb[97].mxu0 }
 0x228   : > { %v3864_v2 = vadd.f32 %v3863_v14, %v3862_v50  ;;  %v3865_v45 = vpop.f32.mrb[98].mxu0 }
 0x229   : > { %v3866_v56 = vpop.f32.mrb[99].mxu0 }
 0x22a   : > { %v3867_v12 = vadd.f32 %v3866_v56, %v3865_v45  ;;  %v5506_v46 = vadd.f32 %v5451_v21, %v3864_v2 }
 0x22c   : > { %v5509_v63 = vadd.f32 %v5459_v19, %v3867_v12 }
 0x22e   : > { %v3868_v62 = vpop.f32.mrb[100].mxu0 }
 0x22f   : > { %v3869_v57 = vpop.f32.mrb[101].mxu0 }
 0x230   : > { %v3870_v39 = vadd.f32 %v3869_v57, %v3868_v62  ;;  %v3871_v22 = vpop.f32.mrb[102].mxu0 }
 0x231   : > { %v3872_v40 = vpop.f32.mrb[103].mxu0 }
 0x232   : > { %v3873_v58 = vadd.f32 %v3872_v40, %v3871_v22  ;;  %v5512_v10 = vadd.f32 %v5448_v0, %v3870_v39 }
 0x234   : > { %v5515_v20 = vadd.f32 %v5456_v13, %v3873_v58 }
 0x236   : > { %v3874_v35 = vpop.f32.mrb[104].mxu0 }
 0x237   : > { %v3875_v38 = vpop.f32.mrb[105].mxu0 }
 0x238   : > { %v3876_v9 = vadd.f32 %v3875_v38, %v3874_v35  ;;  %v3877_v21 = vpop.f32.mrb[106].mxu0 }
 0x239   : > { %v3878_v36 = vpop.f32.mrb[107].mxu0 }
 0x23a   : > { %v3879_v49 = vadd.f32 %v3878_v36, %v3877_v21  ;;  %v5517_v19 = vadd.f32 %v4185_v18, %v3876_v9 }
 0x23c   : > { %v5519_v55 = vadd.f32 %v4195_v23, %v3879_v49 }
 0x23e   : > { %v3880_v3 = vpop.f32.mrb[108].mxu0 }
 0x23f   : > { %v3881_v6 = vpop.f32.mrb[109].mxu0 }
 0x240   : > { %v3882_v53 = vadd.f32 %v3881_v6, %v3880_v3  ;;  %v3883_v41 = vpop.f32.mrb[110].mxu0 }
 0x241   : > { %v3884_v0 = vpop.f32.mrb[111].mxu0 }
 0x242   : > { %v3885_v60 = vadd.f32 %v3884_v0, %v3883_v41  ;;  %v5522_v13 = vadd.f32 %v5476_v8, %v3882_v53  ;;  %v5663_v53 = vld [vmem:[#allocation12_spill] sm:$0xff] }
 0x244   : > { %v5525_v37 = vadd.f32 %v5482_v31, %v3885_v60 }
 0x246   : > { %v3886_v59 = vpop.f32.mrb[112].mxu0  ;;  %v4072_v48 = vpop.f32.mrb[80].mxu1 }
 0x247   : > { %v4122_v61 = vadd.f32 %v4121_v28, %v4072_v48  ;;  %v3887_v18 = vpop.f32.mrb[113].mxu0  ;;  %v2684_v26 = vpop.f32.mrb[81].mxu1  ;;  %v5664_v48 = vld [vmem:[#allocation13_spill] sm:$0xff] }
 0x248   : > { %v3888_v23 = vadd.f32 %v3887_v18, %v3886_v59  ;;  %v4127_v11 = vadd.f32 %v5488_v4, %v2684_v26  ;;  %v3889_v29 = vpop.f32.mrb[114].mxu0  ;;  %v4073_v50 = vpop.f32.mrb[82].mxu1 }
 0x249   : > { %v4132_v14 = vadd.f32 %v4131_v33, %v4073_v50  ;;  %v3890_v2 = vpop.f32.mrb[115].mxu0  ;;  %v2687_v45 = vpop.f32.mrb[83].mxu1  ;;  %v2845_v12 = vmax.f32 %v4122_v61, 0.0 }
 0x24a   : > { %v3891_v56 = vadd.f32 %v3890_v2, %v3889_v29  ;;  %v4137_v8 = vadd.f32 %v5491_v43, %v2687_v45  ;;  %v5531_v31 = vadd.f32 %v5343_v44, %v3888_v23  ;;  %v2843_v28 = vmax.f32 %v4127_v11, 0.0 }
 0x24b   : > { %v2846_v62 = vmax.f32 %v4132_v14, 0.0 }
 0x24c   : > { %v2844_v57 = vmax.f32 %v4137_v8, 0.0  ;;  %v5534_v39 = vadd.f32 %v5347_v25, %v3891_v56 }
 0x24d   : > { %v3463_v4 = vpack.c.bf16 %v2846_v62, %v2845_v12 }
 0x24e   : > { %v3458_v22 = vpack.c.bf16 %v2844_v57, %v2843_v28  ;;  %v3892_v40 = vpop.f32.mrb[116].mxu0  ;;  %v4076_v58 = vpop.f32.mrb[84].mxu1 }
 0x24f   : > { %3535 = vst [vmem:[%s5536_s22 + $0x8] sm:$0xff] %v3463_v4   ;;  %v4142_v43 = vadd.f32 %v4141_v1, %v4076_v58  ;;  %v3893_v33 = vpop.f32.mrb[117].mxu0  ;;  %v2700_v44 = vpop.f32.mrb[85].mxu1 }
 0x250   : > { %3459 = vst [vmem:[%s5536_s22] sm:$0xff] %v3458_v22   ;;  %v3894_v35 = vadd.f32 %v3893_v33, %v3892_v40  ;;  %v4147_v38 = vadd.f32 %v5496_v34, %v2700_v44  ;;  %v3895_v9 = vpop.f32.mrb[118].mxu0  ;;  %v4077_v21 = vpop.f32.mrb[86].mxu1 }
 0x251   : > { %v4152_v25 = vadd.f32 %v5503_v15, %v4077_v21  ;;  %v3896_v36 = vpop.f32.mrb[119].mxu0  ;;  %v2703_v49 = vpop.f32.mrb[87].mxu1  ;;  %v2849_v1 = vmax.f32 %v4142_v43, 0.0 }
 0x252   : > { %v3897_v3 = vadd.f32 %v3896_v36, %v3895_v9  ;;  %v4157_v6 = vadd.f32 %v5499_v32, %v2703_v49  ;;  %v4200_v41 = vadd.f32 %v5663_v53, %v3894_v35  ;;  %v2847_v60 = vmax.f32 %v4147_v38, 0.0 }
 0x253   : > { %v2850_v0 = vmax.f32 %v4152_v25, 0.0 }
 0x254   : > { %v2848_v59 = vmax.f32 %v4157_v6, 0.0  ;;  %v4208_v61 = vadd.f32 %v5664_v48, %v3897_v3 }
 0x255   : > { %v3473_v34 = vpack.c.bf16 %v2850_v0, %v2849_v1 }
 0x256   : > { %v3468_v18 = vpack.c.bf16 %v2848_v59, %v2847_v60  ;;  %v3898_v26 = vpop.f32.mrb[120].mxu0  ;;  %v4080_v23 = vpop.f32.mrb[88].mxu1 }
 0x257   : > { %3537 = vst [vmem:[%s5536_s22 + $0x18] sm:$0xff] %v3473_v34   ;;  %v4162_v15 = vadd.f32 %v5512_v10, %v4080_v23  ;;  %v3899_v11 = vpop.f32.mrb[121].mxu0  ;;  %v2716_v29 = vpop.f32.mrb[89].mxu1 }
 0x258   : > { %3536 = vst [vmem:[%s5536_s22 + $0x10] sm:$0xff] %v3468_v18   ;;  %v3900_v50 = vadd.f32 %v3899_v11, %v3898_v26  ;;  %v4167_v32 = vadd.f32 %v5506_v46, %v2716_v29  ;;  %v3901_v14 = vpop.f32.mrb[122].mxu0  ;;  %v4081_v2 = vpop.f32.mrb[90].mxu1 }
 0x259   : > { %v4172_v45 = vadd.f32 %v5515_v20, %v4081_v2  ;;  %v3902_v56 = vpop.f32.mrb[123].mxu0  ;;  %v2719_v8 = vpop.f32.mrb[91].mxu1  ;;  %v2853_v10 = vmax.f32 %v4162_v15, 0.0 }
 0x25a   : > { %v3903_v12 = vadd.f32 %v3902_v56, %v3901_v14  ;;  %v4177_v62 = vadd.f32 %v5509_v63, %v2719_v8  ;;  %v5552_v28 = vadd.f32 %v5363_v5, %v3900_v50  ;;  %v2851_v4 = vmax.f32 %v4167_v32, 0.0 }
 0x25b   : > { %v2854_v57 = vmax.f32 %v4172_v45, 0.0 }
 0x25c   : > { %v2852_v22 = vmax.f32 %v4177_v62, 0.0  ;;  %v5555_v46 = vadd.f32 %v5367_v27, %v3903_v12 }
 0x25d   : > { %v3483_v40 = vpack.c.bf16 %v2854_v57, %v2853_v10 }
 0x25e   : > { %v3478_v58 = vpack.c.bf16 %v2852_v22, %v2851_v4  ;;  %v3904_v43 = vpop.f32.mrb[124].mxu0  ;;  %v4084_v20 = vpop.f32.mrb[92].mxu1 }
 0x25f   : > { %3539 = vst [vmem:[%s5536_s22 + $0x28] sm:$0xff] %v3483_v40   ;;  %v4182_v33 = vadd.f32 %v5522_v13, %v4084_v20  ;;  %v3905_v44 = vpop.f32.mrb[125].mxu0  ;;  %v2732_v35 = vpop.f32.mrb[93].mxu1 }
 0x260   : > { %3538 = vst [vmem:[%s5536_s22 + $0x20] sm:$0xff] %v3478_v58   ;;  %v3906_v63 = vadd.f32 %v3905_v44, %v3904_v43  ;;  %v4187_v5 = vadd.f32 %v5517_v19, %v2732_v35  ;;  %v3907_v38 = vpop.f32.mrb[126].mxu0  ;;  %v4085_v9 = vpop.f32.mrb[94].mxu1 }
 0x261   : > { %v4192_v21 = vadd.f32 %v5525_v37, %v4085_v9  ;;  %v3908_v27 = vpop.f32.mrb[127].mxu0  ;;  %v2735_v25 = vpop.f32.mrb[95].mxu1  ;;  %v2857_v13 = vmax.f32 %v4182_v33, 0.0 }
 0x262   : > { %v3909_v36 = vadd.f32 %v3908_v27, %v3907_v38  ;;  %v4197_v49 = vadd.f32 %v5519_v55, %v2735_v25  ;;  %v4216_v3 = vadd.f32 %v5373_v17, %v3906_v63  ;;  %v2855_v53 = vmax.f32 %v4187_v5, 0.0 }
 0x263   : > { %v2858_v6 = vmax.f32 %v4192_v21, 0.0 }
 0x264   : > { %v2856_v1 = vmax.f32 %v4197_v49, 0.0  ;;  %v4224_v0 = vadd.f32 %v5377_v47, %v3909_v36 }
 0x265   : > { %v3493_v19 = vpack.c.bf16 %v2858_v6, %v2857_v13 }
 0x266   : > { %v3488_v60 = vpack.c.bf16 %v2856_v1, %v2855_v53  ;;  %v3910_v59 = vpop.f32.mrb[128].mxu0  ;;  %v4088_v48 = vpop.f32.mrb[0].mxu1 }
 0x267   : > { %3541 = vst [vmem:[%s5536_s22 + $0x38] sm:$0xff] %v3493_v19   ;;  %v4201_v37 = vadd.f32 %v4200_v41, %v4088_v48  ;;  %v3911_v34 = vpop.f32.mrb[129].mxu0  ;;  %v2748_v18 = vpop.f32.mrb[1].mxu1 }
 0x268   : > { %3540 = vst [vmem:[%s5536_s22 + $0x30] sm:$0xff] %v3488_v60   ;;  %v3912_v26 = vadd.f32 %v3911_v34, %v3910_v59  ;;  %v4205_v55 = vadd.f32 %v5531_v31, %v2748_v18  ;;  %v3913_v23 = vpop.f32.mrb[130].mxu0  ;;  %v4089_v17 = vpop.f32.mrb[2].mxu1 }
 0x269   : > { %v4209_v15 = vadd.f32 %v4208_v61, %v4089_v17  ;;  %v3914_v11 = vpop.f32.mrb[131].mxu0  ;;  %v2751_v29 = vpop.f32.mrb[3].mxu1  ;;  %v2861_v14 = vmax.f32 %v4201_v37, 0.0 }
 0x26a   : > { %v3915_v50 = vadd.f32 %v3914_v11, %v3913_v23  ;;  %v4213_v47 = vadd.f32 %v5534_v39, %v2751_v29  ;;  %v4236_v32 = vadd.f32 %v5397_v7, %v3912_v26  ;;  %v2859_v2 = vmax.f32 %v4205_v55, 0.0 }
 0x26b   : > { %v2862_v41 = vmax.f32 %v4209_v15, 0.0 }
 0x26c   : > { %v2860_v45 = vmax.f32 %v4213_v47, 0.0  ;;  %v4244_v56 = vadd.f32 %v5405_v16, %v3915_v50 }
 0x26d   : > { %v3503_v8 = vpack.c.bf16 %v2862_v41, %v2861_v14 }
 0x26e   : > { %v3498_v31 = vpack.c.bf16 %v2860_v45, %v2859_v2  ;;  %v3916_v12 = vpop.f32.mrb[132].mxu0  ;;  %v4092_v62 = vpop.f32.mrb[4].mxu1 }
 0x26f   : > { %3543 = vst [vmem:[%s5536_s22 + $0x48] sm:$0xff] %v3503_v8   ;;  %v4217_v61 = vadd.f32 %v4216_v3, %v4092_v62  ;;  %v3917_v10 = vpop.f32.mrb[133].mxu0  ;;  %v2764_v57 = vpop.f32.mrb[5].mxu1 }
 0x270   : > { %3542 = vst [vmem:[%s5536_s22 + $0x40] sm:$0xff] %v3498_v31   ;;  %v3918_v4 = vadd.f32 %v3917_v10, %v3916_v12  ;;  %v4221_v39 = vadd.f32 %v5552_v28, %v2764_v57  ;;  %v3919_v22 = vpop.f32.mrb[134].mxu0  ;;  %v4093_v7 = vpop.f32.mrb[6].mxu1 }
 0x271   : > { %v4225_v40 = vadd.f32 %v4224_v0, %v4093_v7  ;;  %v3920_v58 = vpop.f32.mrb[135].mxu0  ;;  %v2767_v43 = vpop.f32.mrb[7].mxu1  ;;  %v2865_v44 = vmax.f32 %v4217_v61, 0.0 }
 0x272   : > { %v3921_v20 = vadd.f32 %v3920_v58, %v3919_v22  ;;  %v4229_v16 = vadd.f32 %v5555_v46, %v2767_v43  ;;  %v4232_v33 = vadd.f32 %v5425_v42, %v3918_v4  ;;  %v2863_v63 = vmax.f32 %v4221_v39, 0.0 }
 0x273   : > { %v2866_v35 = vmax.f32 %v4225_v40, 0.0 }
 0x274   : > { %v2864_v5 = vmax.f32 %v4229_v16, 0.0  ;;  %v4240_v38 = vadd.f32 %v5433_v30, %v3921_v20 }
 0x275   : > { %v3513_v9 = vpack.c.bf16 %v2866_v35, %v2865_v44 }
 0x276   : > { %v3508_v28 = vpack.c.bf16 %v2864_v5, %v2863_v63  ;;  %v3922_v21 = vpop.f32.mrb[136].mxu0  ;;  %v4096_v27 = vpop.f32.mrb[8].mxu1 }
 0x277   : > { %3545 = vst [vmem:[%s5536_s22 + $0x58] sm:$0xff] %v3513_v9   ;;  %v4233_v25 = vadd.f32 %v4232_v33, %v4096_v27  ;;  %v3923_v36 = vpop.f32.mrb[137].mxu0  ;;  %v2780_v49 = vpop.f32.mrb[9].mxu1 }
 0x278   : > { %3544 = vst [vmem:[%s5536_s22 + $0x50] sm:$0xff] %v3508_v28   ;;  %v3924_v3 = vadd.f32 %v3923_v36, %v3922_v21  ;;  %v4237_v13 = vadd.f32 %v4236_v32, %v2780_v49  ;;  %v3925_v46 = vpop.f32.mrb[138].mxu0  ;;  %v4097_v6 = vpop.f32.mrb[10].mxu1 }
 0x279   : > { %v4241_v42 = vadd.f32 %v4240_v38, %v4097_v6  ;;  %v3926_v53 = vpop.f32.mrb[139].mxu0  ;;  %v2783_v1 = vpop.f32.mrb[11].mxu1  ;;  %v2869_v60 = vmax.f32 %v4233_v25, 0.0 }
 0x27a   : > { %v3927_v0 = vadd.f32 %v3926_v53, %v3925_v46  ;;  %v4245_v30 = vadd.f32 %v4244_v56, %v2783_v1  ;;  %v4252_v19 = vadd.f32 %v5453_v52, %v3924_v3  ;;  %v2867_v48 = vmax.f32 %v4237_v13, 0.0 }
 0x27b   : > { %v2870_v59 = vmax.f32 %v4241_v42, 0.0 }
 0x27c   : > { %v2868_v37 = vmax.f32 %v4245_v30, 0.0  ;;  %v4260_v34 = vadd.f32 %v5461_v51, %v3927_v0 }
 0x27d   : > { %v3523_v18 = vpack.c.bf16 %v2870_v59, %v2869_v60 }
 0x27e   : > { %v3518_v26 = vpack.c.bf16 %v2868_v37, %v2867_v48  ;;  %v3928_v55 = vpop.f32.mrb[140].mxu0  ;;  %v4100_v23 = vpop.f32.mrb[12].mxu1 }
 0x27f   : > { %3547 = vst [vmem:[%s5536_s22 + $0x68] sm:$0xff] %v3523_v18   ;;  %v3929_v17 = vpop.f32.mrb[141].mxu0  ;;  %v2796_v15 = vpop.f32.mrb[13].mxu1 }
 0x280   : > { %3546 = vst [vmem:[%s5536_s22 + $0x60] sm:$0xff] %v3518_v26   ;;  %v3930_v11 = vadd.f32 %v3929_v17, %v3928_v55  ;;  %v4253_v29 = vadd.f32 %v4252_v19, %v2796_v15  ;;  %v3931_v50 = vpop.f32.mrb[142].mxu0  ;;  %v4101_v52 = vpop.f32.mrb[14].mxu1 }
 0x281   : > { %v3932_v47 = vpop.f32.mrb[143].mxu0  ;;  %v2799_v32 = vpop.f32.mrb[15].mxu1 }
 0x282   : > { %v4248_v14 = vadd.f32 %v5479_v24, %v3930_v11  ;;  %v3933_v51 = vadd.f32 %v3932_v47, %v3931_v50  ;;  %v4261_v41 = vadd.f32 %v4260_v34, %v2799_v32  ;;  %v2871_v45 = vmax.f32 %v4253_v29, 0.0 }
 0x284   : > { %v4249_v2 = vadd.f32 %v4248_v14, %v4100_v23  ;;  %v4256_v56 = vadd.f32 %v5485_v54, %v3933_v51  ;;  %v2872_v8 = vmax.f32 %v4261_v41, 0.0 }
 0x286   : > { %v4257_v31 = vadd.f32 %v4256_v56, %v4101_v52  ;;  %v3528_v12 = vpack.c.bf16 %v2872_v8, %v2871_v45  ;;  %v2873_v62 = vmax.f32 %v4249_v2, 0.0 }
 0x288   : > { %v2874_v61 = vmax.f32 %v4257_v31, 0.0  ;;  %3548 = vst [vmem:[%s5536_s22 + $0x70] sm:$0xff] %v3528_v12  }
 0x28a   : > { %v3533_v24 = vpack.c.bf16 %v2874_v61, %v2873_v62 }
 0x28c   : > { %3549 = vst [vmem:[%s5536_s22 + $0x78] sm:$0xff] %v3533_v24  }
 0x28d   : > { %4675 = shalt.err (!%p4672_p2)
}
 0x28e   : > { %s4676_s10 = scalar_lea.hbm %s5591_s9, 2048  ;;  %s4680_s29 = scalar_lea.hbm %s5646_s3, 4096 }
 0x28f   : > { %p4677_p0 = scmp.ne.s32.totalorder %s5591_s9, %s4676_s10  ;;  %p4681_p6 = scmp.lt.u32.totalorder %s5591_s9, %s5646_s3 }
 0x290   : > { %p4682_p7 = scmp.lt.u32.totalorder %s4680_s29, %s4676_s10  ;;  %p4684_p8 = scmp.lt.u32.totalorder %s4676_s10, %s5591_s9 }
 0x291   : > { %p4678_p4 = pnand %p4677_p0, %p5665_p12 }
 0x292   : > { %p4683_p11 = por %p4682_p7, %p4681_p6 }
 0x293   : > { %p4679_p13 = pneg %p4678_p4 }
 0x294   : > { %p4685_p1 = por %p4684_p8, %p4683_p11 }
 0x296   : > { %p4686_p10 = pnand %p4685_p1, %p4679_p13 }
 0x298   : > { %4689 = shalt.err (!%p4686_p10)
}
 0x299   : > { %s4758_s22 = smov 64   ;;  %s4759_s24 = smov 4  }
 0x29a   : > { %4323 = dma.vmem_to_hbm [thread:$0]  (%p5665_p12), %s5593_s30, 2048, %s5591_s9, %s3036_s28, %s4758_s22, %s4758_s22, %s4759_s24  }
 0x29b PF: > { %s3066_s7 = sand.u32 1, %s4728_s12   ;;  %p5666_p3 = scmp.ne.s32.totalorder %s5654_s23, 0 }
 0x29c   : > { %p5667_p5 = scmp.ge.s32.totalorder %s4748_s17, 2  ;;  %s3067_s26 = scalar_lea.sflag [#allocation4], %s3066_s7 }
 0x29e   : > { %p4337_p9 = pnand %p5667_p5, %p5666_p3 }
 0x2a0   : > { %4723 = dma.done.wait (!%p4337_p9), %s3067_s26, 2048  }
 0x2a1   : > { %4725 = vsyncadd (!%p4337_p9), %s3067_s26, 4294965248  ;;  %s20_s17 = sadd.s32 1, %s4748_s17   ;;  %s5668_s12 = smov %s4732_s13 }
 0x2a2   : > { %p17_p2 = scmp.ge.s32.totalorder %s20_s17, 4   ;;  %s5669_s13 = smov %s4736_s14 }
 0x2a3   : > { %s5670_s14 = smov %s4926_s4  ;;  %s5671_s15 = smov %s4744_s16 }
 0x2a4   : > { %s5672_s16 = smov %s5674_s18  ;;  %19 = sbr.rel (!%p17_p2) target bundleno = 7 (0x7), region = 87 }
 0x2ab   :  { %3072 = vsyncpa [#allocation3], 1 }
 0x2ac   :  { %3074 = vsyncpa [#allocation3 + $0x1], 1 }
 0x2ad   :  { %3075 = vsyncpa [#allocation6], 1 }
 0x2ae   :  { %3076 = vsyncpa [#allocation4], 1 }
 0x2af   :  { %3078 = vsyncpa [#allocation4 + $0x1], 1 }

// kernel: bdrm_forward.3
= control target key start
LH: loop header
LB: loop body
LE: loop exit
PB: predicated region body
PF: predicated region fallthrough
CT: control target
= control target key end

     0   :  { %s6260_s0 = inlined_call_operand.hbm [shape: bf16[2,1,288,384], index: 0, kind: input, shape index: {}]   ;;  %s6261_s1 = inlined_call_operand.hbm [shape: bf16[3,384,128], index: 1, kind: input, shape index: {}]   ;;  %s6262_s2 = inlined_call_operand.hbm [shape: f32[1,128], index: 2, kind: input, shape index: {}]   ;;  %s6263_s3 = inlined_call_operand.hbm [shape: bf16[2,1,384], index: 3, kind: input, shape index: {}]   ;;  %s6264_s4 = inlined_call_operand.hbm [shape: bf16[2,256,128], index: 4, kind: input, shape index: {}]   ;;  %s6265_s5 = inlined_call_operand.hbm [shape: f32[2,256,128], index: 5, kind: output, shape index: {}]  }
   0x1   :  { %6276 = sst [smem:[#allocation20_spill]] %s6260_s0 }
   0x2   :  { %6277 = sst [smem:[#allocation21_spill]] %s6261_s1 }
   0x3   :  { %6278 = sst [smem:[#allocation22_spill]] %s6263_s3 }
   0x4   :  { %10 = vsyncpa [#allocation3], 0 }
   0x5   :  { %12 = vsyncpa [#allocation3 + $0x1], 0 }
   0x6   :  { %13 = vsyncpa [#allocation6], 0 }
   0x7   :  { %14 = vsyncpa [#allocation9], 0 }
   0x8   :  { %16 = vsyncpa [#allocation9 + $0x1], 0 }
   0x9   :  { %17 = vsyncpa [#allocation4], 0 }
   0xa   :  { %19 = vsyncpa [#allocation4 + $0x1], 0  ;;  %s5094_s18 = smov 0   ;;  %s5096_s19 = smov 0  }
   0xb   :  { %s5098_s20 = smov 0   ;;  %s5100_s21 = smov 0  }
   0xc   :  { %s5102_s22 = smov 0   ;;  %s5104_s23 = smov 0  }
   0xd LB: > { %s5125_s24 = sadd.s32 4294967295, %s5049_s23   ;;  %s3554_s25 = sadd.s32 4294967294, %s5049_s23   ;;  %s5049_s23 = sphi %s5104_s23, %s25_s23   ;;  %s5045_s22 = sphi %s5102_s22, %s6314_s22   ;;  %s5041_s21 = sphi %s5100_s21, %s6313_s21   ;;  %s5037_s20 = sphi %s5098_s20, %s6312_s20   ;;  %s5033_s19 = sphi %s5096_s19, %s6311_s19   ;;  %s5029_s18 = sphi %s5094_s18, %s6310_s18  }
   0xe   : > { %p59_p0 = scmp.ne.s32.totalorder %s5033_s19, %s5029_s18  ;;  %p6266_p1 = scmp.eq.s32.totalorder %s5125_s24, 0 }
   0xf   : > { %p187_p3 = scmp.eq.s32.totalorder %s3554_s25, 1  ;;  %p3555_p5 = scmp.ge.s32.totalorder %s5049_s23, 1 }
  0x10   : > { %p5134_p4 = por %p6266_p1, %p59_p0  ;;  %p194_p7 = scmp.lt.s32.totalorder %s5049_s23, 3 }
  0x11   : > { %p5139_p6 = por %p187_p3, %p59_p0  ;;  %s5051_s29 = smov [#allocation5]  }
  0x12   : > { %s6279_s26 = scalar_select %p5134_p4, 1, 0 }
  0x13   : > { %s6280_s27 = scalar_select %p5139_p6, 1, 0 }
  0x14   : > { %p5144_p8 = pnand %p3555_p5, %p194_p7  ;;  %s206_s30 = sshll.u32 %s5051_s29, 4  ;;  %s207_s30 = int_to_ptr.vmem [resolvable:$true] %s206_s30 }
  0x15   : > { %s37_s7 = sadd.s32 1, %s5045_s22  ;;  %s6283_s1 = sld [smem:[#allocation21_spill]] }
  0x16   : > { %s6281_s28 = scalar_select %p5144_p8, 1, 0 }
  0x17   : > { %p4657_p9 = pneg %p5144_p8 }
  0x19   : > { %p5153_p11 = pnand %p4657_p9, %p6266_p1 }
  0x1b   : > { %s6282_s6 = scalar_select %p5153_p11, 1, 0 }
  0x1c   : > { %s4813_s10 = scalar_lea.hbm %s6283_s1, 9216  ;;  %p6272_p13 = pneg %p5153_p11 }
  0x1d   : > { %p4814_p12 = scmp.ne.s32.totalorder %s6283_s1, %s4813_s10  ;;  %p4820_p5 = scmp.lt.u32.totalorder %s4813_s10, %s6283_s1 }
  0x1f   : > { %p4816_p0 = pnand %p6272_p13, %p4814_p12 }
  0x21   : > { %p4817_p3 = pneg %p4816_p0 }
  0x23   : > { %p4822_p7 = pnand %p4820_p5, %p4817_p3 }
  0x25   : > { %4825 = shalt.err (!%p4822_p7)
}
  0x26   : > { %s4826_s15 = scalar_lea.vmem %s207_s30, 9216  ;;  %p4834_p2 = scmp.lt.s32.totalorder %s207_s30, %s207_s30 }
  0x27   : > { %p4827_p9 = scmp.ne.s32.totalorder %s207_s30, %s4826_s15  ;;  %p4835_p6 = scmp.lt.s32.totalorder %s4826_s15, %s4826_s15 }
  0x29   : > { %p4829_p10 = pnand %p4827_p9, %p6272_p13  ;;  %p4836_p4 = por %p4835_p6, %p4834_p2 }
  0x2b   : > { %p4830_p1 = pneg %p4829_p10 }
  0x2d   : > { %p4837_p8 = pnand %p4836_p4, %p4830_p1 }
  0x2f   : > { %4840 = shalt.err (!%p4837_p8)
}
  0x30   : > { %s6269_s16 = smov 64   ;;  %s6270_s17 = smov 4  }
  0x31   : > { %4660 = dma.hbm_to_vmem [thread:$0]  (!%p5153_p11), %s6283_s1, 9216, %s207_s30, [#allocation6], %s6269_s16, %s6269_s16, %s6270_s17  }
  0x32   : > { %p39_p1 = scmp.ge.s32.totalorder %s37_s7, 2  ;;  %s46_s8 = sadd.s32 1, %s5037_s20 }
  0x33   : > { %p53_p2 = scmp.ne.s32.totalorder %s5037_s20, %s5033_s19  ;;  %p54_p4 = scmp.eq.s32.totalorder %s5049_s23, 0 }
  0x34   : > { %s6316_s7 = smov (%p39_p1, %s37_s7), 0  ;;  %p6285_p8 = scmp.eq.s32.totalorder %s5125_s24, 1 }
  0x35   : > { %6284 = sst [smem:[#allocation16_spill]] %s6316_s7  ;;  %p55_p6 = por %p54_p4, %p53_p2 }
  0x36   : > { %p5191_p10 = por %p6285_p8, %p53_p2  ;;  %s41_s10 = ssub.s32 %s5045_s22, %s6316_s7 }
  0x37   : > { %p4680_p12 = scmp.lt.s32.totalorder %s5049_s23, 2  ;;  %p44_p0 = scmp.eq.s32.totalorder %s41_s10, 0 }
  0x38   : > { %s6286_s9 = scalar_select %p5191_p10, 1, 0 }
  0x39   : > { %s5199_s11 = sand.u32 1, %s5037_s20   ;;  %p5201_p3 = pnand %p4680_p12, %p55_p6 }
  0x3a   : > { %s254_s12 = sand.u32 1, %s5049_s23   ;;  %s4637_s14 = smul.u32 3, %s5199_s11 }
  0x3b   : > { %s5207_s13 = scalar_select %p44_p0, %s5037_s20, %s46_s8  }
  0x3c   : > { %s4638_s15 = smul.u32 48, %s5045_s22  ;;  %s5054_s25 = smov [#allocation7]  }
  0x3d   : > { %6288 = sst [smem:[#allocation17_spill]] %s5207_s13  ;;  %s220_s29 = sshll.u32 %s5054_s25, 4  ;;  %s5211_s29 = int_to_ptr.vmem [resolvable:$true] %s220_s29 }
  0x3e   : > { %s6289_s3 = sld [smem:[#allocation22_spill]]  ;;  %s258_s1 = scalar_lea.vmem [#allocation8], %s4637_s14 }
  0x3f   : > { %s266_s7 = sshll.u32 %s258_s1, 4  ;;  %s5220_s8 = scalar_lea.sflag [#allocation9], %s254_s12  ;;  %s5218_s7 = int_to_ptr.vmem [resolvable:$true] %s266_s7 }
  0x40   : > { %p5226_p7 = pneg %p5201_p3 }
  0x44   : > { %s5216_s10 = scalar_lea.hbm %s6289_s3, %s4638_s15  ;;  %s4846_s14 = scalar_lea.hbm %s6289_s3, 96 }
  0x45   : > { %s4841_s13 = scalar_lea.hbm %s5216_s10, 48  ;;  %p4847_p2 = scmp.lt.u32.totalorder %s5216_s10, %s6289_s3 }
  0x46   : > { %p4842_p5 = scmp.ne.s32.totalorder %s5216_s10, %s4841_s13  ;;  %p4848_p4 = scmp.lt.u32.totalorder %s4846_s14, %s4841_s13 }
  0x47   : > { %p4850_p8 = scmp.lt.u32.totalorder %s4841_s13, %s5216_s10 }
  0x48   : > { %p4844_p9 = pnand %p5226_p7, %p4842_p5  ;;  %p4849_p6 = por %p4848_p4, %p4847_p2 }
  0x4a   : > { %p4845_p1 = pneg %p4844_p9  ;;  %p4851_p12 = por %p4850_p8, %p4849_p6 }
  0x4c   : > { %p4852_p0 = pnand %p4851_p12, %p4845_p1 }
  0x4e   : > { %4855 = shalt.err (!%p4852_p0)
}
  0x4f   : > { %s4856_s12 = scalar_lea.vmem %s5218_s7, 48  ;;  %s5055_s16 = smov [#allocation8]  }
  0x50   : > { %p4857_p5 = scmp.ne.s32.totalorder %s5218_s7, %s4856_s12  ;;  %s4861_s17 = sshll.u32 %s5055_s16, 4  ;;  %s4862_s17 = int_to_ptr.vmem [resolvable:$false] %s4861_s17 }
  0x51   : > { %s4863_s1 = scalar_lea.vmem %s4862_s17, 96  ;;  %p4864_p10 = scmp.lt.s32.totalorder %s5218_s7, %s4862_s17 }
  0x52   : > { %p4859_p9 = pnand %p4857_p5, %p5226_p7  ;;  %p4865_p11 = scmp.lt.s32.totalorder %s4863_s1, %s4856_s12 }
  0x54   : > { %p4860_p13 = pneg %p4859_p9  ;;  %p4866_p2 = por %p4865_p11, %p4864_p10 }
  0x56   : > { %p4867_p4 = pnand %p4866_p2, %p4860_p13 }
  0x58   : > { %4870 = shalt.err (!%p4867_p4)
}
  0x59   : > { %4670 = dma.hbm_to_vmem [thread:$0]  (!%p5201_p3), %s5216_s10, 48, %s5218_s7, %s5220_s8  }
  0x5a   : > { %s4871_s15 = scalar_lea.hbm %s6262_s2, 16  ;;  %p6291_p6 = scmp.ne.s32.totalorder %s6282_s6, 0 }
  0x5b   : > { %p4872_p1 = scmp.ne.s32.totalorder %s6262_s2, %s4871_s15  ;;  %p4878_p10 = scmp.lt.u32.totalorder %s4871_s15, %s6262_s2 }
  0x5c   : > { %p6292_p8 = pneg %p6291_p6 }
  0x5e   : > { %p4874_p11 = pnand %p4872_p1, %p6292_p8 }
  0x60   : > { %p4875_p13 = pneg %p4874_p11 }
  0x62   : > { %p4880_p12 = pnand %p4878_p10, %p4875_p13 }
  0x64   : > { %4883 = shalt.err (!%p4880_p12)
}
  0x65   : > { %s4884_s7 = scalar_lea.vmem %s5211_s29, 16  ;;  %p6293_p5 = pmov %p6292_p8 }
  0x66   : > { %p4885_p0 = scmp.ne.s32.totalorder %s5211_s29, %s4884_s7  ;;  %s4891_s3 = scalar_lea.vmem %s5211_s29, 32 }
  0x67   : > { %p4892_p4 = scmp.lt.s32.totalorder %s5211_s29, %s5211_s29  ;;  %p4893_p1 = scmp.lt.s32.totalorder %s4891_s3, %s4884_s7 }
  0x68   : > { %p4887_p9 = pnand %p4885_p0, %p6293_p5 }
  0x69   : > { %p4894_p8 = por %p4893_p1, %p4892_p4 }
  0x6a   : > { %p4888_p2 = pneg %p4887_p9 }
  0x6c   : > { %p4895_p11 = pnand %p4894_p8, %p4888_p2 }
  0x6e   : > { %4898 = shalt.err (!%p4895_p11)
}
  0x6f   : > { %4663 = dma.hbm_to_vmem [thread:$0]  (!%p6291_p6), %s6262_s2, 16, %s5211_s29, [#allocation6]  }
  0x70   : > { %s4635_s13 = smul.u32 432, %s5199_s11  ;;  %s3561_s15 = sshll.u32 %s5199_s11, 7 }
  0x71   : > { %s4636_s14 = smul.u32 6912, %s5045_s22  ;;  %s6294_s0 = sld [smem:[#allocation20_spill]] }
  0x72   : > { %s235_s6 = scalar_lea.vmem [#allocation2], %s4635_s13  ;;  %s232_s3 = scalar_lea.sflag [#allocation3], %s5199_s11 }
  0x73   : > { %s244_s7 = sshll.u32 %s235_s6, 4  ;;  %s5284_s7 = int_to_ptr.vmem [resolvable:$true] %s244_s7 }
  0x77   : > { %s5282_s17 = scalar_lea.hbm %s6294_s0, %s4636_s14  ;;  %s4904_s16 = scalar_lea.hbm %s6294_s0, 13824 }
  0x78   : > { %s4899_s10 = scalar_lea.hbm %s5282_s17, 6912  ;;  %p4905_p12 = scmp.lt.u32.totalorder %s5282_s17, %s6294_s0 }
  0x79   : > { %p4900_p13 = scmp.ne.s32.totalorder %s5282_s17, %s4899_s10  ;;  %p4906_p0 = scmp.lt.u32.totalorder %s4904_s16, %s4899_s10 }
  0x7a   : > { %p4908_p9 = scmp.lt.u32.totalorder %s4899_s10, %s5282_s17 }
  0x7b   : > { %p4902_p6 = pnand %p4900_p13, %p5226_p7  ;;  %p4907_p5 = por %p4906_p0, %p4905_p12 }
  0x7d   : > { %p4903_p10 = pneg %p4902_p6  ;;  %p4909_p2 = por %p4908_p9, %p4907_p5 }
  0x7f   : > { %p4910_p4 = pnand %p4909_p2, %p4903_p10 }
  0x81   : > { %4913 = shalt.err (!%p4910_p4)
}
  0x82   : > { %s4914_s13 = scalar_lea.vmem %s5284_s7, 6912  ;;  %s5056_s6 = smov [#allocation2]  }
  0x83   : > { %p4915_p1 = scmp.ne.s32.totalorder %s5284_s7, %s4914_s13  ;;  %s4919_s29 = sshll.u32 %s5056_s6, 4  ;;  %s4920_s29 = int_to_ptr.vmem [resolvable:$false] %s4919_s29 }
  0x84   : > { %s4921_s1 = scalar_lea.vmem %s4920_s29, 13824  ;;  %p4922_p13 = scmp.lt.s32.totalorder %s5284_s7, %s4920_s29 }
  0x85   : > { %p4917_p8 = pnand %p4915_p1, %p5226_p7  ;;  %p4923_p6 = scmp.lt.s32.totalorder %s4921_s1, %s4914_s13 }
  0x87   : > { %p4918_p11 = pneg %p4917_p8  ;;  %p4924_p12 = por %p4923_p6, %p4922_p13 }
  0x89   : > { %p4925_p0 = pnand %p4924_p12, %p4918_p11 }
  0x8b   : > { %4928 = shalt.err (!%p4925_p0)
}
  0x8c   : > { %s5057_s10 = smov 192   ;;  %s5058_s16 = smov 12  }
  0x8d   : > { %4667 = dma.hbm_to_vmem [thread:$0]  (!%p5201_p3), %s5282_s17, 6912, %s5284_s7, %s232_s3, %s5057_s10, %s5057_s10, %s5058_s16  }
  0x8e   : > { %s3794_s14 = sshll.u32 %s5045_s22, 11  ;;  %s277_s12 = scalar_lea.vmem [#allocation10], %s3561_s15 }
  0x8f   : > { %s286_s6 = sshll.u32 %s277_s12, 4  ;;  %s5316_s1 = scalar_lea.hbm %s6264_s4, %s3794_s14  ;;  %s5318_s6 = int_to_ptr.vmem [resolvable:$true] %s286_s6 }
  0x90   : > { %s4929_s0 = scalar_lea.hbm %s5316_s1, 2048  ;;  %s4934_s15 = scalar_lea.hbm %s6264_s4, 4096 }
  0x91   : > { %p4930_p10 = scmp.ne.s32.totalorder %s5316_s1, %s4929_s0  ;;  %p4935_p2 = scmp.lt.u32.totalorder %s5316_s1, %s6264_s4 }
  0x92   : > { %p4936_p4 = scmp.lt.u32.totalorder %s4934_s15, %s4929_s0  ;;  %p4938_p8 = scmp.lt.u32.totalorder %s4929_s0, %s5316_s1 }
  0x93   : > { %p4932_p5 = pnand %p4930_p10, %p5226_p7 }
  0x94   : > { %p4937_p1 = por %p4936_p4, %p4935_p2 }
  0x95   : > { %p4933_p9 = pneg %p4932_p5 }
  0x96   : > { %p4939_p11 = por %p4938_p8, %p4937_p1 }
  0x98   : > { %p4940_p13 = pnand %p4939_p11, %p4933_p9 }
  0x9a   : > { %4943 = shalt.err (!%p4940_p13)
}
  0x9b   : > { %s4944_s10 = scalar_lea.vmem %s5318_s6, 2048  ;;  %s5059_s16 = smov [#allocation10]  }
  0x9c   : > { %p4945_p6 = scmp.ne.s32.totalorder %s5318_s6, %s4944_s10  ;;  %s4949_s14 = sshll.u32 %s5059_s16, 4  ;;  %s4950_s14 = int_to_ptr.vmem [resolvable:$false] %s4949_s14 }
  0x9d   : > { %s4951_s12 = scalar_lea.vmem %s4950_s14, 4096  ;;  %p4952_p10 = scmp.lt.s32.totalorder %s5318_s6, %s4950_s14 }
  0x9e   : > { %p4947_p12 = pnand %p4945_p6, %p5226_p7  ;;  %p4953_p5 = scmp.lt.s32.totalorder %s4951_s12, %s4944_s10 }
  0xa0   : > { %p4948_p0 = pneg %p4947_p12  ;;  %p4954_p2 = por %p4953_p5, %p4952_p10 }
  0xa2   : > { %p4955_p4 = pnand %p4954_p2, %p4948_p0 }
  0xa4   : > { %4958 = shalt.err (!%p4955_p4)
}
  0xa5   : > { %s6295_s0 = smov 4   ;;  %s6296_s13 = smov 64  }
  0xa6   : > { %4673 = dma.hbm_to_vmem [thread:$0]  (!%p5201_p3), %s5316_s1, 2048, %s5318_s6, %s5220_s8, %s6296_s13, %s6296_s13, %s6295_s0  }
  0xa7   : > { %p6297_p7 = scmp.ne.s32.totalorder %s6281_s28, 0 }
  0xa9   : > { %298 = sbr.rel (%p6297_p7) target bundleno = 742 (0x2e6), region = 40 }
  0xb0   : > { %s5348_s25 = sand.u32 1, %s5033_s19   ;;  %p6298_p9 = scmp.ne.s32.totalorder %s6279_s26, 0 }
  0xb1   : > { %s4639_s29 = smul.u32 432, %s5348_s25  ;;  %s301_s17 = scalar_lea.sflag [#allocation3], %s5348_s25 }
  0xb3   : > { %s5352_s11 = scalar_lea.vmem [#allocation2], %s4639_s29 }
  0xb4   : > { %5012 = dma.done.wait (%p6298_p9), %s301_s17, 6912  }
  0xb5   : > { %5014 = vsyncadd (%p6298_p9), %s301_s17, 4294960384  ;;  %p6299_p3 = scmp.eq.s32.totalorder %s5125_s24, 0 }
  0xb7   : > { %5016 = dma.done.wait (%p6299_p3), [#allocation6], 9232   ;;  %p6300_p1 = pmov %p6299_p3 }
  0xb8   : > { %s317_s28 = sand.u32 1, %s5125_s24   ;;  %s4640_s30 = smul.u32 3, %s5348_s25 }
  0xb9   : > { %5018 = vsyncadd (%p6300_p1), [#allocation6], 4294958064  ;;  %s318_s8 = scalar_lea.sflag [#allocation9], %s317_s28 }
  0xba   : > { %s5364_s6 = scalar_lea.vmem [#allocation8], %s4640_s30 }
  0xbb   : > { %5020 = dma.done.wait (%p6298_p9), %s318_s8, 2096  }
  0xbc   : > { %5022 = vsyncadd (%p6298_p9), %s318_s8, 4294965200  ;;  %v4741_v0 = vld [vmem:[#allocation5 + $0x40] sm:$0xff]   ;;  %v4744_v3 = vld [vmem:[#allocation5 + $0x48] sm:$0xff]   ;;  %v5060_v14 = vmov 1966171168   ;;  %v454_v16 = vlaneseq  ;;  %s3567_s24 = sshll.u32 %s5348_s25, 7 }
  0xbd   : > { %v5370_v1 = vld [vmem:[#allocation5 + $0x80] sm:$0xff]   ;;  %3875 = vmatprep.subr.bf16.mxu0 %v4741_v0  ;;  %v5374_v4 = vld [vmem:[#allocation5 + $0x88] sm:$0xff]   ;;  %v4747_v6 = vld [vmem:[#allocation5 + $0x50] sm:$0xff]   ;;  %v452_v15 = vunpack.c.l.s4 %v5060_v14  ;;  %s6096_s26 = scalar_lea.vmem [#allocation10], %s3567_s24  ;;  %s3568_s1 = sshll.u32 %s5348_s25, 8 }
  0xbe   : > { %v4743_v2 = vld [vmem:[#allocation5] sm:$0xff]   ;;  %4427 = vmatprep.subr.bf16.mxu1 %v5370_v1  ;;  %v4746_v5 = vld [vmem:[#allocation5 + $0x8] sm:$0xff]   ;;  %v5377_v7 = vld [vmem:[#allocation5 + $0x90] sm:$0xff]   ;;  %v455_v21 = vshrl.u32 %v454_v16, 7  ;;  %s6118_s15 = scalar_lea.vmem [#allocation11], %s3568_s1  ;;  %s3795_s7 = sshll.u32 %s5041_s21, 12 }
  0xbf   : > { %3876 = vmatpush3.bf16.msra.mxu0 %v4743_v2  ;;  %4435 = vmatpush3.bf16.msra.mxu1 %v5370_v1  ;;  %v4749_v8 = vld [vmem:[#allocation5 + $0x10] sm:$0xff]   ;;  %v4750_v9 = vld [vmem:[#allocation5 + $0x58] sm:$0xff]   ;;  %v4753_v12 = vld [vmem:[#allocation5 + $0x60] sm:$0xff]   ;;  %v453_v20 = vunpack.c.0.s8 %v452_v15  ;;  %s3401_s3 = sshll.u32 %s6118_s15, 4  ;;  %s6207_s14 = scalar_lea.hbm %s6265_s5, %s3795_s7  ;;  %s6209_s3 = int_to_ptr.vmem [resolvable:$true] %s3401_s3 }
  0xc0   : > { %3877 = vmatprep.subr.bf16.mxu0 %v4744_v3  ;;  %4428 = vmatprep.subr.bf16.mxu1 %v5374_v4  ;;  %v5381_v10 = vld [vmem:[#allocation5 + $0x98] sm:$0xff]   ;;  %v5385_v13 = vld [vmem:[#allocation5 + $0xa0] sm:$0xff]   ;;  %v4756_v18 = vld [vmem:[#allocation5 + $0x68] sm:$0xff]   ;;  %v471_v32 = vsub.s32 0, %v455_v21  ;;  %s3386_s12 = scalar_lea.sflag [#allocation4], %s5348_s25  ;;  %s4959_s0 = scalar_lea.vmem %s6209_s3, 4096 }
  0xc1   : > { %v4752_v11 = vld [vmem:[#allocation5 + $0x18] sm:$0xff]   ;;  %v4755_v17 = vld [vmem:[#allocation5 + $0x20] sm:$0xff]   ;;  %v5389_v19 = vld [vmem:[#allocation5 + $0xa8] sm:$0xff]   ;;  %v456_v25 = vsub.s32 %v453_v20, %v455_v21  ;;  %p4960_p8 = scmp.ne.s32.totalorder %s6209_s3, %s4959_s0  ;;  %p6305_p11 = scmp.ne.s32.totalorder %s6286_s9, 0 }
  0xc2   : > { %v4758_v22 = vld [vmem:[#allocation5 + $0x28] sm:$0xff]   ;;  %v4759_v23 = vld [vmem:[#allocation5 + $0x70] sm:$0xff]   ;;  %v3570_v27 = vld.sshfl [vmem:[%s5364_s6] sm:$0x13 pattern:$0x75316420] }
  0xc3   : > { %3878 = vmatpush3.bf16.msra.mxu0 %v4746_v5  ;;  %4436 = vmatpush3.bf16.msra.mxu1 %v5374_v4  ;;  %v5393_v24 = vld [vmem:[#allocation5 + $0xb0] sm:$0xff]   ;;  %v4762_v28 = vld [vmem:[#allocation5 + $0x78] sm:$0xff]   ;;  %v450_v30 = vcombine.high %v3570_v27, %v3570_v27  ;;  %v457_v31 = vrot.slane %v3570_v27, %v456_v25  ;;  %v4765_v40 = vld [vmem:[#allocation5 + $0x100] sm:$0xff]   ;;  %p4961_p13 = pnand %p4960_p8, %p6305_p11  ;;  %s5061_s21 = smov [#allocation11]  }
  0xc4   : > { %3879 = vmatprep.subr.bf16.mxu0 %v4747_v6  ;;  %4429 = vmatprep.subr.bf16.mxu1 %v5377_v7  ;;  %v4761_v26 = vld [vmem:[#allocation5 + $0x30] sm:$0xff]   ;;  %v5398_v29 = vld [vmem:[#allocation5 + $0xb8] sm:$0xff]   ;;  %v4766_v61 = vld [vmem:[#allocation5 + $0xc0] sm:$0xff]   ;;  %s4963_s13 = sshll.u32 %s5061_s21, 4  ;;  %s4964_s13 = int_to_ptr.vmem [resolvable:$false] %s4963_s13 }
  0xc5   : > { %v464_v33 = vrot.slane %v450_v30, %v456_v25  ;;  %v467_v34 = vpack.i.b16 %v457_v31, %v457_v31  ;;  %v465_v35 = vcombine.high %v457_v31, %v457_v31  ;;  %v4764_v36 = vld [vmem:[#allocation5 + $0x38] sm:$0xff]   ;;  %v377_v41 = vld [vmem:[%s5352_s11] sm:$0xff]  ;;  %v412_v45 = vld [vmem:[%s5352_s11 + $0xd4] sm:$0xf]  ;;  %p4962_p6 = pneg %p4961_p13  ;;  %s4965_s29 = scalar_lea.vmem %s4964_s13, 8192 }
  0xc6   : > { %v379_v42 = vld [vmem:[%s5352_s11 + $0xc] sm:$0xff]  ;;  %v410_v43 = vld [vmem:[%s5352_s11 + $0xc8] sm:$0xf]  ;;  %v414_v47 = vld [vmem:[%s5352_s11 + $0xe0] sm:$0xf]  ;;  %p4966_p12 = scmp.lt.s32.totalorder %s6209_s3, %s4964_s13  ;;  %p4967_p0 = scmp.lt.s32.totalorder %s4965_s29, %s4959_s0 }
  0xc7   : > { %3880 = vmatpush3.bf16.msra.mxu0 %v4749_v8  ;;  %4437 = vmatpush3.bf16.msra.mxu1 %v5377_v7  ;;  %v472_v37 = vrot.slane %v467_v34, %v471_v32  ;;  %v474_v38 = vpack.i.b16 %v464_v33, %v464_v33  ;;  %v481_v39 = vpack.i.b16 %v465_v35, %v465_v35  ;;  %v416_v48 = vld [vmem:[%s5352_s11 + $0xec] sm:$0xf]  ;;  %v381_v49 = vld [vmem:[%s5352_s11 + $0x18] sm:$0xff]  ;;  %v383_v52 = vld [vmem:[%s5352_s11 + $0x24] sm:$0xff] }
  0xc8   : > { %3881 = vmatprep.subr.bf16.mxu0 %v4750_v9  ;;  %4430 = vmatprep.subr.bf16.mxu1 %v5381_v10  ;;  %v418_v53 = vld [vmem:[%s5352_s11 + $0xf8] sm:$0xf]  ;;  %v420_v58 = vld [vmem:[%s5352_s11 + $0x104] sm:$0xf]  ;;  %v422_v2 = vld [vmem:[%s5352_s11 + $0x110] sm:$0xf]  ;;  %p4968_p10 = por %p4967_p0, %p4966_p12 }
  0xc9   : > { %v479_v44 = vrot.slane %v474_v38, %v471_v32  ;;  %v486_v46 = vrot.slane %v481_v39, %v471_v32  ;;  %v4767_v62 = vld [vmem:[#allocation5 + $0x108] sm:$0xff]   ;;  %v4769_v27 = vld [vmem:[#allocation5 + $0x110] sm:$0xff]   ;;  %v4771_v35 = vld [vmem:[#allocation5 + $0x118] sm:$0xff]  }
  0xca   : > { %v424_v9 = vld [vmem:[%s5352_s11 + $0x11c] sm:$0xf]  ;;  %v4770_v31 = vld [vmem:[#allocation5 + $0xd0] sm:$0xff]   ;;  %v432_v32 = vld [vmem:[%s5352_s11 + $0x14c] sm:$0xf]  ;;  %p4969_p5 = pnand %p4968_p10, %p4962_p6 }
  0xcb   : > { %3882 = vmatpush3.bf16.msra.mxu0 %v4752_v11  ;;  %4438 = vmatpush3.bf16.msra.mxu1 %v5381_v10  ;;  %v5410_v50 = vcombine.low %v472_v37, %v479_v44  ;;  %v5412_v51 = vcombine.low %v486_v46, %v486_v46  ;;  %v385_v11 = vld [vmem:[%s5352_s11 + $0x30] sm:$0xff]  ;;  %v4772_v44 = vld [vmem:[#allocation5 + $0xd8] sm:$0xff]  }
  0xcc   : > { %3883 = vmatprep.subr.bf16.mxu0 %v4753_v12  ;;  %4431 = vmatprep.subr.bf16.mxu1 %v5385_v13  ;;  %v387_v12 = vld [vmem:[%s5352_s11 + $0x3c] sm:$0xff]  ;;  %v391_v38 = vld [vmem:[%s5352_s11 + $0x54] sm:$0xff] }
  0xcd   : > { %v497_v54 = vmul.bf16 %v5410_v50, %v377_v41  ;;  %v499_v55 = vmul.bf16 %v5410_v50, %v379_v42  ;;  %v530_v56 = vmul.bf16 %v5412_v51, %v410_v43  ;;  %v532_v57 = vmul.bf16 %v5412_v51, %v412_v45  ;;  %v436_v41 = vld [vmem:[%s5352_s11 + $0x164] sm:$0xf] }
  0xce   : > { %v534_v59 = vmul.bf16 %v5412_v51, %v414_v47  ;;  %v536_v60 = vmul.bf16 %v5412_v51, %v416_v48  ;;  %v501_v63 = vmul.bf16 %v5410_v50, %v381_v49  ;;  %v503_v0 = vmul.bf16 %v5410_v50, %v383_v52  ;;  %v4773_v46 = vld [vmem:[#allocation5 + $0x120] sm:$0xff]  }
  0xcf   : > { %3884 = vmatpush3.bf16.msra.mxu0 %v4755_v17  ;;  %4439 = vmatpush3.bf16.msra.mxu1 %v5385_v13  ;;  %v3574_v3 = vcombine.high %v497_v54, %v499_v55  ;;  %v3599_v5 = vcombine.low %v530_v56, %v532_v57  ;;  %v3573_v6 = vcombine.low %v497_v54, %v499_v55  ;;  %v426_v17 = vld [vmem:[%s5352_s11 + $0x128] sm:$0xf]  ;;  %v438_v56 = vld [vmem:[%s5352_s11 + $0x170] sm:$0xf]  ;;  %v440_v57 = vld [vmem:[%s5352_s11 + $0x17c] sm:$0xf] }
  0xd0   : > { %3885 = vmatprep.subr.bf16.mxu0 %v4756_v18  ;;  %4432 = vmatprep.subr.bf16.mxu1 %v5389_v19  ;;  %v538_v8 = vmul.bf16 %v5412_v51, %v418_v53  ;;  %v3602_v14 = vcombine.low %v534_v59, %v536_v60  ;;  %v5431_v15 = vcombine.high %v501_v63, %v503_v0  ;;  %v428_v18 = vld [vmem:[%s5352_s11 + $0x134] sm:$0xf]  ;;  %v4775_v54 = vld [vmem:[#allocation5 + $0x128] sm:$0xff]   ;;  %v393_v59 = vld [vmem:[%s5352_s11 + $0x60] sm:$0xff] }
  0xd1   : > { %v540_v16 = vmul.bf16 %v5412_v51, %v420_v58  ;;  %1041 = vmatprep.mubr.bf16.mxu0 %v3574_v3  ;;  %4315 = vmatprep.mubr.bf16.mxu1 %v3599_v5  ;;  %v542_v21 = vmul.bf16 %v5412_v51, %v422_v2  ;;  %v505_v25 = vmul.bf16 %v5410_v50, %v385_v11  ;;  %v4774_v53 = vld [vmem:[#allocation5 + $0xe0] sm:$0xff]   ;;  %v4778_v5 = vld [vmem:[#allocation5 + $0xf0] sm:$0xff]  }
  0xd2   : > { %v548_v30 = vmul.bf16 %v5412_v51, %v428_v18  ;;  %v5447_v33 = vcombine.low %v501_v63, %v503_v0  ;;  %v552_v43 = vmul.bf16 %v5412_v51, %v432_v32  ;;  %v511_v45 = vmul.bf16 %v5410_v50, %v391_v38  ;;  %v395_v60 = vld [vmem:[%s5352_s11 + $0x6c] sm:$0xff]  ;;  %v399_v11 = vld [vmem:[%s5352_s11 + $0x84] sm:$0xff] }
  0xd3   : > { %3886 = vmatpush3.bf16.msra.mxu0 %v4758_v22  ;;  %4440 = vmatpush3.bf16.msra.mxu1 %v5389_v19  ;;  %v3605_v20 = vcombine.low %v538_v8, %v540_v16  ;;  %v544_v22 = vmul.bf16 %v5412_v51, %v424_v9  ;;  %v556_v48 = vmul.bf16 %v5412_v51, %v436_v41  ;;  %v4779_v8 = vld [vmem:[#allocation5 + $0x138] sm:$0xff]   ;;  %v4781_v16 = vld [vmem:[#allocation5 + $0x140] sm:$0xff]  }
  0xd4   : > { %3887 = vmatprep.subr.bf16.mxu0 %v4759_v23  ;;  %4433 = vmatprep.subr.bf16.mxu1 %v5393_v24  ;;  %v4768_v23 = vld [vmem:[#allocation5 + $0xc8] sm:$0xff]   ;;  %v513_v63 = vmul.bf16 %v5410_v50, %v393_v59  ;;  %v515_v0 = vmul.bf16 %v5410_v50, %v395_v60 }
  0xd5   : > { %v3608_v34 = vcombine.low %v542_v21, %v544_v22  ;;  %v397_v9 = vld [vmem:[%s5352_s11 + $0x78] sm:$0xff]  ;;  %v421_v60 = vld [vmem:[%s5352_s11 + $0x108] sm:$0xff] }
  0xd6   : > { %v403_v21 = vld [vmem:[%s5352_s11 + $0x9c] sm:$0xff] }
  0xd7   : > { %3888 = vmatpush3.bf16.msra.mxu0 %v4761_v26  ;;  %4441 = vmatpush3.bf16.msra.mxu1 %v5393_v24  ;;  %v507_v26 = vmul.bf16 %v5410_v50, %v387_v12  ;;  %v4780_v12 = vld [vmem:[#allocation5 + $0xf8] sm:$0xff]   ;;  %v4782_v22 = vld [vmem:[#allocation5 + $0x148] sm:$0xff]  }
  0xd8   : > { %3889 = vmatprep.subr.bf16.mxu0 %v4762_v28  ;;  %4434 = vmatprep.subr.bf16.mxu1 %v5398_v29  ;;  %v546_v28 = vmul.bf16 %v5412_v51, %v426_v17  ;;  %v5497_v17 = vcombine.low %v513_v63, %v515_v0 }
  0xd9   : > { %v5450_v37 = vcombine.high %v505_v25, %v507_v26  ;;  %v5466_v49 = vcombine.low %v505_v25, %v507_v26  ;;  %v4783_v25 = vld [vmem:[#allocation5 + $0x150] sm:$0xff]  }
  0xda   : > { %v3611_v39 = vcombine.low %v546_v28, %v548_v30  ;;  %v407_v28 = vld [vmem:[%s5352_s11 + $0xb4] sm:$0xff] }
  0xdb   : > { %3890 = vmatpush3.bf16.msra.mxu0 %v4764_v36  ;;  %4442 = vmatpush3.bf16.msra.mxu1 %v5398_v29  ;;  %v389_v36 = vld [vmem:[%s5352_s11 + $0x48] sm:$0xff] }
  0xdc   : > { %4283 = vmatprep.subr.bf16.mxu0 %v5370_v1  ;;  %4011 = vmatprep.subr.bf16.mxu1 %v4765_v40  ;;  %v434_v40 = vld [vmem:[%s5352_s11 + $0x158] sm:$0xf] }
  0xdd   : > { %v554_v47 = vmul.bf16 %v5412_v51, %v434_v40  ;;  %v4784_v30 = vld [vmem:[#allocation5 + $0x158] sm:$0xff]   ;;  %v4789_v40 = vld [vmem:[#allocation5 + $0x170] sm:$0xff]  }
  0xde   : > { %1042 = vmatmul.mubr.bf16.vlgmr.msra.gmra.mrb[0].mxu0 %v3573_v6  ;;  %4316 = vmatmul.mubr.bf16.vlgmr.msra.gmra.mrb[0].mxu1 %v3602_v14  ;;  %v5486_v6 = vcombine.high %v513_v63, %v515_v0  ;;  %v519_v14 = vmul.bf16 %v5410_v50, %v399_v11 }
  0xdf   : > { %4284 = vmatpush3.bf16.msra.mxu0 %v5370_v1  ;;  %4012 = vmatpush3.bf16.msra.mxu1 %v4766_v61  ;;  %v430_v1 = vld [vmem:[%s5352_s11 + $0x140] sm:$0xf]  ;;  %v3617_v58 = vcombine.low %v554_v47, %v556_v48  ;;  %v560_v61 = vmul.bf16 %v5412_v51, %v440_v57 }
  0xe0   : > { %4013 = vmatprep.subr.bf16.mxu1 %v4767_v62  ;;  %1049 = vmatprep.mubr.bf16.mxu0 %v5431_v15  ;;  %v550_v42 = vmul.bf16 %v5412_v51, %v430_v1  ;;  %v4776_v62 = vld [vmem:[#allocation5 + $0xe8] sm:$0xff]   ;;  %v4785_v1 = vld [vmem:[#allocation5 + $0x160] sm:$0xff]  }
  0xe1   : > { %4319 = vmatprep.mubr.bf16.mxu1 %v3605_v20  ;;  %4285 = vmatprep.subr.bf16.mxu0 %v5374_v4  ;;  %v401_v20 = vld [vmem:[%s5352_s11 + $0x90] sm:$0xff] }
  0xe2   : > { %v3614_v52 = vcombine.low %v550_v42, %v552_v43  ;;  %v413_v43 = vld [vmem:[%s5352_s11 + $0xd8] sm:$0xff]  ;;  %v5549_v47 = vld [vmem:[#allocation5 + $0x200] sm:$0xff]  }
  0xe3   : > { %4014 = vmatpush3.bf16.msra.mxu1 %v4768_v23  ;;  %4286 = vmatpush3.bf16.msra.mxu0 %v5374_v4  ;;  %v509_v4 = vmul.bf16 %v5410_v50, %v389_v36  ;;  %v4787_v23 = vld [vmem:[#allocation5 + $0x1c0] sm:$0xff]   ;;  %v4786_v36 = vld [vmem:[#allocation5 + $0x168] sm:$0xff]  }
  0xe4   : > { %4015 = vmatprep.subr.bf16.mxu1 %v4769_v27  ;;  %4287 = vmatprep.subr.bf16.mxu0 %v5377_v7  ;;  %v405_v27 = vld [vmem:[%s5352_s11 + $0xa8] sm:$0xff] }
  0xe5   : > { %v5469_v55 = vcombine.high %v509_v4, %v511_v45  ;;  %v5483_v2 = vcombine.low %v509_v4, %v511_v45  ;;  %v4798_v4 = vld [vmem:[#allocation5 + $0x178] sm:$0xff]   ;;  %v533_v45 = vmul.bf16 %v5410_v50, %v413_v43 }
  0xe6   : > { %1050 = vmatmul.mubr.bf16.gmra.mrb[4].mxu0 %v5447_v33  ;;  %4320 = vmatmul.mubr.bf16.gmra.mrb[4].mxu1 %v3608_v34  ;;  %v409_v34 = vld [vmem:[%s5352_s11 + $0xc0] sm:$0xff] }
  0xe7   : > { %4016 = vmatpush3.bf16.msra.mxu1 %v4770_v31  ;;  %1057 = vmatprep.mubr.bf16.mxu0 %v5450_v37  ;;  %v527_v31 = vmul.bf16 %v5410_v50, %v407_v28  ;;  %v529_v38 = vmul.bf16 %v5410_v50, %v409_v34  ;;  %v437_v28 = vld [vmem:[%s5352_s11 + $0x168] sm:$0xff] }
  0xe8   : > { %4017 = vmatprep.subr.bf16.mxu1 %v4771_v35  ;;  %4323 = vmatprep.mubr.bf16.mxu1 %v3611_v39  ;;  %v411_v35 = vld [vmem:[%s5352_s11 + $0xcc] sm:$0xff] }
  0xe9   : > { %4288 = vmatpush3.bf16.msra.mxu0 %v5377_v7  ;;  %v558_v7 = vmul.bf16 %v5412_v51, %v438_v56  ;;  %v531_v39 = vmul.bf16 %v5410_v50, %v411_v35  ;;  %v378_v35 = vld [vmem:[%s5352_s11 + $0x8] sm:$0xf] }
  0xea   : > { %4289 = vmatprep.subr.bf16.mxu0 %v5381_v10 }
  0xeb   : > { %4018 = vmatpush3.bf16.msra.mxu1 %v4772_v44  ;;  %v3620_v3 = vcombine.low %v558_v7, %v560_v61  ;;  %v5539_v42 = vcombine.high %v529_v38, %v531_v39  ;;  %v415_v44 = vld [vmem:[%s5352_s11 + $0xe4] sm:$0xff]  ;;  %v5551_v48 = vcombine.low %v529_v38, %v531_v39  ;;  %v423_v7 = vld [vmem:[%s5352_s11 + $0x114] sm:$0xff]  ;;  %v541_v61 = vmul.bf16 %v5410_v50, %v421_v60 }
  0xec   : > { %4019 = vmatprep.subr.bf16.mxu1 %v4773_v46  ;;  %v535_v46 = vmul.bf16 %v5410_v50, %v415_v44  ;;  %v498_v38 = vmul.bf16 %v5412_v51, %v378_v35  ;;  %v382_v44 = vld [vmem:[%s5352_s11 + $0x20] sm:$0xf]  ;;  %v402_v35 = vld [vmem:[%s5352_s11 + $0x98] sm:$0xf] }
  0xed   : > { %4290 = vmatpush3.bf16.msra.mxu0 %v5381_v10  ;;  %v4777_v10 = vld [vmem:[#allocation5 + $0x130] sm:$0xff]  }
  0xee   : > { %1058 = vmatmul.mubr.bf16.gmra.mrb[8].mxu0 %v5466_v49  ;;  %4324 = vmatmul.mubr.bf16.gmra.mrb[8].mxu1 %v3614_v52  ;;  %v5553_v52 = vcombine.high %v533_v45, %v535_v46 }
  0xef   : > { %4020 = vmatpush3.bf16.msra.mxu1 %v4774_v53  ;;  %1065 = vmatprep.mubr.bf16.mxu0 %v5469_v55  ;;  %v417_v53 = vld [vmem:[%s5352_s11 + $0xf0] sm:$0xff] }
  0xf0   : > { %4021 = vmatprep.subr.bf16.mxu1 %v4775_v54  ;;  %4327 = vmatprep.mubr.bf16.mxu1 %v3617_v58  ;;  %v419_v54 = vld [vmem:[%s5352_s11 + $0xfc] sm:$0xff]  ;;  %v537_v56 = vmul.bf16 %v5410_v50, %v417_v53  ;;  %v5564_v58 = vcombine.low %v533_v45, %v535_v46  ;;  %v386_v45 = vld [vmem:[%s5352_s11 + $0x38] sm:$0xf]  ;;  %v388_v46 = vld [vmem:[%s5352_s11 + $0x44] sm:$0xf]  ;;  %v502_v53 = vmul.bf16 %v5412_v51, %v382_v44 }
  0xf1   : > { %4291 = vmatprep.subr.bf16.mxu0 %v5385_v13  ;;  %v539_v57 = vmul.bf16 %v5410_v50, %v419_v54  ;;  %v4795_v44 = vld [vmem:[#allocation5 + $0x198] sm:$0xff]  }
  0xf2   : > { %4292 = vmatpush3.bf16.msra.mxu0 %v5385_v13  ;;  %v517_v13 = vmul.bf16 %v5410_v50, %v397_v9 }
  0xf3   : > { %4022 = vmatpush3.bf16.msra.mxu1 %v4776_v62  ;;  %4293 = vmatprep.subr.bf16.mxu0 %v5389_v19  ;;  %v5566_v59 = vcombine.high %v537_v56, %v539_v57  ;;  %v543_v62 = vmul.bf16 %v5410_v50, %v423_v7  ;;  %v5576_v63 = vcombine.low %v537_v56, %v539_v57  ;;  %v4788_v7 = vld [vmem:[#allocation5 + $0x180] sm:$0xff]  }
  0xf4   : > { %4023 = vmatprep.subr.bf16.mxu1 %v4777_v10  ;;  %v5500_v18 = vcombine.high %v517_v13, %v519_v14  ;;  %v425_v10 = vld [vmem:[%s5352_s11 + $0x120] sm:$0xff]  ;;  %v506_v56 = vmul.bf16 %v5412_v51, %v386_v45  ;;  %v508_v57 = vmul.bf16 %v5412_v51, %v388_v46 }
  0xf5   : > { %v5578_v0 = vcombine.high %v541_v61, %v543_v62  ;;  %v5588_v9 = vcombine.low %v541_v61, %v543_v62  ;;  %v390_v62 = vld [vmem:[%s5352_s11 + $0x50] sm:$0xf] }
  0xf6   : > { %1066 = vmatmul.mubr.bf16.gmra.mrb[12].mxu0 %v5483_v2  ;;  %4328 = vmatmul.mubr.bf16.gmra.mrb[12].mxu1 %v3620_v3  ;;  %v427_v3 = vld [vmem:[%s5352_s11 + $0x12c] sm:$0xff]  ;;  %v3581_v61 = vcombine.low %v506_v56, %v508_v57 }
  0xf7   : > { %4024 = vmatpush3.bf16.msra.mxu1 %v4778_v5  ;;  %1073 = vmatprep.mubr.bf16.mxu0 %v5486_v6  ;;  %v545_v5 = vmul.bf16 %v5410_v50, %v425_v10  ;;  %v392_v10 = vld [vmem:[%s5352_s11 + $0x5c] sm:$0xf]  ;;  %v4796_v46 = vld [vmem:[#allocation5 + $0x1e0] sm:$0xff]  }
  0xf8   : > { %4025 = vmatprep.subr.bf16.mxu1 %v4779_v8  ;;  %1972 = vmatprep.mubr.bf16.mxu1 %v5431_v15  ;;  %v523_v15 = vmul.bf16 %v5410_v50, %v403_v21  ;;  %v547_v8 = vmul.bf16 %v5410_v50, %v427_v3  ;;  %v4790_v3 = vld [vmem:[#allocation5 + $0x1c8] sm:$0xff]   ;;  %v4797_v56 = vld [vmem:[#allocation5 + $0x1a0] sm:$0xff]  }
  0xf9   : > { %4294 = vmatpush3.bf16.msra.mxu0 %v5389_v19  ;;  %v521_v19 = vmul.bf16 %v5410_v50, %v401_v20 }
  0xfa   : > { %4295 = vmatprep.subr.bf16.mxu0 %v5393_v24  ;;  %v5590_v11 = vcombine.high %v545_v5, %v547_v8  ;;  %v5600_v20 = vcombine.low %v545_v5, %v547_v8  ;;  %v394_v5 = vld [vmem:[%s5352_s11 + $0x68] sm:$0xf]  ;;  %v396_v8 = vld [vmem:[%s5352_s11 + $0x74] sm:$0xf] }
  0xfb   : > { %4026 = vmatpush3.bf16.msra.mxu1 %v4780_v12  ;;  %v5515_v26 = vcombine.high %v521_v19, %v523_v15  ;;  %v5525_v32 = vcombine.low %v521_v19, %v523_v15  ;;  %v429_v12 = vld [vmem:[%s5352_s11 + $0x138] sm:$0xff] }
  0xfc   : > { %4331 = vmatprep.subr.bf16.mxu1 %v4781_v16  ;;  %v435_v19 = vld [vmem:[%s5352_s11 + $0x15c] sm:$0xff] }
  0xfd   : > { %4296 = vmatpush3.bf16.msra.mxu0 %v5393_v24  ;;  %v5512_v24 = vcombine.low %v517_v13, %v519_v14  ;;  %v431_v13 = vld [vmem:[%s5352_s11 + $0x144] sm:$0xff]  ;;  %v549_v14 = vmul.bf16 %v5410_v50, %v429_v12  ;;  %v510_v12 = vmul.bf16 %v5412_v51, %v390_v62 }
  0xfe   : > { %1074 = vmatmul.mubr.bf16.gmra.mrb[16].mxu0 %v5497_v17  ;;  %1973 = vmatmul.mubr.bf16.vlgmr.msra.gmra.mrb[16].mxu1 %v5447_v33 }
  0xff   : > { %4332 = vmatpush3.bf16.msra.mxu1 %v4781_v16  ;;  %1081 = vmatprep.mubr.bf16.mxu0 %v5500_v18  ;;  %v551_v16 = vmul.bf16 %v5410_v50, %v431_v13  ;;  %v512_v13 = vmul.bf16 %v5412_v51, %v392_v10  ;;  %v1364_v10 = vld [vmem:[%s5352_s11 + $0x20] sm:$0xf] }
 0x100   : > { %1980 = vmatprep.mubr.bf16.mxu1 %v5450_v37  ;;  %4333 = vmatprep.subr.bf16.mxu1 %v4782_v22 }
 0x101   : > { %4297 = vmatprep.subr.bf16.mxu0 %v5398_v29  ;;  %v5602_v21 = vcombine.high %v549_v14, %v551_v16 }
 0x102   : > { %4298 = vmatpush3.bf16.msra.mxu0 %v5398_v29  ;;  %v525_v29 = vmul.bf16 %v5410_v50, %v405_v27 }
 0x103   : > { %4334 = vmatpush3.bf16.msra.mxu1 %v4782_v22  ;;  %4147 = vmatprep.subr.bf16.mxu0 %v4787_v23  ;;  %v433_v22 = vld [vmem:[%s5352_s11 + $0x150] sm:$0xff]  ;;  %v555_v23 = vmul.bf16 %v5410_v50, %v435_v19 }
 0x104   : > { %4335 = vmatprep.subr.bf16.mxu1 %v4783_v25  ;;  %v5527_v33 = vcombine.high %v525_v29, %v527_v31  ;;  %v5537_v41 = vcombine.low %v525_v29, %v527_v31  ;;  %v553_v15 = vmul.bf16 %v5410_v50, %v433_v22  ;;  %v557_v29 = vmul.bf16 %v5410_v50, %v437_v28  ;;  %v4792_v19 = vld [vmem:[#allocation5 + $0x1d0] sm:$0xff]  }
 0x105   : > { %v516_v22 = vmul.bf16 %v5412_v51, %v396_v8  ;;  %v4800_v8 = vld [vmem:[#allocation5 + $0x1a8] sm:$0xff]  }
 0x106   : > { %1082 = vmatmul.mubr.bf16.gmra.mrb[20].mxu0 %v5512_v24  ;;  %1981 = vmatmul.mubr.bf16.gmra.mrb[20].mxu1 %v5466_v49  ;;  %v3616_v27 = vcombine.high %v553_v15, %v555_v23 }
 0x107   : > { %1089 = vmatprep.mubr.bf16.mxu0 %v5515_v26  ;;  %1988 = vmatprep.mubr.bf16.mxu1 %v5469_v55 }
 0x108   : > { %4336 = vmatpush3.bf16.msra.mxu1 %v4783_v25  ;;  %v5612_v25 = vcombine.low %v549_v14, %v551_v16  ;;  %v4791_v14 = vld [vmem:[#allocation5 + $0x188] sm:$0xff]   ;;  %v514_v16 = vmul.bf16 %v5412_v51, %v394_v5 }
 0x109   : > { %4337 = vmatprep.subr.bf16.mxu1 %v4784_v30 }
 0x10a   : > { %v3587_v28 = vcombine.low %v514_v16, %v516_v22  ;;  %v4802_v22 = vld [vmem:[#allocation5 + $0x1b0] sm:$0xff]  }
 0x10c   : > { %4338 = vmatpush3.bf16.msra.mxu1 %v4784_v30  ;;  %v439_v30 = vld [vmem:[%s5352_s11 + $0x174] sm:$0xff] }
 0x10d   : > { %4339 = vmatprep.subr.bf16.mxu1 %v4785_v1  ;;  %v559_v31 = vmul.bf16 %v5410_v50, %v439_v30  ;;  %v398_v30 = vld [vmem:[%s5352_s11 + $0x80] sm:$0xf] }
 0x10e   : > { %1090 = vmatmul.mubr.bf16.gmra.mrb[24].mxu0 %v5525_v32  ;;  %1989 = vmatmul.mubr.bf16.gmra.mrb[24].mxu1 %v5483_v2 }
 0x10f   : > { %1097 = vmatprep.mubr.bf16.mxu0 %v5527_v33  ;;  %1996 = vmatprep.mubr.bf16.mxu1 %v5486_v6  ;;  %v5621_v34 = vcombine.high %v557_v29, %v559_v31 }
 0x110   : > { %4340 = vmatpush3.bf16.msra.mxu1 %v4785_v1  ;;  %v3615_v1 = vcombine.low %v553_v15, %v555_v23  ;;  %v3584_v15 = vcombine.low %v510_v12, %v512_v13  ;;  %v4793_v23 = vld [vmem:[#allocation5 + $0x190] sm:$0xff]   ;;  %v1428_v12 = vmul.bf16 %v5412_v51, %v1364_v10 }
 0x111   : > { %4341 = vmatprep.subr.bf16.mxu1 %v4786_v36  ;;  %v1388_v10 = vld [vmem:[%s5352_s11 + $0xb0] sm:$0xf] }
 0x114   : > { %4342 = vmatpush3.bf16.msra.mxu1 %v4786_v36  ;;  %v380_v36 = vld [vmem:[%s5352_s11 + $0x14] sm:$0xf] }
 0x115   : > { %4343 = vmatprep.subr.bf16.mxu1 %v4789_v40  ;;  %v500_v39 = vmul.bf16 %v5412_v51, %v380_v36  ;;  %v404_v36 = vld [vmem:[%s5352_s11 + $0xa4] sm:$0xf] }
 0x116   : > { %1098 = vmatmul.mubr.bf16.gmra.mrb[28].mxu0 %v5537_v41  ;;  %1997 = vmatmul.mubr.bf16.gmra.mrb[28].mxu1 %v5497_v17  ;;  %v524_v45 = vmul.bf16 %v5412_v51, %v404_v36  ;;  %v4804_v36 = vld [vmem:[#allocation5 + $0x1b8] sm:$0xff]  }
 0x117   : > { %1105 = vmatprep.mubr.bf16.mxu0 %v5539_v42  ;;  %2004 = vmatprep.mubr.bf16.mxu1 %v5500_v18  ;;  %v3575_v43 = vcombine.low %v498_v38, %v500_v39  ;;  %v1423_v38 = vld [vmem:[%s5352_s11 + $0x180] sm:$0xff]  ;;  %v1425_v39 = vld [vmem:[%s5352_s11 + $0x18c] sm:$0xff] }
 0x118   : > { %4344 = vmatpush3.bf16.msra.mxu1 %v4789_v40  ;;  %v5630_v40 = vcombine.low %v557_v29, %v559_v31  ;;  %v400_v29 = vld [vmem:[%s5352_s11 + $0x8c] sm:$0xf] }
 0x119   : > { %4345 = vmatprep.subr.bf16.mxu1 %v4798_v4  ;;  %v4794_v31 = vld [vmem:[#allocation5 + $0x1d8] sm:$0xff]  }
 0x11c   : > { %4346 = vmatpush3.bf16.msra.mxu1 %v4798_v4  ;;  %v384_v4 = vld [vmem:[%s5352_s11 + $0x2c] sm:$0xf] }
 0x11d   : > { %4379 = vmatprep.subr.bf16.mxu1 %v5549_v47  ;;  %v504_v54 = vmul.bf16 %v5412_v51, %v384_v4  ;;  %v522_v4 = vmul.bf16 %v5412_v51, %v402_v35 }
 0x11e   : > { %1106 = vmatmul.mubr.bf16.gmra.mrb[32].mxu0 %v5551_v48  ;;  %2005 = vmatmul.mubr.bf16.gmra.mrb[32].mxu1 %v5512_v24 }
 0x11f   : > { %1113 = vmatprep.mubr.bf16.mxu0 %v5553_v52  ;;  %2012 = vmatprep.mubr.bf16.mxu1 %v5515_v26  ;;  %v3578_v60 = vcombine.low %v502_v53, %v504_v54  ;;  %v1489_v53 = vmul.bf16 %v5410_v50, %v1425_v39  ;;  %v3593_v57 = vcombine.low %v522_v4, %v524_v45  ;;  %v1378_v4 = vld [vmem:[%s5352_s11 + $0x74] sm:$0xf]  ;;  %v4806_v45 = vld [vmem:[#allocation5 + $0x208] sm:$0xff]  }
 0x126   : > { %1114 = vmatmul.mubr.bf16.gmra.mrb[36].mxu0 %v5564_v58  ;;  %2013 = vmatmul.mubr.bf16.gmra.mrb[36].mxu1 %v5525_v32 }
 0x127   : > { %1121 = vmatprep.mubr.bf16.mxu0 %v5566_v59  ;;  %2020 = vmatprep.mubr.bf16.mxu1 %v5527_v33 }
 0x12e   : > { %1122 = vmatmul.mubr.bf16.gmra.mrb[40].mxu0 %v5576_v63  ;;  %2021 = vmatmul.mubr.bf16.gmra.mrb[40].mxu1 %v5537_v41 }
 0x12f   : > { %1129 = vmatprep.mubr.bf16.mxu0 %v5578_v0  ;;  %2028 = vmatprep.mubr.bf16.mxu1 %v5539_v42 }
 0x136   : > { %1130 = vmatmul.mubr.bf16.gmra.mrb[44].mxu0 %v5588_v9  ;;  %2029 = vmatmul.mubr.bf16.gmra.mrb[44].mxu1 %v5551_v48 }
 0x137   : > { %1137 = vmatprep.mubr.bf16.mxu0 %v5590_v11  ;;  %2036 = vmatprep.mubr.bf16.mxu1 %v5553_v52 }
 0x13e   : > { %1138 = vmatmul.mubr.bf16.gmra.mrb[48].mxu0 %v5600_v20  ;;  %2037 = vmatmul.mubr.bf16.gmra.mrb[48].mxu1 %v5564_v58 }
 0x13f   : > { %1145 = vmatprep.mubr.bf16.mxu0 %v5602_v21  ;;  %2044 = vmatprep.mubr.bf16.mxu1 %v5566_v59 }
 0x146   : > { %1146 = vmatmul.mubr.bf16.gmra.mrb[52].mxu0 %v5612_v25  ;;  %2045 = vmatmul.mubr.bf16.gmra.mrb[52].mxu1 %v5576_v63 }
 0x147   : > { %1153 = vmatprep.mubr.bf16.mxu0 %v3616_v27  ;;  %2052 = vmatprep.mubr.bf16.mxu1 %v5578_v0 }
 0x14e   : > { %1154 = vmatmul.mubr.bf16.gmra.mrb[56].mxu0 %v3615_v1  ;;  %2053 = vmatmul.mubr.bf16.gmra.mrb[56].mxu1 %v5588_v9 }
 0x14f   : > { %1161 = vmatprep.mubr.bf16.mxu0 %v5621_v34  ;;  %2060 = vmatprep.mubr.bf16.mxu1 %v5590_v11 }
 0x156   : > { %1162 = vmatmul.mubr.bf16.gmra.mrb[60].mxu0 %v5630_v40  ;;  %2061 = vmatmul.mubr.bf16.gmra.mrb[60].mxu1 %v5600_v20 }
 0x157   : > { %4299 = vmatprep.mubr.bf16.mxu0 %v3575_v43  ;;  %2068 = vmatprep.mubr.bf16.mxu1 %v5602_v21  ;;  %v518_v43 = vmul.bf16 %v5412_v51, %v398_v30  ;;  %v1372_v30 = vld [vmem:[%s5352_s11 + $0x50] sm:$0xf] }
 0x15e   : > { %4300 = vmatmul.mubr.bf16.vlgmr.msra.gmra.mrb[64].mxu0 %v3578_v60  ;;  %2069 = vmatmul.mubr.bf16.gmra.mrb[64].mxu1 %v5612_v25  ;;  %v406_v60 = vld [vmem:[%s5352_s11 + $0xb0] sm:$0xf] }
 0x15f   : > { %4148 = vmatpush3.bf16.msra.mxu0 %v4788_v7  ;;  %4303 = vmatprep.mubr.bf16.mxu0 %v3581_v61  ;;  %v408_v7 = vld [vmem:[%s5352_s11 + $0xbc] sm:$0xf] }
 0x160   : > { %4149 = vmatprep.subr.bf16.mxu0 %v4790_v3  ;;  %2076 = vmatprep.mubr.bf16.mxu1 %v3616_v27  ;;  %v520_v27 = vmul.bf16 %v5412_v51, %v400_v29  ;;  %v4799_v61 = vld [vmem:[#allocation5 + $0x1e8] sm:$0xff]   ;;  %v528_v5 = vmul.bf16 %v5412_v51, %v408_v7 }
 0x161   : > { %v1366_v3 = vld [vmem:[%s5352_s11 + $0x2c] sm:$0xf]  ;;  %v1374_v29 = vld [vmem:[%s5352_s11 + $0x5c] sm:$0xf]  ;;  %v1384_v7 = vld [vmem:[%s5352_s11 + $0x98] sm:$0xf] }
 0x162   : > { %v3590_v54 = vcombine.low %v518_v43, %v520_v27  ;;  %v1430_v13 = vmul.bf16 %v5412_v51, %v1366_v3  ;;  %v1438_v39 = vmul.bf16 %v5412_v51, %v1374_v29  ;;  %v1390_v3 = vld [vmem:[%s5352_s11 + $0xbc] sm:$0xf]  ;;  %v4811_v29 = vld [vmem:[#allocation5 + $0x230] sm:$0xff]  }
 0x163   : > { %4150 = vmatpush3.bf16.msra.mxu0 %v4791_v14  ;;  %v4801_v14 = vld [vmem:[#allocation5 + $0x1f0] sm:$0xff]  }
 0x164   : > { %4151 = vmatprep.subr.bf16.mxu0 %v4792_v19  ;;  %v3647_v19 = vcombine.low %v1428_v12, %v1430_v13  ;;  %v4809_v12 = vld [vmem:[#allocation5 + $0x220] sm:$0xff]  }
 0x166   : > { %4304 = vmatmul.mubr.bf16.gmra.mrb[68].mxu0 %v3584_v15  ;;  %2077 = vmatmul.mubr.bf16.gmra.mrb[68].mxu1 %v3615_v1  ;;  %v1487_v1 = vmul.bf16 %v5410_v50, %v1423_v38  ;;  %v1368_v15 = vld [vmem:[%s5352_s11 + $0x38] sm:$0xf]  ;;  %v1436_v38 = vmul.bf16 %v5412_v51, %v1372_v30 }
 0x167   : > { %4152 = vmatpush3.bf16.msra.mxu0 %v4793_v23  ;;  %4307 = vmatprep.mubr.bf16.mxu0 %v3587_v28  ;;  %v1370_v23 = vld [vmem:[%s5352_s11 + $0x44] sm:$0xf]  ;;  %v4803_v28 = vld [vmem:[#allocation5 + $0x1f8] sm:$0xff]  }
 0x168   : > { %4153 = vmatprep.subr.bf16.mxu0 %v4794_v31  ;;  %2084 = vmatprep.mubr.bf16.mxu1 %v5621_v34  ;;  %v5667_v62 = vcombine.high %v1487_v1, %v1489_v53  ;;  %v526_v34 = vmul.bf16 %v5412_v51, %v406_v60  ;;  %v5677_v16 = vcombine.low %v1487_v1, %v1489_v53  ;;  %v1382_v1 = vld [vmem:[%s5352_s11 + $0x8c] sm:$0xf] }
 0x169   : > { %v1432_v31 = vmul.bf16 %v5412_v51, %v1368_v15  ;;  %v1434_v35 = vmul.bf16 %v5412_v51, %v1370_v23  ;;  %v3653_v27 = vcombine.low %v1436_v38, %v1438_v39  ;;  %v4810_v15 = vld [vmem:[#allocation5 + $0x228] sm:$0xff]   ;;  %v1402_v38 = vld [vmem:[%s5352_s11 + $0x104] sm:$0xf]  ;;  %v1404_v39 = vld [vmem:[%s5352_s11 + $0x110] sm:$0xf] }
 0x16b   : > { %4154 = vmatpush3.bf16.msra.mxu0 %v4795_v44  ;;  %v3650_v43 = vcombine.low %v1432_v31, %v1434_v35  ;;  %v1376_v44 = vld [vmem:[%s5352_s11 + $0x68] sm:$0xf] }
 0x16c   : > { %4155 = vmatprep.subr.bf16.mxu0 %v4796_v46  ;;  %v1380_v46 = vld [vmem:[%s5352_s11 + $0x80] sm:$0xf]  ;;  %v1440_v53 = vmul.bf16 %v5412_v51, %v1376_v44  ;;  %v1468_v44 = vmul.bf16 %v5412_v51, %v1404_v39 }
 0x16e   : > { %4308 = vmatmul.mubr.bf16.gmra.mrb[72].mxu0 %v3590_v54  ;;  %2085 = vmatmul.mubr.bf16.gmra.mrb[72].mxu1 %v5630_v40  ;;  %v3596_v40 = vcombine.low %v526_v34, %v528_v5  ;;  %v1442_v54 = vmul.bf16 %v5412_v51, %v1378_v4  ;;  %v1452_v5 = vmul.bf16 %v5412_v51, %v1388_v10  ;;  %v1422_v10 = vld [vmem:[%s5352_s11 + $0x17c] sm:$0xf] }
 0x16f   : > { %4156 = vmatpush3.bf16.msra.mxu0 %v4797_v56  ;;  %4311 = vmatprep.mubr.bf16.mxu0 %v3593_v57  ;;  %v1446_v56 = vmul.bf16 %v5412_v51, %v1382_v1  ;;  %v4807_v57 = vld [vmem:[#allocation5 + $0x210] sm:$0xff]   ;;  %v1408_v1 = vld [vmem:[%s5352_s11 + $0x128] sm:$0xf] }
 0x170   : > { %4157 = vmatprep.subr.bf16.mxu0 %v4799_v61  ;;  %2092 = vmatprep.mubr.bf16.mxu1 %v5667_v62  ;;  %v3656_v60 = vcombine.low %v1440_v53, %v1442_v54  ;;  %v1386_v61 = vld [vmem:[%s5352_s11 + $0xa4] sm:$0xf]  ;;  %v1410_v53 = vld [vmem:[%s5352_s11 + $0x134] sm:$0xf]  ;;  %v1414_v54 = vld [vmem:[%s5352_s11 + $0x14c] sm:$0xf] }
 0x171   : > { %v1450_v34 = vmul.bf16 %v5412_v51, %v1386_v61  ;;  %v1418_v61 = vld [vmem:[%s5352_s11 + $0x164] sm:$0xf] }
 0x173   : > { %4158 = vmatpush3.bf16.msra.mxu0 %v4800_v8  ;;  %v1454_v8 = vmul.bf16 %v5412_v51, %v1390_v3 }
 0x174   : > { %4159 = vmatprep.subr.bf16.mxu0 %v4801_v14 }
 0x175   : > { %v3665_v14 = vcombine.low %v1452_v5, %v1454_v8  ;;  %v1424_v8 = vld [vmem:[%s5352_s11 + $0x188] sm:$0xf] }
 0x176   : > { %4312 = vmatmul.mubr.bf16.gmra.mrb[76].mxu0 %v3596_v40  ;;  %2093 = vmatmul.mubr.bf16.gmra.mrb[76].mxu1 %v5677_v16  ;;  %v1392_v40 = vld [vmem:[%s5352_s11 + $0xc8] sm:$0xf] }
 0x177   : > { %4160 = vmatpush3.bf16.msra.mxu0 %v4802_v22  ;;  %4347 = vmatprep.mubr.bf16.mxu1 %v3647_v19  ;;  %v1394_v22 = vld [vmem:[%s5352_s11 + $0xd4] sm:$0xf]  ;;  %v1398_v19 = vld [vmem:[%s5352_s11 + $0xec] sm:$0xf] }
 0x178   : > { %4161 = vmatprep.subr.bf16.mxu0 %v4803_v28  ;;  %2903 = vmatprep.mubr.bf16.mxu0 %v5450_v37  ;;  %v1444_v37 = vmul.bf16 %v5412_v51, %v1380_v46  ;;  %v1458_v23 = vmul.bf16 %v5412_v51, %v1394_v22  ;;  %v1462_v30 = vmul.bf16 %v5412_v51, %v1398_v19 }
 0x17b   : > { %4162 = vmatpush3.bf16.msra.mxu0 %v4804_v36  ;;  %v1400_v36 = vld [vmem:[%s5352_s11 + $0xf8] sm:$0xf] }
 0x17e   : > { %4348 = vmatmul.mubr.bf16.vlgmr.msra.gmra.mrb[80].mxu1 %v3650_v43  ;;  %2904 = vmatmul.mubr.bf16.vlgmr.msra.gmra.mrb[80].mxu0 %v5466_v49  ;;  %v3659_v49 = vcombine.low %v1444_v37, %v1446_v56  ;;  %v4812_v43 = vld [vmem:[#allocation5 + $0x238] sm:$0xff]   ;;  %v1474_v37 = vmul.bf16 %v5412_v51, %v1410_v53 }
 0x17f   : > { %4380 = vmatpush3.bf16.msra.mxu1 %v5549_v47  ;;  %4351 = vmatprep.mubr.bf16.mxu1 %v3653_v27  ;;  %v4808_v47 = vld [vmem:[#allocation5 + $0x218] sm:$0xff]   ;;  %v1466_v27 = vmul.bf16 %v5412_v51, %v1402_v38 }
 0x180   : > { %2911 = vmatprep.mubr.bf16.mxu0 %v5469_v55  ;;  %4381 = vmatprep.subr.bf16.mxu1 %v4806_v45  ;;  %v1448_v55 = vmul.bf16 %v5412_v51, %v1384_v7  ;;  %v1416_v7 = vld [vmem:[%s5352_s11 + $0x158] sm:$0xf] }
 0x181   : > { %v1480_v3 = vmul.bf16 %v5412_v51, %v1416_v7  ;;  %v2311_v53 = vld [vmem:[%s5352_s11 + $0x98] sm:$0xf] }
 0x182   : > { %v3662_v13 = vcombine.low %v1448_v55, %v1450_v34  ;;  %v1486_v55 = vmul.bf16 %v5412_v51, %v1422_v10  ;;  %v2317_v10 = vld [vmem:[%s5352_s11 + $0xbc] sm:$0xf] }
 0x183   : > { %4382 = vmatpush3.bf16.msra.mxu1 %v4806_v45 }
 0x184   : > { %4383 = vmatprep.subr.bf16.mxu1 %v4807_v57 }
 0x186   : > { %4352 = vmatmul.mubr.bf16.gmra.mrb[84].mxu1 %v3656_v60  ;;  %2912 = vmatmul.mubr.bf16.gmra.mrb[84].mxu0 %v5483_v2  ;;  %v1396_v2 = vld [vmem:[%s5352_s11 + $0xe0] sm:$0xf] }
 0x187   : > { %4355 = vmatprep.mubr.bf16.mxu1 %v3659_v49  ;;  %2919 = vmatprep.mubr.bf16.mxu0 %v5486_v6  ;;  %v1456_v6 = vmul.bf16 %v5412_v51, %v1392_v40  ;;  %v1460_v28 = vmul.bf16 %v5412_v51, %v1396_v2 }
 0x188   : > { %4384 = vmatpush3.bf16.msra.mxu1 %v4807_v57  ;;  %v1478_v57 = vmul.bf16 %v5412_v51, %v1414_v54 }
 0x189   : > { %4385 = vmatprep.subr.bf16.mxu1 %v4808_v47  ;;  %v3668_v31 = vcombine.low %v1456_v6, %v1458_v23  ;;  %v3671_v35 = vcombine.low %v1460_v28, %v1462_v30  ;;  %v2299_v28 = vld [vmem:[%s5352_s11 + $0x50] sm:$0xf]  ;;  %v2301_v30 = vld [vmem:[%s5352_s11 + $0x5c] sm:$0xf] }
 0x18a   : > { %v2365_v38 = vmul.bf16 %v5412_v51, %v2301_v30 }
 0x18c   : > { %4386 = vmatpush3.bf16.msra.mxu1 %v4808_v47 }
 0x18d   : > { %4387 = vmatprep.subr.bf16.mxu1 %v4809_v12 }
 0x18e   : > { %4356 = vmatmul.mubr.bf16.gmra.mrb[88].mxu1 %v3662_v13  ;;  %2920 = vmatmul.mubr.bf16.gmra.mrb[88].mxu0 %v5497_v17  ;;  %v1406_v17 = vld [vmem:[%s5352_s11 + $0x11c] sm:$0xf]  ;;  %v2295_v13 = vld [vmem:[%s5352_s11 + $0x38] sm:$0xf] }
 0x18f   : > { %4359 = vmatprep.mubr.bf16.mxu1 %v3665_v14  ;;  %2927 = vmatprep.mubr.bf16.mxu0 %v5500_v18  ;;  %v1464_v18 = vmul.bf16 %v5412_v51, %v1400_v36  ;;  %v1470_v4 = vmul.bf16 %v5412_v51, %v1406_v17  ;;  %v2297_v14 = vld [vmem:[%s5352_s11 + $0x44] sm:$0xf]  ;;  %v2359_v40 = vmul.bf16 %v5412_v51, %v2295_v13 }
 0x190   : > { %4388 = vmatpush3.bf16.msra.mxu1 %v4809_v12  ;;  %v1426_v12 = vld [vmem:[%s5352_s11 + $0x194] sm:$0xf]  ;;  %v2361_v22 = vmul.bf16 %v5412_v51, %v2297_v14 }
 0x191   : > { %4389 = vmatprep.subr.bf16.mxu1 %v4810_v15  ;;  %v3674_v45 = vcombine.low %v1464_v18, %v1466_v27  ;;  %v3677_v46 = vcombine.low %v1468_v44, %v1470_v4 }
 0x194   : > { %4390 = vmatpush3.bf16.msra.mxu1 %v4810_v15 }
 0x195   : > { %4391 = vmatprep.subr.bf16.mxu1 %v4811_v29 }
 0x196   : > { %4360 = vmatmul.mubr.bf16.gmra.mrb[92].mxu1 %v3668_v31  ;;  %2928 = vmatmul.mubr.bf16.gmra.mrb[92].mxu0 %v5512_v24  ;;  %v1412_v24 = vld [vmem:[%s5352_s11 + $0x140] sm:$0xf]  ;;  %v2303_v31 = vld [vmem:[%s5352_s11 + $0x68] sm:$0xf] }
 0x197   : > { %4363 = vmatprep.mubr.bf16.mxu1 %v3671_v35  ;;  %2935 = vmatprep.mubr.bf16.mxu0 %v5515_v26  ;;  %v1472_v26 = vmul.bf16 %v5412_v51, %v1408_v1  ;;  %v1476_v56 = vmul.bf16 %v5412_v51, %v1412_v24  ;;  %v2305_v35 = vld [vmem:[%s5352_s11 + $0x74] sm:$0xf]  ;;  %v2367_v39 = vmul.bf16 %v5412_v51, %v2303_v31  ;;  %v2313_v24 = vld [vmem:[%s5352_s11 + $0xa4] sm:$0xf] }
 0x198   : > { %4392 = vmatpush3.bf16.msra.mxu1 %v4811_v29  ;;  %v2369_v17 = vmul.bf16 %v5412_v51, %v2305_v35 }
 0x199   : > { %4393 = vmatprep.subr.bf16.mxu1 %v4812_v43  ;;  %v3680_v60 = vcombine.low %v1472_v26, %v1474_v37  ;;  %v3683_v49 = vcombine.low %v1476_v56, %v1478_v57  ;;  %v2375_v37 = vmul.bf16 %v5412_v51, %v2311_v53  ;;  %v2377_v56 = vmul.bf16 %v5412_v51, %v2313_v24  ;;  %v2346_v53 = vld [vmem:[%s5352_s11 + $0x168] sm:$0xff]  ;;  %v2348_v24 = vld [vmem:[%s5352_s11 + $0x174] sm:$0xff] }
 0x19c   : > { %4394 = vmatpush3.bf16.msra.mxu1 %v4812_v43 }
 0x19e   : > { %4364 = vmatmul.mubr.bf16.gmra.mrb[0].mxu1 %v3674_v45  ;;  %2936 = vmatmul.mubr.bf16.gmra.mrb[96].mxu0 %v5525_v32  ;;  %v1420_v32 = vld [vmem:[%s5352_s11 + $0x170] sm:$0xf]  ;;  %v2307_v45 = vld [vmem:[%s5352_s11 + $0x80] sm:$0xf] }
 0x19f   : > { %4367 = vmatprep.mubr.bf16.mxu1 %v3677_v46  ;;  %2943 = vmatprep.mubr.bf16.mxu0 %v5527_v33  ;;  %v1482_v33 = vmul.bf16 %v5412_v51, %v1418_v61  ;;  %v1484_v47 = vmul.bf16 %v5412_v51, %v1420_v32  ;;  %v2309_v46 = vld [vmem:[%s5352_s11 + $0x8c] sm:$0xf]  ;;  %v3731_v61 = vcombine.low %v2375_v37, %v2377_v56  ;;  %v2315_v32 = vld [vmem:[%s5352_s11 + $0xb0] sm:$0xf]  ;;  %v2335_v37 = vld [vmem:[%s5352_s11 + $0x128] sm:$0xf] }
 0x1a0   : > { %v2373_v26 = vmul.bf16 %v5412_v51, %v2309_v46  ;;  %v2337_v56 = vld [vmem:[%s5352_s11 + $0x134] sm:$0xf] }
 0x1a1   : > { %v3686_v34 = vcombine.low %v1480_v3, %v1482_v33  ;;  %v3689_v5 = vcombine.low %v1484_v47, %v1486_v55  ;;  %v2319_v33 = vld [vmem:[%s5352_s11 + $0xc8] sm:$0xf]  ;;  %v2321_v47 = vld [vmem:[%s5352_s11 + $0xd4] sm:$0xf] }
 0x1a6   : > { %4368 = vmatmul.mubr.bf16.gmra.mrb[4].mxu1 %v3680_v60  ;;  %2944 = vmatmul.mubr.bf16.gmra.mrb[100].mxu0 %v5537_v41  ;;  %v1488_v41 = vmul.bf16 %v5412_v51, %v1424_v8  ;;  %v2385_v8 = vmul.bf16 %v5412_v51, %v2321_v47 }
 0x1a7   : > { %4371 = vmatprep.mubr.bf16.mxu1 %v3683_v49  ;;  %2951 = vmatprep.mubr.bf16.mxu0 %v5539_v42  ;;  %v1490_v42 = vmul.bf16 %v5412_v51, %v1426_v12 }
 0x1a9   : > { %v3692_v15 = vcombine.low %v1488_v41, %v1490_v42 }
 0x1ae   : > { %4372 = vmatmul.mubr.bf16.gmra.mrb[8].mxu1 %v3686_v34  ;;  %2952 = vmatmul.mubr.bf16.gmra.mrb[104].mxu0 %v5551_v48  ;;  %v3719_v48 = vcombine.low %v2359_v40, %v2361_v22  ;;  %v2381_v34 = vmul.bf16 %v5412_v51, %v2317_v10  ;;  %v2323_v40 = vld [vmem:[%s5352_s11 + $0xe0] sm:$0xf]  ;;  %v2325_v22 = vld [vmem:[%s5352_s11 + $0xec] sm:$0xf]  ;;  %v2399_v10 = vmul.bf16 %v5412_v51, %v2335_v37 }
 0x1af   : > { %4375 = vmatprep.mubr.bf16.mxu1 %v3689_v5  ;;  %2959 = vmatprep.mubr.bf16.mxu0 %v5553_v52  ;;  %v2363_v52 = vmul.bf16 %v5412_v51, %v2299_v28  ;;  %v2383_v5 = vmul.bf16 %v5412_v51, %v2319_v33  ;;  %v2387_v28 = vmul.bf16 %v5412_v51, %v2323_v40  ;;  %v2339_v40 = vld [vmem:[%s5352_s11 + $0x140] sm:$0xf] }
 0x1b0   : > { %v2389_v30 = vmul.bf16 %v5412_v51, %v2325_v22  ;;  %v2341_v22 = vld [vmem:[%s5352_s11 + $0x14c] sm:$0xf] }
 0x1b1   : > { %v3891_v2 = vpop.f32.mrb[0].mxu0  ;;  %v3722_v27 = vcombine.low %v2363_v52, %v2365_v38  ;;  %v3737_v42 = vcombine.low %v2383_v5, %v2385_v8 }
 0x1b2   : > { %v3892_v19 = vpop.f32.mrb[1].mxu0 }
 0x1b3   : > { %v5760_v6 = vadd.f32 %v3892_v19, %v3891_v2  ;;  %v3894_v23 = vpop.f32.mrb[2].mxu0  ;;  %v2342_v2 = vld [vmem:[%s5352_s11 + $0x150] sm:$0xff] }
 0x1b4   : > { %v3895_v29 = vpop.f32.mrb[3].mxu0 }
 0x1b5   : > { %v5766_v36 = vadd.f32 %v3895_v29, %v3894_v23  ;;  %v2327_v23 = vld [vmem:[%s5352_s11 + $0xf8] sm:$0xf]  ;;  %v2406_v29 = vmul.bf16 %v5410_v50, %v2342_v2 }
 0x1b6   : > { %4376 = vmatmul.mubr.bf16.gmra.mrb[12].mxu1 %v3692_v15  ;;  %2960 = vmatmul.mubr.bf16.gmra.mrb[108].mxu0 %v5564_v58  ;;  %v3725_v58 = vcombine.low %v2367_v39, %v2369_v17  ;;  %v2344_v15 = vld [vmem:[%s5352_s11 + $0x15c] sm:$0xff]  ;;  %v2391_v35 = vmul.bf16 %v5412_v51, %v2327_v23  ;;  %v2345_v23 = vld [vmem:[%s5352_s11 + $0x164] sm:$0xf] }
 0x1b7   : > { %2967 = vmatprep.mubr.bf16.mxu0 %v5566_v59  ;;  %4395 = vmatprep.mubr.bf16.mxu1 %v3719_v48  ;;  %v2371_v59 = vmul.bf16 %v5412_v51, %v2307_v45  ;;  %v2408_v31 = vmul.bf16 %v5410_v50, %v2344_v15  ;;  %v2343_v15 = vld [vmem:[%s5352_s11 + $0x158] sm:$0xf] }
 0x1b9   : > { %v3897_v43 = vpop.f32.mrb[4].mxu0  ;;  %v3728_v49 = vcombine.low %v2371_v59, %v2373_v26  ;;  %v3754_v45 = vcombine.high %v2406_v29, %v2408_v31 }
 0x1ba   : > { %v3898_v18 = vpop.f32.mrb[5].mxu0 }
 0x1bb   : > { %v5774_v44 = vadd.f32 %v3898_v18, %v3897_v43  ;;  %v3900_v4 = vpop.f32.mrb[6].mxu0  ;;  %v3740_v43 = vcombine.low %v2387_v28, %v2389_v30  ;;  %v2331_v18 = vld [vmem:[%s5352_s11 + $0x110] sm:$0xf]  ;;  %v2403_v30 = vmul.bf16 %v5412_v51, %v2339_v40 }
 0x1bc   : > { %v3901_v1 = vpop.f32.mrb[7].mxu0 }
 0x1bd   : > { %v5780_v54 = vadd.f32 %v3901_v1, %v3900_v4  ;;  %v2333_v1 = vld [vmem:[%s5352_s11 + $0x11c] sm:$0xf] }
 0x1be   : > { %2968 = vmatmul.mubr.bf16.gmra.mrb[112].mxu0 %v5576_v63  ;;  %4396 = vmatmul.mubr.bf16.vlgmr.msra.gmra.mrb[80].mxu1 %v3722_v27 }
 0x1bf   : > { %2975 = vmatprep.mubr.bf16.mxu0 %v5578_v0  ;;  %4399 = vmatprep.mubr.bf16.mxu1 %v3725_v58  ;;  %v2379_v0 = vmul.bf16 %v5412_v51, %v2315_v32  ;;  %v2412_v32 = vmul.bf16 %v5410_v50, %v2348_v24  ;;  %v2354_v24 = vld [vmem:[%s5352_s11 + $0x198] sm:$0xff] }
 0x1c1   : > { %v3903_v57 = vpop.f32.mrb[8].mxu0  ;;  %v3734_v14 = vcombine.low %v2379_v0, %v2381_v34  ;;  %v3753_v34 = vcombine.low %v2406_v29, %v2408_v31  ;;  %v2405_v29 = vmul.bf16 %v5412_v51, %v2341_v22  ;;  %v2407_v31 = vmul.bf16 %v5412_v51, %v2343_v15  ;;  %v2357_v15 = vld [vmem:[%s5352_s11 + $0x1ac] sm:$0xf] }
 0x1c2   : > { %v3904_v60 = vpop.f32.mrb[9].mxu0 }
 0x1c3   : > { %v5788_v7 = vadd.f32 %v3904_v60, %v3903_v57  ;;  %v3906_v63 = vpop.f32.mrb[10].mxu0 }
 0x1c4   : > { %v3907_v3 = vpop.f32.mrb[11].mxu0 }
 0x1c5   : > { %v5794_v55 = vadd.f32 %v3907_v3, %v3906_v63  ;;  %v2397_v63 = vmul.bf16 %v5412_v51, %v2333_v1  ;;  %v2401_v3 = vmul.bf16 %v5412_v51, %v2337_v56  ;;  %v2351_v56 = vld [vmem:[%s5352_s11 + $0x188] sm:$0xf] }
 0x1c6   : > { %2976 = vmatmul.mubr.bf16.gmra.mrb[116].mxu0 %v5588_v9  ;;  %4400 = vmatmul.mubr.bf16.gmra.mrb[84].mxu1 %v3728_v49  ;;  %v2395_v49 = vmul.bf16 %v5412_v51, %v2331_v18  ;;  %v2347_v18 = vld [vmem:[%s5352_s11 + $0x170] sm:$0xf] }
 0x1c7   : > { %2983 = vmatprep.mubr.bf16.mxu0 %v5590_v11  ;;  %4403 = vmatprep.mubr.bf16.mxu1 %v3731_v61  ;;  %v2329_v11 = vld [vmem:[%s5352_s11 + $0x104] sm:$0xf]  ;;  %v2410_v61 = vmul.bf16 %v5410_v50, %v2346_v53  ;;  %v2349_v53 = vld [vmem:[%s5352_s11 + $0x17c] sm:$0xf] }
 0x1c8   : > { %v2393_v52 = vmul.bf16 %v5412_v51, %v2329_v11  ;;  %v3746_v5 = vcombine.low %v2395_v49, %v2397_v63  ;;  %v2353_v49 = vld [vmem:[%s5352_s11 + $0x194] sm:$0xf] }
 0x1c9   : > { %v3909_v12 = vpop.f32.mrb[12].mxu0 }
 0x1ca   : > { %v3910_v13 = vpop.f32.mrb[13].mxu0  ;;  %v3743_v46 = vcombine.low %v2391_v35, %v2393_v52  ;;  %v2409_v35 = vmul.bf16 %v5412_v51, %v2345_v23 }
 0x1cb   : > { %v5802_v9 = vadd.f32 %v3910_v13, %v3909_v12  ;;  %v3912_v41 = vpop.f32.mrb[14].mxu0 }
 0x1cc   : > { %v3913_v19 = vpop.f32.mrb[15].mxu0  ;;  %v3755_v1 = vcombine.low %v2407_v31, %v2409_v35  ;;  %v2421_v35 = vmul.bf16 %v5412_v51, %v2357_v15 }
 0x1cd   : > { %v5810_v48 = vadd.f32 %v3913_v19, %v3912_v41  ;;  %v3757_v41 = vcombine.high %v2410_v61, %v2412_v32 }
 0x1ce   : > { %2984 = vmatmul.mubr.bf16.gmra.mrb[120].mxu0 %v5600_v20  ;;  %4404 = vmatmul.mubr.bf16.gmra.mrb[88].mxu1 %v3734_v14 }
 0x1cf   : > { %2991 = vmatprep.mubr.bf16.mxu0 %v5602_v21  ;;  %4407 = vmatprep.mubr.bf16.mxu1 %v3737_v42  ;;  %v3749_v42 = vcombine.low %v2399_v10, %v2401_v3  ;;  %v2418_v3 = vmul.bf16 %v5410_v50, %v2354_v24 }
 0x1d1   : > { %v3915_v20 = vpop.f32.mrb[16].mxu0  ;;  %v4027_v38 = vpop.f32.mrb[16].mxu1 }
 0x1d2   : > { %v3916_v39 = vpop.f32.mrb[17].mxu0  ;;  %v4028_v17 = vpop.f32.mrb[17].mxu1 }
 0x1d3   : > { %v5821_v27 = vadd.f32 %v3916_v39, %v3915_v20  ;;  %v3918_v21 = vpop.f32.mrb[18].mxu0  ;;  %v5823_v4 = vadd.f32 %v4028_v17, %v4027_v38  ;;  %v4030_v58 = vpop.f32.mrb[18].mxu1  ;;  %v3756_v17 = vcombine.low %v2410_v61, %v2412_v32  ;;  %v2411_v61 = vmul.bf16 %v5412_v51, %v2347_v18 }
 0x1d4   : > { %v3919_v59 = vpop.f32.mrb[19].mxu0  ;;  %v4031_v26 = vpop.f32.mrb[19].mxu1  ;;  %v2413_v32 = vmul.bf16 %v5412_v51, %v2349_v53 }
 0x1d5   : > { %v5830_v57 = vadd.f32 %v3919_v59, %v3918_v21  ;;  %v5832_v60 = vadd.f32 %v4031_v26, %v4030_v58  ;;  %v2356_v59 = vld [vmem:[%s5352_s11 + $0x1a4] sm:$0xff] }
 0x1d6   : > { %2992 = vmatmul.mubr.bf16.gmra.mrb[124].mxu0 %v5612_v25  ;;  %4408 = vmatmul.mubr.bf16.gmra.mrb[92].mxu1 %v3740_v43  ;;  %v3752_v43 = vcombine.low %v2403_v30, %v2405_v29 }
 0x1d7   : > { %2999 = vmatprep.mubr.bf16.mxu0 %v3754_v45  ;;  %4411 = vmatprep.mubr.bf16.mxu1 %v3743_v46 }
 0x1d9   : > { %v3921_v33 = vpop.f32.mrb[20].mxu0  ;;  %v4033_v25 = vpop.f32.mrb[20].mxu1 }
 0x1da   : > { %v3922_v47 = vpop.f32.mrb[21].mxu0  ;;  %v4034_v0 = vpop.f32.mrb[21].mxu1 }
 0x1db   : > { %v5841_v8 = vadd.f32 %v3922_v47, %v3921_v33  ;;  %v3924_v12 = vpop.f32.mrb[22].mxu0  ;;  %v5843_v13 = vadd.f32 %v4034_v0, %v4033_v25  ;;  %v4036_v14 = vpop.f32.mrb[22].mxu1  ;;  %v2420_v33 = vmul.bf16 %v5410_v50, %v2356_v59  ;;  %v2415_v25 = vmul.bf16 %v5412_v51, %v2351_v56 }
 0x1dc   : > { %v3925_v2 = vpop.f32.mrb[23].mxu0  ;;  %v4037_v19 = vpop.f32.mrb[23].mxu1  ;;  %v2417_v47 = vmul.bf16 %v5412_v51, %v2353_v49 }
 0x1dd   : > { %v5849_v11 = vadd.f32 %v3925_v2, %v3924_v12  ;;  %v5851_v28 = vadd.f32 %v4037_v19, %v4036_v14  ;;  %v3758_v14 = vcombine.low %v2411_v61, %v2413_v32  ;;  %v3763_v22 = vcombine.high %v2418_v3, %v2420_v33  ;;  %v2355_v19 = vld [vmem:[%s5352_s11 + $0x1a0] sm:$0xf] }
 0x1de   : > { %3000 = vmatmul.mubr.bf16.gmra.mrb[128].mxu0 %v3753_v34  ;;  %4412 = vmatmul.mubr.bf16.gmra.mrb[0].mxu1 %v3746_v5  ;;  %v3761_v2 = vcombine.low %v2415_v25, %v2417_v47  ;;  %v2419_v31 = vmul.bf16 %v5412_v51, %v2355_v19 }
 0x1df   : > { %3007 = vmatprep.mubr.bf16.mxu0 %v3757_v41  ;;  %4415 = vmatprep.mubr.bf16.mxu1 %v3749_v42 }
 0x1e1   : > { %v3927_v52 = vpop.f32.mrb[24].mxu0  ;;  %v4039_v20 = vpop.f32.mrb[24].mxu1 }
 0x1e2   : > { %v3928_v38 = vpop.f32.mrb[25].mxu0  ;;  %v4040_v39 = vpop.f32.mrb[25].mxu1 }
 0x1e3   : > { %v5858_v21 = vadd.f32 %v3928_v38, %v3927_v52  ;;  %v3930_v58 = vpop.f32.mrb[26].mxu0  ;;  %v5860_v45 = vadd.f32 %v4040_v39, %v4039_v20  ;;  %v4042_v46 = vpop.f32.mrb[26].mxu1 }
 0x1e4   : > { %v3931_v26 = vpop.f32.mrb[27].mxu0  ;;  %v4043_v37 = vpop.f32.mrb[27].mxu1 }
 0x1e5   : > { %v5867_v63 = vadd.f32 %v3931_v26, %v3930_v58  ;;  %v5869_v10 = vadd.f32 %v4043_v37, %v4042_v46 }
 0x1e6   : > { %3008 = vmatmul.mubr.bf16.gmra.mrb[132].mxu0 %v3756_v17  ;;  %4416 = vmatmul.mubr.bf16.gmra.mrb[4].mxu1 %v3752_v43  ;;  %v3762_v17 = vcombine.low %v2418_v3, %v2420_v33  ;;  %v3764_v43 = vcombine.low %v2419_v31, %v2421_v35 }
 0x1e7   : > { %3015 = vmatprep.mubr.bf16.mxu0 %v5667_v62  ;;  %4419 = vmatprep.mubr.bf16.mxu1 %v3755_v1 }
 0x1e9   : > { %v3933_v0 = vpop.f32.mrb[28].mxu0  ;;  %v4045_v34 = vpop.f32.mrb[28].mxu1 }
 0x1ea   : > { %v3934_v5 = vpop.f32.mrb[29].mxu0  ;;  %v4046_v12 = vpop.f32.mrb[29].mxu1 }
 0x1eb   : > { %v5878_v41 = vadd.f32 %v3934_v5, %v3933_v0  ;;  %v3936_v42 = vpop.f32.mrb[30].mxu0  ;;  %v5880_v40 = vadd.f32 %v4046_v12, %v4045_v34  ;;  %v4048_v62 = vpop.f32.mrb[30].mxu1 }
 0x1ec   : > { %v3937_v50 = vpop.f32.mrb[31].mxu0  ;;  %v4049_v23 = vpop.f32.mrb[31].mxu1 }
 0x1ed   : > { %v5884_v30 = vadd.f32 %v3937_v50, %v3936_v42  ;;  %v5886_v29 = vadd.f32 %v4049_v23, %v4048_v62 }
 0x1ee   : > { %3016 = vmatmul.mubr.bf16.gmra.mrb[136].mxu0 %v5677_v16  ;;  %4420 = vmatmul.mubr.bf16.gmra.mrb[8].mxu1 %v3758_v14 }
 0x1ef   : > { %3023 = vmatprep.mubr.bf16.mxu0 %v3763_v22  ;;  %4423 = vmatprep.mubr.bf16.mxu1 %v3761_v2 }
 0x1f1   : > { %v3939_v52 = vpop.f32.mrb[32].mxu0  ;;  %v4051_v20 = vpop.f32.mrb[32].mxu1 }
 0x1f2   : > { %v3940_v38 = vpop.f32.mrb[33].mxu0  ;;  %v4052_v39 = vpop.f32.mrb[33].mxu1 }
 0x1f3   : > { %v3941_v18 = vadd.f32 %v3940_v38, %v3939_v52  ;;  %v3942_v58 = vpop.f32.mrb[34].mxu0  ;;  %v5891_v46 = vadd.f32 %v4052_v39, %v4051_v20  ;;  %v4054_v1 = vpop.f32.mrb[34].mxu1 }
 0x1f4   : > { %v3943_v53 = vpop.f32.mrb[35].mxu0  ;;  %v4055_v16 = vpop.f32.mrb[35].mxu1 }
 0x1f5   : > { %v3944_v24 = vadd.f32 %v3943_v53, %v3942_v58  ;;  %v5893_v59 = vadd.f32 %v4055_v16, %v4054_v1 }
 0x1f6   : > { %3024 = vmatmul.mubr.bf16.gmra.mrb[140].mxu0 %v3762_v17  ;;  %4424 = vmatmul.mubr.bf16.gmra.mrb[12].mxu1 %v3764_v43 }
 0x1f9   : > { %v3945_v51 = vpop.f32.mrb[36].mxu0  ;;  %v4057_v26 = vpop.f32.mrb[36].mxu1 }
 0x1fa   : > { %v3946_v37 = vpop.f32.mrb[37].mxu0  ;;  %v4058_v56 = vpop.f32.mrb[37].mxu1 }
 0x1fb   : > { %v3947_v49 = vadd.f32 %v3946_v37, %v3945_v51  ;;  %v3948_v61 = vpop.f32.mrb[38].mxu0  ;;  %v5895_v32 = vadd.f32 %v4058_v56, %v4057_v26  ;;  %v4060_v3 = vpop.f32.mrb[38].mxu1  ;;  %v5907_v37 = vld [vmem:[#allocation7] ss:$0 sm:$0xff] }
 0x1fc   : > { %v3949_v33 = vpop.f32.mrb[39].mxu0  ;;  %v4061_v25 = vpop.f32.mrb[39].mxu1 }
 0x1fd   : > { %v3950_v47 = vadd.f32 %v3949_v33, %v3948_v61  ;;  %v5897_v0 = vadd.f32 %v4061_v25, %v4060_v3  ;;  %v4527_v3 = vadd.f32 %v3941_v18, %v5907_v37 }
 0x201   : > { %v3951_v34 = vpop.f32.mrb[40].mxu0  ;;  %v4063_v5 = vpop.f32.mrb[40].mxu1 }
 0x202   : > { %v3952_v12 = vpop.f32.mrb[41].mxu0  ;;  %v4064_v14 = vpop.f32.mrb[41].mxu1 }
 0x203   : > { %v3953_v42 = vadd.f32 %v3952_v12, %v3951_v34  ;;  %v3954_v62 = vpop.f32.mrb[42].mxu0  ;;  %v5899_v22 = vadd.f32 %v4064_v14, %v4063_v5  ;;  %v4066_v2 = vpop.f32.mrb[42].mxu1 }
 0x204   : > { %v3955_v19 = vpop.f32.mrb[43].mxu0  ;;  %v4067_v15 = vpop.f32.mrb[43].mxu1 }
 0x205   : > { %v3956_v50 = vadd.f32 %v3955_v19, %v3954_v62  ;;  %v5901_v23 = vadd.f32 %v4067_v15, %v4066_v2  ;;  %v4535_v62 = vadd.f32 %v3944_v24, %v5907_v37 }
 0x209   : > { %v3957_v31 = vpop.f32.mrb[44].mxu0  ;;  %v4069_v35 = vpop.f32.mrb[44].mxu1 }
 0x20a   : > { %v3958_v52 = vpop.f32.mrb[45].mxu0  ;;  %v4070_v20 = vpop.f32.mrb[45].mxu1 }
 0x20b   : > { %v3959_v38 = vadd.f32 %v3958_v52, %v3957_v31  ;;  %v3960_v39 = vpop.f32.mrb[46].mxu0  ;;  %v5903_v17 = vadd.f32 %v4070_v20, %v4069_v35  ;;  %v4072_v43 = vpop.f32.mrb[46].mxu1 }
 0x20c   : > { %v3961_v58 = vpop.f32.mrb[47].mxu0  ;;  %v4073_v1 = vpop.f32.mrb[47].mxu1 }
 0x20d   : > { %v3962_v53 = vadd.f32 %v3961_v58, %v3960_v39  ;;  %v5905_v16 = vadd.f32 %v4073_v1, %v4072_v43  ;;  %v4523_v39 = vadd.f32 %v3947_v49, %v5907_v37 }
 0x211   : > { %v3963_v51 = vpop.f32.mrb[48].mxu0  ;;  %v4075_v26 = vpop.f32.mrb[48].mxu1 }
 0x212   : > { %v3964_v56 = vpop.f32.mrb[49].mxu0  ;;  %v4076_v61 = vpop.f32.mrb[49].mxu1 }
 0x213   : > { %v5910_v33 = vadd.f32 %v3964_v56, %v3963_v51  ;;  %v4077_v25 = vadd.f32 %v4076_v61, %v4075_v26  ;;  %v3966_v34 = vpop.f32.mrb[50].mxu0  ;;  %v4078_v5 = vpop.f32.mrb[50].mxu1  ;;  %v4531_v56 = vadd.f32 %v3950_v47, %v5907_v37 }
 0x214   : > { %v3967_v12 = vpop.f32.mrb[51].mxu0  ;;  %v4079_v14 = vpop.f32.mrb[51].mxu1 }
 0x215   : > { %v5913_v2 = vadd.f32 %v4527_v3, %v4077_v25  ;;  %v5915_v19 = vadd.f32 %v3967_v12, %v3966_v34  ;;  %v4080_v15 = vadd.f32 %v4079_v14, %v4078_v5 }
 0x217   : > { %v5917_v31 = vadd.f32 %v4535_v62, %v4080_v15  ;;  %v4543_v62 = vadd.f32 %v3953_v42, %v5907_v37 }
 0x219   : > { %v3969_v35 = vpop.f32.mrb[52].mxu0  ;;  %v4081_v52 = vpop.f32.mrb[52].mxu1 }
 0x21a   : > { %v3970_v20 = vpop.f32.mrb[53].mxu0  ;;  %v4082_v18 = vpop.f32.mrb[53].mxu1 }
 0x21b   : > { %v5920_v43 = vadd.f32 %v3970_v20, %v3969_v35  ;;  %v4083_v58 = vadd.f32 %v4082_v18, %v4081_v52  ;;  %v3972_v1 = vpop.f32.mrb[54].mxu0  ;;  %v4084_v51 = vpop.f32.mrb[54].mxu1 }
 0x21c   : > { %v3973_v26 = vpop.f32.mrb[55].mxu0  ;;  %v4085_v24 = vpop.f32.mrb[55].mxu1 }
 0x21d   : > { %v5923_v61 = vadd.f32 %v4523_v39, %v4083_v58  ;;  %v5925_v3 = vadd.f32 %v3973_v26, %v3972_v1  ;;  %v4086_v25 = vadd.f32 %v4085_v24, %v4084_v51  ;;  %v4551_v39 = vadd.f32 %v3956_v50, %v5907_v37 }
 0x21f   : > { %6301 = vst [vmem:[#allocation18_spill] sm:$0xff] %v5923_v61  ;;  %v5927_v34 = vadd.f32 %v4531_v56, %v4086_v25 }
 0x221   : > { %6302 = vst [vmem:[#allocation19_spill] sm:$0xff] %v5927_v34  ;;  %v3975_v5 = vpop.f32.mrb[56].mxu0  ;;  %v4087_v12 = vpop.f32.mrb[56].mxu1 }
 0x222   : > { %v3976_v14 = vpop.f32.mrb[57].mxu0  ;;  %v4088_v49 = vpop.f32.mrb[57].mxu1 }
 0x223   : > { %v5930_v15 = vadd.f32 %v3976_v14, %v3975_v5  ;;  %v4089_v35 = vadd.f32 %v4088_v49, %v4087_v12  ;;  %v3978_v52 = vpop.f32.mrb[58].mxu0  ;;  %v4090_v20 = vpop.f32.mrb[58].mxu1  ;;  %v4539_v5 = vadd.f32 %v3959_v38, %v5907_v37 }
 0x224   : > { %v3979_v18 = vpop.f32.mrb[59].mxu0  ;;  %v4091_v47 = vpop.f32.mrb[59].mxu1 }
 0x225   : > { %v5933_v58 = vadd.f32 %v4543_v62, %v4089_v35  ;;  %v5935_v1 = vadd.f32 %v3979_v18, %v3978_v52  ;;  %v4092_v51 = vadd.f32 %v4091_v47, %v4090_v20  ;;  %v4547_v62 = vadd.f32 %v3962_v53, %v5907_v37 }
 0x226   : > { %v4443_v47 = vadd.f32 %v5774_v44, %v5907_v37  ;;  %v4453_v53 = vadd.f32 %v5780_v54, %v5907_v37  ;;  %v4458_v44 = vadd.f32 %v5766_v36, %v5907_v37 }
 0x227   : > { %v5937_v26 = vadd.f32 %v4551_v39, %v4092_v51  ;;  %v4448_v51 = vadd.f32 %v5760_v6, %v5907_v37 }
 0x229   : > { %v3981_v24 = vpop.f32.mrb[60].mxu0  ;;  %v4093_v56 = vpop.f32.mrb[60].mxu1 }
 0x22a   : > { %v3982_v25 = vpop.f32.mrb[61].mxu0  ;;  %v4094_v42 = vpop.f32.mrb[61].mxu1 }
 0x22b   : > { %v5940_v12 = vadd.f32 %v3982_v25, %v3981_v24  ;;  %v4095_v14 = vadd.f32 %v4094_v42, %v4093_v56  ;;  %v3984_v49 = vpop.f32.mrb[62].mxu0  ;;  %v4096_v34 = vpop.f32.mrb[62].mxu1 }
 0x22c   : > { %v3985_v61 = vpop.f32.mrb[63].mxu0  ;;  %v4097_v50 = vpop.f32.mrb[63].mxu1 }
 0x22d   : > { %v5943_v35 = vadd.f32 %v4539_v5, %v4095_v14  ;;  %v5945_v52 = vadd.f32 %v3985_v61, %v3984_v49  ;;  %v4098_v20 = vadd.f32 %v4097_v50, %v4096_v34  ;;  %v4559_v61 = vadd.f32 %v5910_v33, %v5907_v37 }
 0x22e   : > { %v4567_v49 = vadd.f32 %v5915_v19, %v5907_v37 }
 0x22f   : > { %v5947_v18 = vadd.f32 %v4547_v62, %v4098_v20 }
 0x231   : > { %v4301_v38 = vpop.f32.mrb[64].mxu0  ;;  %v4099_v39 = vpop.f32.mrb[64].mxu1 }
 0x232   : > { %v4444_v24 = vadd.f32 %v4443_v47, %v4301_v38  ;;  %v1204_v56 = vpop.f32.mrb[65].mxu0  ;;  %v4100_v25 = vpop.f32.mrb[65].mxu1 }
 0x233   : > { %v4449_v34 = vadd.f32 %v4448_v51, %v1204_v56  ;;  %v4101_v42 = vadd.f32 %v4100_v25, %v4099_v39  ;;  %v4302_v5 = vpop.f32.mrb[66].mxu0  ;;  %v4102_v14 = vpop.f32.mrb[66].mxu1 }
 0x234   : > { %v5962_v6 = vadd.f32 %v4444_v24, %v5843_v13  ;;  %v4454_v50 = vadd.f32 %v4453_v53, %v4302_v5  ;;  %v1207_v62 = vpop.f32.mrb[67].mxu0  ;;  %v4103_v20 = vpop.f32.mrb[67].mxu1  ;;  %v4463_v13 = vadd.f32 %v5802_v9, %v5907_v37  ;;  %v4478_v9 = vadd.f32 %v5794_v55, %v5907_v37 }
 0x235   : > { %v5965_v54 = vadd.f32 %v4449_v34, %v5823_v4  ;;  %v5967_v33 = vadd.f32 %v4559_v61, %v4101_v42  ;;  %v4459_v47 = vadd.f32 %v4458_v44, %v1207_v62  ;;  %v4104_v38 = vadd.f32 %v4103_v20, %v4102_v14 }
 0x236   : > { %v5970_v39 = vadd.f32 %v4454_v50, %v5851_v28  ;;  %v4468_v4 = vadd.f32 %v5788_v7, %v5907_v37  ;;  %v4473_v28 = vadd.f32 %v5810_v48, %v5907_v37  ;;  %v4563_v14 = vadd.f32 %v5925_v3, %v5907_v37 }
 0x237   : > { %v5973_v36 = vadd.f32 %v4459_v47, %v5832_v60  ;;  %v5975_v19 = vadd.f32 %v4567_v49, %v4104_v38  ;;  %v4555_v60 = vadd.f32 %v5920_v43, %v5907_v37 }
 0x239   : > { %v4305_v51 = vpop.f32.mrb[68].mxu0  ;;  %v4105_v24 = vpop.f32.mrb[68].mxu1 }
 0x23a   : > { %v4464_v56 = vadd.f32 %v4463_v13, %v4305_v51  ;;  %v1220_v25 = vpop.f32.mrb[69].mxu0  ;;  %v4106_v53 = vpop.f32.mrb[69].mxu1 }
 0x23b   : > { %v4469_v61 = vadd.f32 %v4468_v4, %v1220_v25  ;;  %v4107_v34 = vadd.f32 %v4106_v53, %v4105_v24  ;;  %v4306_v42 = vpop.f32.mrb[70].mxu0  ;;  %v4108_v5 = vpop.f32.mrb[70].mxu1 }
 0x23c   : > { %v5990_v7 = vadd.f32 %v4464_v56, %v5880_v40  ;;  %v4474_v44 = vadd.f32 %v4473_v28, %v4306_v42  ;;  %v1223_v49 = vpop.f32.mrb[71].mxu0  ;;  %v4109_v50 = vpop.f32.mrb[71].mxu1  ;;  %v4483_v40 = vadd.f32 %v5841_v8, %v5907_v37  ;;  %v4498_v8 = vadd.f32 %v5830_v57, %v5907_v37 }
 0x23d   : > { %v5993_v48 = vadd.f32 %v4469_v61, %v5860_v45  ;;  %v5995_v43 = vadd.f32 %v4555_v60, %v4107_v34  ;;  %v4479_v62 = vadd.f32 %v4478_v9, %v1223_v49  ;;  %v4110_v20 = vadd.f32 %v4109_v50, %v4108_v5 }
 0x23e   : > { %v5998_v47 = vadd.f32 %v4474_v44, %v5886_v29  ;;  %v4488_v45 = vadd.f32 %v5821_v27, %v5907_v37  ;;  %v4493_v29 = vadd.f32 %v5849_v11, %v5907_v37  ;;  %v4583_v60 = vadd.f32 %v5935_v1, %v5907_v37 }
 0x23f   : > { %v6001_v55 = vadd.f32 %v4479_v62, %v5869_v10  ;;  %v6003_v3 = vadd.f32 %v4563_v14, %v4110_v20  ;;  %v4575_v10 = vadd.f32 %v5930_v15, %v5907_v37 }
 0x241   : > { %v4309_v38 = vpop.f32.mrb[72].mxu0  ;;  %v4111_v13 = vpop.f32.mrb[72].mxu1 }
 0x242   : > { %v4484_v51 = vadd.f32 %v4483_v40, %v4309_v38  ;;  %v1236_v24 = vpop.f32.mrb[73].mxu0  ;;  %v4112_v4 = vpop.f32.mrb[73].mxu1 }
 0x243   : > { %v4489_v56 = vadd.f32 %v4488_v45, %v1236_v24  ;;  %v4113_v25 = vadd.f32 %v4112_v4, %v4111_v13  ;;  %v4310_v53 = vpop.f32.mrb[74].mxu0  ;;  %v4114_v28 = vpop.f32.mrb[74].mxu1 }
 0x244   : > { %v6018_v27 = vadd.f32 %v4484_v51, %v5895_v32  ;;  %v4494_v61 = vadd.f32 %v4493_v29, %v4310_v53  ;;  %v1239_v34 = vpop.f32.mrb[75].mxu0  ;;  %v4115_v42 = vpop.f32.mrb[75].mxu1  ;;  %v4503_v32 = vadd.f32 %v5878_v41, %v5907_v37  ;;  %v4518_v41 = vadd.f32 %v5867_v63, %v5907_v37 }
 0x245   : > { %v6021_v11 = vadd.f32 %v4489_v56, %v5891_v46  ;;  %v6023_v15 = vadd.f32 %v4575_v10, %v4113_v25  ;;  %v4499_v5 = vadd.f32 %v4498_v8, %v1239_v34  ;;  %v4116_v9 = vadd.f32 %v4115_v42, %v4114_v28 }
 0x246   : > { %v6026_v14 = vadd.f32 %v4494_v61, %v5897_v0  ;;  %v4508_v46 = vadd.f32 %v5858_v21, %v5907_v37  ;;  %v4513_v0 = vadd.f32 %v5884_v30, %v5907_v37  ;;  %v4579_v51 = vadd.f32 %v5945_v52, %v5907_v37 }
 0x247   : > { %v6029_v57 = vadd.f32 %v4499_v5, %v5893_v59  ;;  %v6031_v1 = vadd.f32 %v4583_v60, %v4116_v9  ;;  %v4571_v59 = vadd.f32 %v5940_v12, %v5907_v37 }
 0x249   : > { %v4313_v44 = vpop.f32.mrb[76].mxu0  ;;  %v4117_v49 = vpop.f32.mrb[76].mxu1 }
 0x24a   : > { %v4504_v50 = vadd.f32 %v4503_v32, %v4313_v44  ;;  %v1252_v62 = vpop.f32.mrb[77].mxu0  ;;  %v4118_v20 = vpop.f32.mrb[77].mxu1 }
 0x24b   : > { %v4509_v40 = vadd.f32 %v4508_v46, %v1252_v62  ;;  %v4119_v38 = vadd.f32 %v4118_v20, %v4117_v49  ;;  %v4314_v13 = vpop.f32.mrb[78].mxu0  ;;  %v4120_v45 = vpop.f32.mrb[78].mxu1 }
 0x24c   : > { %v6046_v21 = vadd.f32 %v4504_v50, %v5903_v17  ;;  %v4514_v24 = vadd.f32 %v4513_v0, %v4314_v13  ;;  %v1255_v4 = vpop.f32.mrb[79].mxu0  ;;  %v4121_v29 = vpop.f32.mrb[79].mxu1 }
 0x24d   : > { %v4510_v30 = vadd.f32 %v4509_v40, %v5899_v22  ;;  %v6049_v10 = vadd.f32 %v4571_v59, %v4119_v38  ;;  %v4519_v12 = vadd.f32 %v4518_v41, %v1255_v4  ;;  %v4122_v56 = vadd.f32 %v4121_v29, %v4120_v45 }
 0x24e   : > { %v6052_v25 = vadd.f32 %v4514_v24, %v5905_v16 }
 0x24f   : > { %v4520_v63 = vadd.f32 %v4519_v12, %v5901_v23  ;;  %v6055_v53 = vadd.f32 %v4579_v51, %v4122_v56 }
 0x251   : > { %v4163_v37 = vpop.f32.mrb[80].mxu0 }
 0x252   : > { %v4164_v52 = vpop.f32.mrb[81].mxu0 }
 0x253   : > { %v4165_v17 = vadd.f32 %v4164_v52, %v4163_v37  ;;  %v4166_v28 = vpop.f32.mrb[82].mxu0 }
 0x254   : > { %v4167_v8 = vpop.f32.mrb[83].mxu0 }
 0x255   : > { %v4168_v60 = vadd.f32 %v4167_v8, %v4166_v28  ;;  %v6058_v61 = vadd.f32 %v5965_v54, %v4165_v17 }
 0x257   : > { %v6061_v22 = vadd.f32 %v5973_v36, %v4168_v60 }
 0x259   : > { %v4169_v34 = vpop.f32.mrb[84].mxu0 }
 0x25a   : > { %v4170_v42 = vpop.f32.mrb[85].mxu0 }
 0x25b   : > { %v4171_v16 = vadd.f32 %v4170_v42, %v4169_v34  ;;  %v4172_v5 = vpop.f32.mrb[86].mxu0 }
 0x25c   : > { %v4173_v9 = vpop.f32.mrb[87].mxu0 }
 0x25d   : > { %v4174_v23 = vadd.f32 %v4173_v9, %v4172_v5  ;;  %v4446_v32 = vadd.f32 %v5962_v6, %v4171_v16 }
 0x25f   : > { %v6065_v44 = vadd.f32 %v5970_v39, %v4174_v23 }
 0x261   : > { %v4175_v49 = vpop.f32.mrb[88].mxu0 }
 0x262   : > { %v4176_v46 = vpop.f32.mrb[89].mxu0 }
 0x263   : > { %v4177_v50 = vadd.f32 %v4176_v46, %v4175_v49  ;;  %v4178_v62 = vpop.f32.mrb[90].mxu0 }
 0x264   : > { %v4179_v54 = vpop.f32.mrb[91].mxu0 }
 0x265   : > { %v4180_v20 = vadd.f32 %v4179_v54, %v4178_v62  ;;  %v6068_v36 = vadd.f32 %v5993_v48, %v4177_v50 }
 0x267   : > { %v6071_v0 = vadd.f32 %v6001_v55, %v4180_v20 }
 0x269   : > { %v4181_v59 = vpop.f32.mrb[92].mxu0 }
 0x26a   : > { %v4182_v40 = vpop.f32.mrb[93].mxu0 }
 0x26b   : > { %v4183_v38 = vadd.f32 %v4182_v40, %v4181_v59  ;;  %v4184_v13 = vpop.f32.mrb[94].mxu0 }
 0x26c   : > { %v4185_v6 = vpop.f32.mrb[95].mxu0 }
 0x26d   : > { %v4186_v45 = vadd.f32 %v4185_v6, %v4184_v13  ;;  %v6074_v39 = vadd.f32 %v5990_v7, %v4183_v38 }
 0x26f   : > { %v6077_v41 = vadd.f32 %v5998_v47, %v4186_v45 }
 0x271   : > { %v4187_v51 = vpop.f32.mrb[96].mxu0 }
 0x272   : > { %v4188_v24 = vpop.f32.mrb[97].mxu0 }
 0x273   : > { %v4189_v4 = vadd.f32 %v4188_v24, %v4187_v51  ;;  %v4190_v48 = vpop.f32.mrb[98].mxu0 }
 0x274   : > { %v4191_v29 = vpop.f32.mrb[99].mxu0 }
 0x275   : > { %v4192_v12 = vadd.f32 %v4191_v29, %v4190_v48  ;;  %v6080_v55 = vadd.f32 %v6021_v11, %v4189_v4 }
 0x277   : > { %v6083_v56 = vadd.f32 %v6029_v57, %v4192_v12 }
 0x279   : > { %v4193_v37 = vpop.f32.mrb[100].mxu0 }
 0x27a   : > { %v4194_v52 = vpop.f32.mrb[101].mxu0 }
 0x27b   : > { %v4195_v7 = vadd.f32 %v4194_v52, %v4193_v37  ;;  %v4196_v17 = vpop.f32.mrb[102].mxu0 }
 0x27c   : > { %v4197_v28 = vpop.f32.mrb[103].mxu0 }
 0x27d   : > { %v4198_v47 = vadd.f32 %v4197_v28, %v4196_v17  ;;  %v6086_v8 = vadd.f32 %v6018_v27, %v4195_v7 }
 0x27f   : > { %v6089_v60 = vadd.f32 %v6026_v14, %v4198_v47  ;;  %v3860_v14 = vld [vmem:[%s6096_s26 + $0x8] sm:$0xff]   ;;  %v3862_v47 = vld [vmem:[%s6096_s26 + $0x18] sm:$0xff]  }
 0x280   : > { %v3803_v24 = vunpack.c.h.bf16 %v3860_v14 }
 0x281   : > { %v4199_v34 = vpop.f32.mrb[104].mxu0 }
 0x282   : > { %v4200_v42 = vpop.f32.mrb[105].mxu0 }
 0x283   : > { %v4201_v11 = vadd.f32 %v4200_v42, %v4199_v34  ;;  %v4202_v16 = vpop.f32.mrb[106].mxu0 }
 0x284   : > { %v4203_v5 = vpop.f32.mrb[107].mxu0 }
 0x285   : > { %v4204_v57 = vadd.f32 %v4203_v5, %v4202_v16  ;;  %v6091_v9 = vadd.f32 %v4510_v30, %v4201_v11  ;;  %v3797_v30 = vld [vmem:[%s6096_s26] sm:$0xff]   ;;  %v3861_v16 = vld [vmem:[%s6096_s26 + $0x10] sm:$0xff]  }
 0x286   : > { %v3798_v13 = vunpack.c.l.bf16 %v3797_v30  ;;  %v3799_v12 = vunpack.c.h.bf16 %v3797_v30 }
 0x287   : > { %v6094_v23 = vadd.f32 %v4520_v63, %v4204_v57  ;;  %v3802_v63 = vunpack.c.l.bf16 %v3860_v14 }
 0x289   : > { %v4205_v49 = vpop.f32.mrb[108].mxu0 }
 0x28a   : > { %v4206_v46 = vpop.f32.mrb[109].mxu0 }
 0x28b   : > { %v4207_v50 = vadd.f32 %v4206_v46, %v4205_v49  ;;  %v4208_v27 = vpop.f32.mrb[110].mxu0 }
 0x28c   : > { %v4209_v62 = vpop.f32.mrb[111].mxu0 }
 0x28d   : > { %v4210_v54 = vadd.f32 %v4209_v62, %v4208_v27  ;;  %v6100_v20 = vadd.f32 %v6046_v21, %v4207_v50  ;;  %v3806_v50 = vunpack.c.l.bf16 %v3861_v16 }
 0x28f   : > { %v6104_v59 = vadd.f32 %v6052_v25, %v4210_v54  ;;  %v3811_v54 = vunpack.c.h.bf16 %v3862_v47 }
 0x291   : > { %v4211_v40 = vpop.f32.mrb[112].mxu0  ;;  %v4397_v38 = vpop.f32.mrb[80].mxu1 }
 0x292   : > { %v4447_v6 = vadd.f32 %v4446_v32, %v4397_v38  ;;  %v4212_v45 = vpop.f32.mrb[113].mxu0  ;;  %v3066_v51 = vpop.f32.mrb[81].mxu1  ;;  %v3807_v38 = vunpack.c.h.bf16 %v3861_v16 }
 0x293   : > { %v4213_v4 = vadd.f32 %v4212_v45, %v4211_v40  ;;  %v4452_v48 = vadd.f32 %v6058_v61, %v3066_v51  ;;  %v4214_v21 = vpop.f32.mrb[114].mxu0  ;;  %v4398_v29 = vpop.f32.mrb[82].mxu1 }
 0x294   : > { %v3291_v37 = vadd.f32 %v4447_v6, %v3802_v63  ;;  %v4457_v25 = vadd.f32 %v6065_v44, %v4398_v29  ;;  %v4215_v52 = vpop.f32.mrb[115].mxu0  ;;  %v3069_v7 = vpop.f32.mrb[83].mxu1  ;;  %v3810_v44 = vunpack.c.l.bf16 %v3862_v47 }
 0x295   : > { %v3289_v17 = vadd.f32 %v4452_v48, %v3798_v13  ;;  %v4216_v28 = vadd.f32 %v4215_v52, %v4214_v21  ;;  %v4462_v32 = vadd.f32 %v6061_v22, %v3069_v7  ;;  %v6112_v34 = vadd.f32 %v5913_v2, %v4213_v4  ;;  %v3864_v48 = vld [vmem:[%s6096_s26 + $0x28] sm:$0xff]   ;;  %v6303_v21 = vld [vmem:[#allocation18_spill] sm:$0xff] }
 0x296   : > { %v3323_v42 = vmax.f32 %v3291_v37, 0.0  ;;  %v3292_v11 = vadd.f32 %v4457_v25, %v3803_v24  ;;  %v3863_v37 = vld [vmem:[%s6096_s26 + $0x20] sm:$0xff]   ;;  %v6304_v7 = vld [vmem:[#allocation19_spill] sm:$0xff] }
 0x297   : > { %v3321_v61 = vmax.f32 %v3289_v17, 0.0  ;;  %v3290_v5 = vadd.f32 %v4462_v32, %v3799_v12  ;;  %v6116_v57 = vadd.f32 %v5917_v31, %v4216_v28  ;;  %v3818_v28 = vunpack.c.l.bf16 %v3864_v48 }
 0x298   : > { %3355 = vst [vmem:[%s6118_s15 + $0x10] sm:$0xff] %v3323_v42  ;;  %v3324_v22 = vmax.f32 %v3292_v11, 0.0  ;;  %v3814_v42 = vunpack.c.l.bf16 %v3863_v37 }
 0x299   : > { %3353 = vst [vmem:[%s6118_s15] sm:$0xff] %v3321_v61  ;;  %v3322_v2 = vmax.f32 %v3290_v5, 0.0  ;;  %v4217_v49 = vpop.f32.mrb[116].mxu0  ;;  %v4401_v46 = vpop.f32.mrb[84].mxu1  ;;  %v3819_v5 = vunpack.c.h.bf16 %v3864_v48 }
 0x29a   : > { %3356 = vst [vmem:[%s6118_s15 + $0x18] sm:$0xff] %v3324_v22  ;;  %v4467_v27 = vadd.f32 %v6074_v39, %v4401_v46  ;;  %v4218_v62 = vpop.f32.mrb[117].mxu0  ;;  %v3082_v31 = vpop.f32.mrb[85].mxu1  ;;  %v3815_v46 = vunpack.c.h.bf16 %v3863_v37 }
 0x29b   : > { %3354 = vst [vmem:[%s6118_s15 + $0x8] sm:$0xff] %v3322_v2  ;;  %v4219_v14 = vadd.f32 %v4218_v62, %v4217_v49  ;;  %v4472_v30 = vadd.f32 %v6068_v36, %v3082_v31  ;;  %v4220_v63 = vpop.f32.mrb[118].mxu0  ;;  %v4402_v40 = vpop.f32.mrb[86].mxu1 }
 0x29c   : > { %v3295_v13 = vadd.f32 %v4467_v27, %v3810_v44  ;;  %v4477_v6 = vadd.f32 %v6077_v41, %v4402_v40  ;;  %v4221_v45 = vpop.f32.mrb[119].mxu0  ;;  %v3085_v51 = vpop.f32.mrb[87].mxu1 }
 0x29d   : > { %v3293_v39 = vadd.f32 %v4472_v30, %v3806_v50  ;;  %v4222_v24 = vadd.f32 %v4221_v45, %v4220_v63  ;;  %v4482_v4 = vadd.f32 %v6071_v0, %v3085_v51  ;;  %v6130_v29 = vadd.f32 %v6303_v21, %v4219_v14  ;;  %v3866_v30 = vld [vmem:[%s6096_s26 + $0x38] sm:$0xff]  }
 0x29e   : > { %v3327_v36 = vmax.f32 %v3295_v13, 0.0  ;;  %v3296_v12 = vadd.f32 %v4477_v6, %v3811_v54  ;;  %v3826_v51 = vunpack.c.l.bf16 %v3866_v30 }
 0x29f   : > { %v3325_v25 = vmax.f32 %v3293_v39, 0.0  ;;  %v3294_v52 = vadd.f32 %v4482_v4, %v3807_v38  ;;  %v6134_v41 = vadd.f32 %v6304_v7, %v4222_v24  ;;  %v3865_v38 = vld [vmem:[%s6096_s26 + $0x30] sm:$0xff]  }
 0x2a0   : > { %3359 = vst [vmem:[%s6118_s15 + $0x30] sm:$0xff] %v3327_v36  ;;  %v3328_v17 = vmax.f32 %v3296_v12, 0.0  ;;  %v3822_v4 = vunpack.c.l.bf16 %v3865_v38  ;;  %v3827_v36 = vunpack.c.h.bf16 %v3866_v30 }
 0x2a1   : > { %3357 = vst [vmem:[%s6118_s15 + $0x20] sm:$0xff] %v3325_v25  ;;  %v3326_v32 = vmax.f32 %v3294_v52, 0.0  ;;  %v4223_v0 = vpop.f32.mrb[120].mxu0  ;;  %v4405_v47 = vpop.f32.mrb[88].mxu1  ;;  %v3823_v52 = vunpack.c.h.bf16 %v3865_v38 }
 0x2a2   : > { %3360 = vst [vmem:[%s6118_s15 + $0x38] sm:$0xff] %v3328_v17  ;;  %v4487_v11 = vadd.f32 %v6086_v8, %v4405_v47  ;;  %v4224_v16 = vpop.f32.mrb[121].mxu0  ;;  %v3098_v61 = vpop.f32.mrb[89].mxu1 }
 0x2a3   : > { %3358 = vst [vmem:[%s6118_s15 + $0x28] sm:$0xff] %v3326_v32  ;;  %v4225_v22 = vadd.f32 %v4224_v16, %v4223_v0  ;;  %v4492_v44 = vadd.f32 %v6080_v55, %v3098_v61  ;;  %v4226_v2 = vpop.f32.mrb[122].mxu0  ;;  %v4406_v49 = vpop.f32.mrb[90].mxu1  ;;  %v3867_v61 = vld [vmem:[%s6096_s26 + $0x40] sm:$0xff]  }
 0x2a4   : > { %v3299_v50 = vadd.f32 %v4487_v11, %v3818_v28  ;;  %v4497_v27 = vadd.f32 %v6089_v60, %v4406_v49  ;;  %v4227_v62 = vpop.f32.mrb[123].mxu0  ;;  %v3101_v31 = vpop.f32.mrb[91].mxu1  ;;  %v3831_v30 = vunpack.c.h.bf16 %v3867_v61 }
 0x2a5   : > { %v3297_v8 = vadd.f32 %v4492_v44, %v3814_v42  ;;  %v4228_v54 = vadd.f32 %v4227_v62, %v4226_v2  ;;  %v4502_v14 = vadd.f32 %v6083_v56, %v3101_v31  ;;  %v6146_v63 = vadd.f32 %v5933_v58, %v4225_v22  ;;  %v3868_v42 = vld [vmem:[%s6096_s26 + $0x48] sm:$0xff]  }
 0x2a6   : > { %v3331_v55 = vmax.f32 %v3299_v50, 0.0  ;;  %v3300_v40 = vadd.f32 %v4497_v27, %v3819_v5  ;;  %v3834_v2 = vunpack.c.l.bf16 %v3868_v42  ;;  %v3835_v31 = vunpack.c.h.bf16 %v3868_v42 }
 0x2a7   : > { %v3329_v13 = vmax.f32 %v3297_v8, 0.0  ;;  %v3298_v6 = vadd.f32 %v4502_v14, %v3815_v46  ;;  %v6150_v60 = vadd.f32 %v5937_v26, %v4228_v54 }
 0x2a8   : > { %3363 = vst [vmem:[%s6118_s15 + $0x50] sm:$0xff] %v3331_v55  ;;  %v3332_v45 = vmax.f32 %v3300_v40, 0.0 }
 0x2a9   : > { %3361 = vst [vmem:[%s6118_s15 + $0x40] sm:$0xff] %v3329_v13  ;;  %v3330_v39 = vmax.f32 %v3298_v6, 0.0  ;;  %v4229_v56 = vpop.f32.mrb[124].mxu0  ;;  %v4409_v24 = vpop.f32.mrb[92].mxu1 }
 0x2aa   : > { %3364 = vst [vmem:[%s6118_s15 + $0x58] sm:$0xff] %v3332_v45  ;;  %v4507_v58 = vadd.f32 %v6100_v20, %v4409_v24  ;;  %v4230_v48 = vpop.f32.mrb[125].mxu0  ;;  %v3114_v21 = vpop.f32.mrb[93].mxu1  ;;  %v3869_v24 = vld [vmem:[%s6096_s26 + $0x50] sm:$0xff]  }
 0x2ab   : > { %3362 = vst [vmem:[%s6118_s15 + $0x48] sm:$0xff] %v3330_v39  ;;  %v4231_v12 = vadd.f32 %v4230_v48, %v4229_v56  ;;  %v4512_v26 = vadd.f32 %v6091_v9, %v3114_v21  ;;  %v4232_v37 = vpop.f32.mrb[126].mxu0  ;;  %v4410_v25 = vpop.f32.mrb[94].mxu1 }
 0x2ac   : > { %v3303_v7 = vadd.f32 %v4507_v58, %v3826_v51  ;;  %v4517_v17 = vadd.f32 %v6104_v59, %v4410_v25  ;;  %v4233_v28 = vpop.f32.mrb[127].mxu0  ;;  %v3117_v32 = vpop.f32.mrb[95].mxu1  ;;  %v3870_v51 = vld [vmem:[%s6096_s26 + $0x58] sm:$0xff]  }
 0x2ad   : > { %v3301_v20 = vadd.f32 %v4512_v26, %v3822_v4  ;;  %v4234_v0 = vadd.f32 %v4233_v28, %v4232_v37  ;;  %v4522_v47 = vadd.f32 %v6094_v23, %v3117_v32  ;;  %v4541_v11 = vadd.f32 %v5943_v35, %v4231_v12 }
 0x2ae   : > { %v3335_v16 = vmax.f32 %v3303_v7, 0.0  ;;  %v3304_v9 = vadd.f32 %v4517_v17, %v3827_v36  ;;  %v3830_v23 = vunpack.c.l.bf16 %v3867_v61  ;;  %v3842_v21 = vunpack.c.l.bf16 %v3870_v51 }
 0x2af   : > { %v3333_v5 = vmax.f32 %v3301_v20, 0.0  ;;  %v3302_v22 = vadd.f32 %v4522_v47, %v3823_v52  ;;  %v4549_v44 = vadd.f32 %v5947_v18, %v4234_v0  ;;  %v3843_v52 = vunpack.c.h.bf16 %v3870_v51 }
 0x2b0   : > { %3367 = vst [vmem:[%s6118_s15 + $0x70] sm:$0xff] %v3335_v16  ;;  %v3336_v59 = vmax.f32 %v3304_v9, 0.0  ;;  %v3839_v32 = vunpack.c.h.bf16 %v3869_v24 }
 0x2b1   : > { %3365 = vst [vmem:[%s6118_s15 + $0x60] sm:$0xff] %v3333_v5  ;;  %v3334_v49 = vmax.f32 %v3302_v22, 0.0  ;;  %v4235_v46 = vpop.f32.mrb[128].mxu0  ;;  %v4413_v50 = vpop.f32.mrb[0].mxu1  ;;  %v3872_v5 = vld [vmem:[%s6096_s26 + $0x68] sm:$0xff]  }
 0x2b2   : > { %3368 = vst [vmem:[%s6118_s15 + $0x78] sm:$0xff] %v3336_v59  ;;  %v4526_v27 = vadd.f32 %v6130_v29, %v4413_v50  ;;  %v4236_v35 = vpop.f32.mrb[129].mxu0  ;;  %v3130_v62 = vpop.f32.mrb[1].mxu1  ;;  %v3850_v50 = vunpack.c.l.bf16 %v3872_v5 }
 0x2b3   : > { %3366 = vst [vmem:[%s6118_s15 + $0x68] sm:$0xff] %v3334_v49  ;;  %v4237_v8 = vadd.f32 %v4236_v35, %v4235_v46  ;;  %v4530_v18 = vadd.f32 %v6112_v34, %v3130_v62  ;;  %v4238_v54 = vpop.f32.mrb[130].mxu0  ;;  %v4414_v14 = vpop.f32.mrb[2].mxu1 }
 0x2b4   : > { %v3307_v55 = vadd.f32 %v4526_v27, %v3834_v2  ;;  %v4534_v40 = vadd.f32 %v6134_v41, %v4414_v14  ;;  %v4239_v38 = vpop.f32.mrb[131].mxu0  ;;  %v3133_v13 = vpop.f32.mrb[3].mxu1 }
 0x2b5   : > { %v3305_v29 = vadd.f32 %v4530_v18, %v3830_v23  ;;  %v4240_v6 = vadd.f32 %v4239_v38, %v4238_v54  ;;  %v4538_v45 = vadd.f32 %v6116_v57, %v3133_v13  ;;  %v4561_v39 = vadd.f32 %v5967_v33, %v4237_v8 }
 0x2b6   : > { %v3339_v56 = vmax.f32 %v3307_v55, 0.0  ;;  %v3308_v34 = vadd.f32 %v4534_v40, %v3835_v31  ;;  %v3838_v57 = vunpack.c.l.bf16 %v3869_v24  ;;  %v3851_v8 = vunpack.c.h.bf16 %v3872_v5 }
 0x2b7   : > { %v3337_v4 = vmax.f32 %v3305_v29, 0.0  ;;  %v3306_v58 = vadd.f32 %v4538_v45, %v3831_v30  ;;  %v4569_v48 = vadd.f32 %v5975_v19, %v4240_v6 }
 0x2b8   : > { %3371 = vst [vmem:[%s6118_s15 + $0x90] sm:$0xff] %v3339_v56  ;;  %v3340_v41 = vmax.f32 %v3308_v34, 0.0 }
 0x2b9   : > { %3369 = vst [vmem:[%s6118_s15 + $0x80] sm:$0xff] %v3337_v4  ;;  %v3338_v36 = vmax.f32 %v3306_v58, 0.0  ;;  %v4241_v12 = vpop.f32.mrb[132].mxu0  ;;  %v4417_v26 = vpop.f32.mrb[4].mxu1 }
 0x2ba   : > { %3372 = vst [vmem:[%s6118_s15 + $0x98] sm:$0xff] %v3340_v41  ;;  %v4542_v37 = vadd.f32 %v4541_v11, %v4417_v26  ;;  %v4242_v25 = vpop.f32.mrb[133].mxu0  ;;  %v3146_v33 = vpop.f32.mrb[5].mxu1  ;;  %v3874_v26 = vld [vmem:[%s6096_s26 + $0x78] sm:$0xff]  }
 0x2bb   : > { %3370 = vst [vmem:[%s6118_s15 + $0x88] sm:$0xff] %v3338_v36  ;;  %v4243_v7 = vadd.f32 %v4242_v25, %v4241_v12  ;;  %v4546_v17 = vadd.f32 %v6146_v63, %v3146_v33  ;;  %v4244_v19 = vpop.f32.mrb[134].mxu0  ;;  %v4418_v28 = vpop.f32.mrb[6].mxu1  ;;  %v3871_v63 = vld [vmem:[%s6096_s26 + $0x60] sm:$0xff]  }
 0x2bc   : > { %v3311_v20 = vadd.f32 %v4542_v37, %v3842_v21  ;;  %v4550_v0 = vadd.f32 %v4549_v44, %v4418_v28  ;;  %v4245_v47 = vpop.f32.mrb[135].mxu0  ;;  %v3149_v42 = vpop.f32.mrb[7].mxu1 }
 0x2bd   : > { %v3309_v16 = vadd.f32 %v4546_v17, %v3838_v57  ;;  %v4246_v11 = vadd.f32 %v4245_v47, %v4244_v19  ;;  %v4554_v9 = vadd.f32 %v6150_v60, %v3149_v42  ;;  %v4557_v61 = vadd.f32 %v5995_v43, %v4243_v7 }
 0x2be   : > { %v3343_v22 = vmax.f32 %v3311_v20, 0.0  ;;  %v3312_v59 = vadd.f32 %v4550_v0, %v3843_v52  ;;  %v3846_v60 = vunpack.c.l.bf16 %v3871_v63  ;;  %v3858_v17 = vunpack.c.l.bf16 %v3874_v26 }
 0x2bf   : > { %v3341_v2 = vmax.f32 %v3309_v16, 0.0  ;;  %v3310_v49 = vadd.f32 %v4554_v9, %v3839_v32  ;;  %v4565_v46 = vadd.f32 %v6003_v3, %v4246_v11  ;;  %v3847_v3 = vunpack.c.h.bf16 %v3871_v63 }
 0x2c0   : > { %3375 = vst [vmem:[%s6118_s15 + $0xb0] sm:$0xff] %v3343_v22  ;;  %v3344_v44 = vmax.f32 %v3312_v59, 0.0  ;;  %v3859_v47 = vunpack.c.h.bf16 %v3874_v26 }
 0x2c1   : > { %3373 = vst [vmem:[%s6118_s15 + $0xa0] sm:$0xff] %v3341_v2  ;;  %v3342_v23 = vmax.f32 %v3310_v49, 0.0  ;;  %v4247_v27 = vpop.f32.mrb[136].mxu0  ;;  %v4421_v35 = vpop.f32.mrb[8].mxu1 }
 0x2c2   : > { %3376 = vst [vmem:[%s6118_s15 + $0xb8] sm:$0xff] %v3344_v44  ;;  %v4558_v43 = vadd.f32 %v4557_v61, %v4421_v35  ;;  %v4248_v62 = vpop.f32.mrb[137].mxu0  ;;  %v3162_v31 = vpop.f32.mrb[9].mxu1 }
 0x2c3   : > { %3374 = vst [vmem:[%s6118_s15 + $0xa8] sm:$0xff] %v3342_v23  ;;  %v4249_v18 = vadd.f32 %v4248_v62, %v4247_v27  ;;  %v4562_v54 = vadd.f32 %v4561_v39, %v3162_v31  ;;  %v4250_v14 = vpop.f32.mrb[138].mxu0  ;;  %v4422_v30 = vpop.f32.mrb[10].mxu1  ;;  %v3873_v39 = vld [vmem:[%s6096_s26 + $0x70] sm:$0xff]  }
 0x2c4   : > { %v3315_v55 = vadd.f32 %v4558_v43, %v3850_v50  ;;  %v4566_v40 = vadd.f32 %v4565_v46, %v4422_v30  ;;  %v4251_v38 = vpop.f32.mrb[139].mxu0  ;;  %v3165_v13 = vpop.f32.mrb[11].mxu1  ;;  %v3854_v57 = vunpack.c.l.bf16 %v3873_v39  ;;  %v3855_v7 = vunpack.c.h.bf16 %v3873_v39 }
 0x2c5   : > { %v3313_v29 = vadd.f32 %v4562_v54, %v3846_v60  ;;  %v4252_v6 = vadd.f32 %v4251_v38, %v4250_v14  ;;  %v4570_v45 = vadd.f32 %v4569_v48, %v3165_v13  ;;  %v4577_v51 = vadd.f32 %v6023_v15, %v4249_v18 }
 0x2c6   : > { %v3347_v56 = vmax.f32 %v3315_v55, 0.0  ;;  %v3316_v34 = vadd.f32 %v4566_v40, %v3851_v8 }
 0x2c7   : > { %v3345_v24 = vmax.f32 %v3313_v29, 0.0  ;;  %v3314_v4 = vadd.f32 %v4570_v45, %v3847_v3  ;;  %v4585_v58 = vadd.f32 %v6031_v1, %v4252_v6 }
 0x2c8   : > { %3379 = vst [vmem:[%s6118_s15 + $0xd0] sm:$0xff] %v3347_v56  ;;  %v3348_v41 = vmax.f32 %v3316_v34, 0.0 }
 0x2c9   : > { %3377 = vst [vmem:[%s6118_s15 + $0xc0] sm:$0xff] %v3345_v24  ;;  %v3346_v21 = vmax.f32 %v3314_v4, 0.0  ;;  %v4253_v36 = vpop.f32.mrb[140].mxu0  ;;  %v4425_v12 = vpop.f32.mrb[12].mxu1 }
 0x2ca   : > { %3380 = vst [vmem:[%s6118_s15 + $0xd8] sm:$0xff] %v3348_v41  ;;  %v4254_v48 = vpop.f32.mrb[141].mxu0  ;;  %v3178_v37 = vpop.f32.mrb[13].mxu1 }
 0x2cb   : > { %3378 = vst [vmem:[%s6118_s15 + $0xc8] sm:$0xff] %v3346_v21  ;;  %v4255_v15 = vadd.f32 %v4254_v48, %v4253_v36  ;;  %v4578_v25 = vadd.f32 %v4577_v51, %v3178_v37  ;;  %v4256_v33 = vpop.f32.mrb[142].mxu0  ;;  %v4426_v52 = vpop.f32.mrb[14].mxu1 }
 0x2cc   : > { %v4257_v1 = vpop.f32.mrb[143].mxu0  ;;  %v3181_v19 = vpop.f32.mrb[15].mxu1 }
 0x2cd   : > { %v4573_v28 = vadd.f32 %v6049_v10, %v4255_v15  ;;  %v3317_v32 = vadd.f32 %v4578_v25, %v3854_v57  ;;  %v4258_v20 = vadd.f32 %v4257_v1, %v4256_v33  ;;  %v4586_v0 = vadd.f32 %v4585_v58, %v3181_v19 }
 0x2cf   : > { %v4574_v42 = vadd.f32 %v4573_v28, %v4425_v12  ;;  %v3349_v16 = vmax.f32 %v3317_v32, 0.0  ;;  %v4581_v11 = vadd.f32 %v6055_v53, %v4258_v20  ;;  %v3318_v9 = vadd.f32 %v4586_v0, %v3855_v7 }
 0x2d1   : > { %v3319_v61 = vadd.f32 %v4574_v42, %v3858_v17  ;;  %3381 = vst [vmem:[%s6118_s15 + $0xe0] sm:$0xff] %v3349_v16  ;;  %v4582_v5 = vadd.f32 %v4581_v11, %v4426_v52  ;;  %v3350_v22 = vmax.f32 %v3318_v9, 0.0 }
 0x2d3   : > { %v3351_v10 = vmax.f32 %v3319_v61, 0.0  ;;  %v3320_v59 = vadd.f32 %v4582_v5, %v3859_v47  ;;  %3382 = vst [vmem:[%s6118_s15 + $0xe8] sm:$0xff] %v3350_v22 }
 0x2d5   : > { %3383 = vst [vmem:[%s6118_s15 + $0xf0] sm:$0xff] %v3351_v10  ;;  %v3352_v53 = vmax.f32 %v3320_v59, 0.0 }
 0x2d7   : > { %3384 = vst [vmem:[%s6118_s15 + $0xf8] sm:$0xff] %v3352_v53 }
 0x2d8   : > { %4972 = shalt.err (!%p4969_p5)
}
 0x2d9   : > { %s4973_s17 = scalar_lea.hbm %s6207_s14, 4096  ;;  %s4977_s30 = scalar_lea.hbm %s6265_s5, 8192 }
 0x2da   : > { %p4974_p2 = scmp.ne.s32.totalorder %s6207_s14, %s4973_s17  ;;  %p4978_p9 = scmp.lt.u32.totalorder %s6207_s14, %s6265_s5 }
 0x2db   : > { %p4979_p3 = scmp.lt.u32.totalorder %s4977_s30, %s4973_s17  ;;  %p4981_p8 = scmp.lt.u32.totalorder %s4973_s17, %s6207_s14 }
 0x2dc   : > { %p4975_p4 = pnand %p4974_p2, %p6305_p11 }
 0x2dd   : > { %p4980_p1 = por %p4979_p3, %p4978_p9 }
 0x2de   : > { %p4976_p7 = pneg %p4975_p4 }
 0x2df   : > { %p4982_p13 = por %p4981_p8, %p4980_p1 }
 0x2e1   : > { %p4983_p6 = pnand %p4982_p13, %p4976_p7 }
 0x2e3   : > { %4986 = shalt.err (!%p4983_p6)
}
 0x2e4   : > { %s5062_s24 = smov 128   ;;  %s5063_s26 = smov 8  }
 0x2e5   : > { %4655 = dma.vmem_to_hbm [thread:$0]  (%p6305_p11), %s6209_s3, 4096, %s6207_s14, %s3386_s12, %s5062_s24, %s5062_s24, %s5063_s26  }
 0x2e6 PF: > { %s3416_s1 = sand.u32 1, %s5029_s18   ;;  %p6306_p12 = scmp.ne.s32.totalorder %s6280_s27, 0 }
 0x2e7   : > { %p6307_p0 = scmp.ge.s32.totalorder %s5049_s23, 2  ;;  %s3417_s15 = scalar_lea.sflag [#allocation4], %s3416_s1 }
 0x2e9   : > { %p4675_p10 = pnand %p6307_p0, %p6306_p12 }
 0x2eb   : > { %5024 = dma.done.wait (!%p4675_p10), %s3417_s15, 4096  }
 0x2ec   : > { %5026 = vsyncadd (!%p4675_p10), %s3417_s15, 4294963200  ;;  %s25_s23 = sadd.s32 1, %s5049_s23   ;;  %s6308_s7 = sld [smem:[#allocation17_spill]] }
 0x2ed   : > { %p22_p5 = scmp.ge.s32.totalorder %s25_s23, 4   ;;  %s6309_s9 = sld [smem:[#allocation16_spill]] }
 0x2ee   : > { %s6310_s18 = smov %s5033_s19  ;;  %s6311_s19 = smov %s5037_s20 }
 0x2ef   : > { %s6313_s21 = smov %s5045_s22  ;;  %24 = sbr.rel (!%p22_p5) target bundleno = 13 (0xd), region = 119 }
 0x2f2   : > { %s6312_s20 = smov %s6308_s7 }
 0x2f3   : > { %s6314_s22 = smov %s6309_s9 }
 0x2f6   :  { %3422 = vsyncpa [#allocation3], 1 }
 0x2f7   :  { %3424 = vsyncpa [#allocation3 + $0x1], 1 }
 0x2f8   :  { %3425 = vsyncpa [#allocation6], 1 }
 0x2f9   :  { %3426 = vsyncpa [#allocation9], 1 }
 0x2fa   :  { %3428 = vsyncpa [#allocation9 + $0x1], 1 }
 0x2fb   :  { %3429 = vsyncpa [#allocation4], 1 }
 0x2fc   :  { %3431 = vsyncpa [#allocation4 + $0x1], 1 }

</bundles_post_ra>
